<compile_context>
chip_gen: v6e
topology: v6e:2x2x1
jax: 0.10.0
libtpu: 0.0.40
codegen_flags: <defaults>
</compile_context>

<pallas_src>
import math
import functools

import jax
import jax.numpy as jnp
from jax import lax
from jax.experimental import pallas as pl
from jax.experimental.pallas import tpu as pltpu


def _largest_divisor(n, candidates):
    for c in candidates:
        if c <= n and n % c == 0:
            return c
    return n


# --------------------- grouped Conv1d + ReLU + BatchNorm ---------------------

def _conv_bn_relu_kernel(x_ref, w_ref, s_ref, b_ref, o_ref):
    # x_ref: (1, 1, Lp, Cin)  w_ref: (1, K, Cin, Cout)  s_ref/b_ref: (1, 1, Cout)
    # o_ref: (1, 1, Lout, Cout)
    K = w_ref.shape[1]
    Lout, Cout = o_ref.shape[2], o_ref.shape[3]
    acc = jnp.zeros((Lout, Cout), jnp.float32)
    for k in range(K):                                         # static unroll over taps
        acc = acc + jnp.dot(x_ref[0, 0, k:k + Lout, :], w_ref[0, k, :, :],
                            preferred_element_type=jnp.float32)
    y = jnp.maximum(acc, 0.0) * s_ref[0] + b_ref[0]            # ReLU + folded eval-BN epilogue
    o_ref[...] = y[None, None, :, :]


def conv_group(x, w, scale, bias):
    """Grouped stride-1 Conv1d(+ReLU+BN) over G = 3*h branches (stride applied by the caller).

    x: (Gx, B, Lin, Cin) with Gx in {1, G} (Gx==1 -> same input for every group, no broadcast in HBM)
    w: (G, K, Cin, Cout); scale/bias: (G, 1, Cout).  Returns (G, B, Lin, Cout) float32."""
    Gx, B, Lin, Cin = x.shape
    G, K, _, Cout = w.shape
    pad = (K - 1) // 2
    xp = jnp.pad(x, ((0, 0), (0, 0), (pad, pad), (0, 0)))
    Lp = Lin + 2 * pad
    x_idx = (lambda g, b: (0, b, 0, 0)) if Gx == 1 else (lambda g, b: (g, b, 0, 0))
    return pl.pallas_call(
        _conv_bn_relu_kernel,
        out_shape=jax.ShapeDtypeStruct((G, B, Lin, Cout), jnp.float32),
        grid=(G, B),
        in_specs=[pl.BlockSpec((1, 1, Lp, Cin), x_idx),
                  pl.BlockSpec((1, K, Cin, Cout), lambda g, b: (g, 0, 0, 0)),
                  pl.BlockSpec((1, 1, Cout), lambda g, b: (g, 0, 0)),
                  pl.BlockSpec((1, 1, Cout), lambda g, b: (g, 0, 0))],
        out_specs=pl.BlockSpec((1, 1, Lin, Cout), lambda g, b: (g, b, 0, 0)),
        compiler_params=pltpu.CompilerParams(
            dimension_semantics=("parallel", "parallel")),
    )(xp, w, scale, bias)


# -------------- fused sliding-window + global-key Longformer attention --------------

def _local_attn_kernel(q_ref, k_ref, v_ref, kg_ref, vg_ref, o_ref, *,
                       w, L, interval, Tq, S):
    t = pl.program_id(1)
    start = pl.multiple_of(t * Tq, Tq)        # offset into the w-padded key/value buffers
    q = q_ref[...]                            # (n, Tq, D), already scaled by 1/sqrt(D)
    ks = k_ref[:, pl.ds(start, S), :]         # (n, Tq+2w, D) sliding-window key span
    vs = v_ref[:, pl.ds(start, S), :]
    kg = kg_ref[...]                          # (n, G, D) keys/values at the global positions
    vg = vg_ref[...]

    s_g = jnp.einsum('nqd,ngd->nqg', q, kg, preferred_element_type=jnp.float32)
    s_l = jnp.einsum('nqd,nsd->nqs', q, ks, preferred_element_type=jnp.float32)

    # band + range mask (== _mask_invalid_locations) and the -10000 diagonal_mask at global keys
    r = lax.broadcasted_iota(jnp.int32, (Tq, S), 0)
    c = lax.broadcasted_iota(jnp.int32, (Tq, S), 1)
    j_abs = start + c - w                     # absolute key position of span slot c
    valid = (c >= r) & (c <= r + 2 * w) & (j_abs >= 0) & (j_abs < L)
    penalty = jnp.where(j_abs % interval == 0, -10000.0, 0.0)
    s_l = s_l + jnp.where(valid, penalty, -jnp.inf)[None, :, :]

    # softmax over [global columns | local band] and PV, all in VMEM
    m = jnp.maximum(jnp.max(s_g, axis=-1), jnp.max(s_l, axis=-1))[..., None]
    e_g = jnp.exp(s_g - m)
    e_l = jnp.exp(s_l - m)
    denom = jnp.sum(e_g, axis=-1, keepdims=True) + jnp.sum(e_l, axis=-1, keepdims=True)
    ctx = (jnp.einsum('nqg,ngd->nqd', e_g, vg, preferred_element_type=jnp.float32) +
           jnp.einsum('nqs,nsd->nqd', e_l, vs, preferred_element_type=jnp.float32))
    o_ref[...] = ctx * pl.reciprocal(denom, approx=True)


def longformer_local_attention(q, k, v, kg, vg, *, w, interval):
    BH, L, D = q.shape
    G = kg.shape[1]
    Tq = _largest_divisor(L, (256, 128, 64, 32, 16, 8))
    BHb = 1
    for c in (16, 8, 4, 2, 1):                # keep blocks well under the v7x 64 MiB VMEM budget
        if BH % c == 0 and c * (L + 2 * w) * D * 4 * 8 <= (16 << 20):
            BHb = c
            break
    S = Tq + 2 * w
    kp = jnp.pad(k, ((0, 0), (w, w), (0, 0)))
    vp = jnp.pad(v, ((0, 0), (w, w), (0, 0)))
    kern = functools.partial(_local_attn_kernel, w=w, L=L, interval=interval, Tq=Tq, S=S)
    return pl.pallas_call(
        kern,
        out_shape=jax.ShapeDtypeStruct((BH, L, D), jnp.float32),
        grid=(BH // BHb, L // Tq),
        in_specs=[pl.BlockSpec((BHb, Tq, D), lambda n, t: (n, t, 0)),
                  pl.BlockSpec((BHb, L + 2 * w, D), lambda n, t: (n, 0, 0)),
                  pl.BlockSpec((BHb, L + 2 * w, D), lambda n, t: (n, 0, 0)),
                  pl.BlockSpec((BHb, G, D), lambda n, t: (n, 0, 0)),
                  pl.BlockSpec((BHb, G, D), lambda n, t: (n, 0, 0))],
        out_specs=pl.BlockSpec((BHb, Tq, D), lambda n, t: (n, t, 0)),
        compiler_params=pltpu.CompilerParams(
            dimension_semantics=("parallel", "parallel")),
    )(q, kp, vp, kg, vg)


# ----------------- fused global-token attention (from *_global linears) -----------------

def _global_attn_kernel(q_ref, k_ref, v_ref, o_ref, *, scale):
    q = q_ref[...] * scale                    # second /sqrt(D), as in the torch global path
    s = jnp.einsum('ngd,nld->ngl', q, k_ref[...], preferred_element_type=jnp.float32)
    m = jnp.max(s, axis=-1, keepdims=True)
    e = jnp.exp(s - m)
    denom = jnp.sum(e, axis=-1, keepdims=True)
    o_ref[...] = (jnp.einsum('ngl,nld->ngd', e, v_ref[...],
                             preferred_element_type=jnp.float32)
                  * pl.reciprocal(denom, approx=True))


def global_token_attention(gq, gk, gv, *, scale):
    BH, G, D = gq.shape
    L = gk.shape[1]
    BHb = 1
    for c in (16, 8, 4, 2, 1):
        if BH % c == 0 and c * L * D * 4 * 8 <= (16 << 20):
            BHb = c
            break
    return pl.pallas_call(
        functools.partial(_global_attn_kernel, scale=scale),
        out_shape=jax.ShapeDtypeStruct((BH, G, D), jnp.float32),
        grid=(BH // BHb,),
        in_specs=[pl.BlockSpec((BHb, G, D), lambda n: (n, 0, 0)),
                  pl.BlockSpec((BHb, L, D), lambda n: (n, 0, 0)),
                  pl.BlockSpec((BHb, L, D), lambda n: (n, 0, 0))],
        out_specs=pl.BlockSpec((BHb, G, D), lambda n: (n, 0, 0)),
        compiler_params=pltpu.CompilerParams(dimension_semantics=("parallel",)),
    )(gq, gk, gv)


# -------------------- batched Linear (+bias) for query/key/value_global --------------------

def _bmm_bias_kernel(x_ref, w_ref, b_ref, o_ref):
    y = jnp.dot(x_ref[0], w_ref[0], preferred_element_type=jnp.float32) + b_ref[0]
    o_ref[...] = y[None]


def fused_linear3(xs, wts, bs):
    # xs: (3, R, E); wts: (3, E, E) (pre-transposed W.T); bs: (3, 1, E)
    _, R, E = xs.shape
    TR = _largest_divisor(R, (512, 256, 128, 64, 32, 16, 8))
    return pl.pallas_call(
        _bmm_bias_kernel,
        out_shape=jax.ShapeDtypeStruct((3, R, E), jnp.float32),
        grid=(3, R // TR),
        in_specs=[pl.BlockSpec((1, TR, E), lambda j, r: (j, r, 0)),
                  pl.BlockSpec((1, E, E), lambda j, r: (j, 0, 0)),
                  pl.BlockSpec((1, 1, E), lambda j, r: (j, 0, 0))],
        out_specs=pl.BlockSpec((1, TR, E), lambda j, r: (j, r, 0)),
        compiler_params=pltpu.CompilerParams(
            dimension_semantics=("parallel", "parallel")),
    )(xs, wts, bs)


# --------------------------------- BasicLayer forward ---------------------------------

def basic_layer_forward(x, prep, cfg):
    B, C, L = x.shape
    H = len(cfg['kernel_sizes'])
    D = cfg['planes']
    E = H * D
    stride = cfg['stride']
    w = cfg['attention_window'] // 2
    interval = L // cfg['global_index_num']
    global_positions = jnp.arange(0, L, interval)
    G = global_positions.shape[0]
    scale = 1.0 / math.sqrt(D)

    # sublayer BatchNorm (eval, folded affine) -> channels-last layout for the conv kernels
    x1 = x * prep['bn0_s'][None, :, None] + prep['bn0_b'][None, :, None]
    h0 = jnp.transpose(x1, (0, 2, 1))[None]                         # (1, B, L, Cin)

    # grouped conv stacks: one fused conv+ReLU+BN kernel per depth for all 3*h branches
    y = conv_group(h0, prep['w1'], prep['s1'], prep['b1'])
    y = conv_group(y, prep['w2'], prep['s2'], prep['b2'])[:, :, ::stride, :]
    y = conv_group(y, prep['w3'], prep['s3'], prep['b3'])[:, :, ::stride, :]
    Lq = y.shape[2]
    assert Lq % (2 * w) == 0, "seq_len must be a multiple of the attention window"
    # TODO(synk): like the torch module, global positions are derived from the pre-stride seq_len;
    #             only stride = 1 is exercised here.

    y = y.reshape(3, H, B, Lq, D)
    qv = jnp.transpose(y[0], (1, 2, 0, 3)) * scale                  # (B, Lq, H, D), scaled query
    kv = jnp.transpose(y[1], (1, 2, 0, 3))
    vv = jnp.transpose(y[2], (1, 2, 0, 3))

    # ---- fused sliding-window + global-key attention ----
    q_bh = jnp.transpose(qv, (0, 2, 1, 3)).reshape(B * H, Lq, D)
    k_bh = jnp.transpose(kv, (0, 2, 1, 3)).reshape(B * H, Lq, D)
    v_bh = jnp.transpose(vv, (0, 2, 1, 3)).reshape(B * H, Lq, D)
    kg = k_bh[:, global_positions, :]
    vg = v_bh[:, global_positions, :]
    out_bh = longformer_local_attention(q_bh, k_bh, v_bh, kg, vg, w=w, interval=interval)
    attn_out = jnp.transpose(out_bh.reshape(B, H, Lq, D), (0, 2, 1, 3))     # (B, Lq, H, D)

    # ---- global-token attention from hidden (query/key/value_global linears) ----
    q_flat = jnp.transpose(qv, (1, 0, 2, 3)).reshape(Lq, B, E)
    k_flat = jnp.transpose(kv, (1, 0, 2, 3)).reshape(Lq, B, E)
    v_flat = jnp.transpose(vv, (1, 0, 2, 3)).reshape(Lq, B, E)
    xs = jnp.stack([q_flat, k_flat, v_flat], 0).reshape(3, Lq * B, E)
    lin = fused_linear3(xs, prep['lin_wt'], prep['lin_b']).reshape(3, Lq, B, E)
    g_hidden = lin[0][global_positions]                                     # (G, B, E)
    gq = jnp.transpose(g_hidden.reshape(G, B, H, D), (1, 2, 0, 3)).reshape(B * H, G, D)
    gk = jnp.transpose(lin[1].reshape(Lq, B, H, D), (1, 2, 0, 3)).reshape(B * H, Lq, D)
    gv = jnp.transpose(lin[2].reshape(Lq, B, H, D), (1, 2, 0, 3)).reshape(B * H, Lq, D)
    g_out = global_token_attention(gq, gk, gv, scale=scale)                 # (BH, G, D)
    g_out = jnp.transpose(g_out.reshape(B, H, G, D), (0, 2, 1, 3))          # (B, G, H, D)

    # replace the rows at global positions with the global-attention output
    attn_out = attn_out.at[:, global_positions, :, :].set(g_out)
    out = jnp.transpose(attn_out, (0, 2, 3, 1)).reshape(B, E, Lq)           # (B, d_model, L')

    if C == E:
        return x + out                       # eval-mode dropout == identity
    return out


# ----------------------------------- parameters -----------------------------------

def init_params(key, in_channels, planes, kernel_sizes, d_model):
    keys = iter(jax.random.split(key, 4096))

    def nrm(shape, scale=0.2):
        return scale * jax.random.normal(next(keys), shape, dtype=jnp.float32)

    def bn(c):
        return (1.0 + 0.1 * jax.random.normal(next(keys), (c,), dtype=jnp.float32),          # gamma
                0.1 * jax.random.normal(next(keys), (c,), dtype=jnp.float32),                # beta
                0.1 * jax.random.normal(next(keys), (c,), dtype=jnp.float32),                # running_mean
                1.0 + 0.1 * jnp.abs(jax.random.normal(next(keys), (c,), dtype=jnp.float32))) # running_var

    models = []
    for ks in kernel_sizes:
        per_j = []
        for _ in range(3):   # q / k / v branches
            per_j.append({
                'w1': nrm((planes // 4, in_channels, 1)),
                'bn1': bn(planes // 4),
                'w2': nrm((planes, planes // 4, ks)),
                'bn2': bn(planes),
                'w3': nrm((planes, planes, ks)),
                'bn3': bn(planes),
            })
        models.append(per_j)
    linears = [(nrm((d_model, d_model)), nrm((d_model,))) for _ in range(3)]
    return {'sublayer_bn': bn(in_channels), 'models': models, 'linears': linears}


def prepare_params(params, cfg, eps=1e-5):
    """Stack / fold the raw (torch-layout) parameters into the kernel-friendly layout."""
    kernel_sizes = cfg['kernel_sizes']
    h = len(kernel_sizes)
    assert all(k % 2 == 1 for k in kernel_sizes), "odd kernel sizes expected (module defaults)"
    Kc = max(kernel_sizes)

    def bn_fold(bn):
        gamma, beta, mean, var = bn
        s = gamma / jnp.sqrt(var + eps)
        return s, beta - mean * s

    def stack_depth(wname, bnname, Kt):
        ws, ss, bs = [], [], []
        for j in range(3):                       # group order: g = j*h + i
            for i in range(h):
                p = params['models'][i][j]
                wt = jnp.transpose(p[wname], (2, 1, 0))              # (k, Cin, Cout)
                k = wt.shape[0]
                off = (Kt - k) // 2                                  # center-embed into Kt taps
                full = jnp.zeros((Kt,) + wt.shape[1:], jnp.float32).at[off:off + k].set(wt)
                ws.append(full)
                s, b = bn_fold(p[bnname])
                ss.append(s)
                bs.append(b)
        return jnp.stack(ws), jnp.stack(ss)[:, None, :], jnp.stack(bs)[:, None, :]

    w1, s1, b1 = stack_depth('w1', 'bn1', 1)
    w2, s2, b2 = stack_depth('w2', 'bn2', Kc)
    w3, s3, b3 = stack_depth('w3', 'bn3', Kc)
    s0, b0 = bn_fold(params['sublayer_bn'])
    lin_wt = jnp.stack([params['linears'][j][0].T for j in range(3)])
    lin_b = jnp.stack([params['linears'][j][1] for j in range(3)])[:, None, :]
    return dict(w1=w1, s1=s1, b1=b1, w2=w2, s2=s2, b2=b2, w3=w3, s3=s3, b3=b3,
                bn0_s=s0, bn0_b=b0, lin_wt=lin_wt, lin_b=lin_b)


# -------------------------------------- main --------------------------------------

if __name__ == "__main__":
    B, IN_CH, SEQ = 2, 32, 32
    PLANES = 16                      # d_k / head_dim
    KERNEL_SIZES = [3, 5]            # h = 2 heads -> d_model = 32 (== IN_CH -> residual path)
    STRIDE = 1
    GLOBAL_INDEX_NUM = 4             # interval = 8 -> global positions {0, 8, 16, 24}
    ATTENTION_WINDOW = 8             # one-sided window w = 4; SEQ % (2w) == 0
    D_MODEL = PLANES * len(KERNEL_SIZES)

    cfg = dict(kernel_sizes=KERNEL_SIZES, planes=PLANES, stride=STRIDE,
               global_index_num=GLOBAL_INDEX_NUM, attention_window=ATTENTION_WINDOW)

    root = jax.random.PRNGKey(0)
    kx, kp = jax.random.split(root)
    x = jax.random.normal(kx, (B, IN_CH, SEQ), dtype=jnp.float32)
    params = init_params(kp, IN_CH, PLANES, KERNEL_SIZES, D_MODEL)
    prep = prepare_params(params, cfg)

    fwd = jax.jit(functools.partial(basic_layer_forward, cfg=cfg))
    out = jax.block_until_ready(fwd(x, prep))

    assert out.shape == (B, D_MODEL, SEQ), out.shape
    assert bool(jnp.all(jnp.isfinite(out)))
    print("KERNEL_OK")
</pallas_src>

<mosaic_0001>
module attributes {stable_mosaic.version = 11 : i64} {
  func.func @_conv_bn_relu_kernel(%arg0: i32, %arg1: i32, %arg2: memref<1x1x32x32xf32, #tpu.memory_space<vmem>>, %arg3: memref<1x1x32x4xf32, #tpu.memory_space<vmem>>, %arg4: memref<1x1x4xf32, #tpu.memory_space<vmem>>, %arg5: memref<1x1x4xf32, #tpu.memory_space<vmem>>, %arg6: memref<1x1x32x4xf32, #tpu.memory_space<vmem>>) attributes {dimension_semantics = [#tpu.dimension_semantics<parallel>, #tpu.dimension_semantics<parallel>], iteration_bounds = array<i64: 6, 2>, scalar_prefetch = 0 : i64, scratch_operands = 0 : i64, tpu.core_type = #tpu.core_type<tc>, window_params = [{transform_indices = @transform_0, window_bounds = array<i64: 1, 1, 32, 32>}, {transform_indices = @transform_1, window_bounds = array<i64: 1, 1, 32, 4>}, {transform_indices = @transform_2, window_bounds = array<i64: 1, 1, 4>}, {transform_indices = @transform_3, window_bounds = array<i64: 1, 1, 4>}, {transform_indices = @transform_4, window_bounds = array<i64: 1, 1, 32, 4>}]} {
    %cst = arith.constant 0.000000e+00 : f32
    %0 = vector.broadcast %cst : f32 to vector<32x4xf32>
    %c0 = arith.constant 0 : index
    %c0_0 = arith.constant 0 : index
    %c0_1 = arith.constant 0 : index
    %c0_2 = arith.constant 0 : index
    %1 = vector.load %arg2[%c0, %c0_0, %c0_1, %c0_2] : memref<1x1x32x32xf32, #tpu.memory_space<vmem>>, vector<1x1x32x32xf32>
    %2 = vector.shape_cast %1 : vector<1x1x32x32xf32> to vector<32x32xf32>
    %c0_3 = arith.constant 0 : index
    %c0_4 = arith.constant 0 : index
    %c0_5 = arith.constant 0 : index
    %c0_6 = arith.constant 0 : index
    %3 = vector.load %arg3[%c0_3, %c0_4, %c0_5, %c0_6] : memref<1x1x32x4xf32, #tpu.memory_space<vmem>>, vector<1x1x32x4xf32>
    %4 = vector.shape_cast %3 : vector<1x1x32x4xf32> to vector<32x4xf32>
    %cst_7 = arith.constant dense<0.000000e+00> : vector<32x4xf32>
    %5 = tpu.matmul %2, %4, %cst_7 {dimension_numbers = #tpu.dot_dimension_numbers<[1], [0], [0], [1], [0, 0, 1, 1], [], []>} : vector<32x32xf32>, vector<32x4xf32>, vector<32x4xf32> -> vector<32x4xf32>
    %6 = arith.addf %0, %5 : vector<32x4xf32>
    %cst_8 = arith.constant 0.000000e+00 : f32
    %7 = vector.broadcast %cst_8 : f32 to vector<32x4xf32>
    %8 = arith.maximumf %6, %7 : vector<32x4xf32>
    %c0_9 = arith.constant 0 : index
    %c0_10 = arith.constant 0 : index
    %c0_11 = arith.constant 0 : index
    %9 = vector.load %arg4[%c0_9, %c0_10, %c0_11] : memref<1x1x4xf32, #tpu.memory_space<vmem>>, vector<1x1x4xf32>
    %10 = vector.shape_cast %9 : vector<1x1x4xf32> to vector<1x4xf32>
    %11 = vector.broadcast %10 : vector<1x4xf32> to vector<32x4xf32>
    %12 = arith.mulf %8, %11 : vector<32x4xf32>
    %c0_12 = arith.constant 0 : index
    %c0_13 = arith.constant 0 : index
    %c0_14 = arith.constant 0 : index
    %13 = vector.load %arg5[%c0_12, %c0_13, %c0_14] : memref<1x1x4xf32, #tpu.memory_space<vmem>>, vector<1x1x4xf32>
    %14 = vector.shape_cast %13 : vector<1x1x4xf32> to vector<1x4xf32>
    %15 = vector.broadcast %14 : vector<1x4xf32> to vector<32x4xf32>
    %16 = arith.addf %12, %15 : vector<32x4xf32>
    %17 = vector.shape_cast %16 : vector<32x4xf32> to vector<1x1x32x4xf32>
    %c0_15 = arith.constant 0 : index
    %c0_16 = arith.constant 0 : index
    %c0_17 = arith.constant 0 : index
    %c0_18 = arith.constant 0 : index
    %18 = vector.load %arg6[%c0_15, %c0_16, %c0_17, %c0_18] : memref<1x1x32x4xf32, #tpu.memory_space<vmem>>, vector<1x1x32x4xf32>
    tpu.vector_store %arg6[%c0_15, %c0_16, %c0_17, %c0_18], %17 {strides = array<i32>} : memref<1x1x32x4xf32, #tpu.memory_space<vmem>>, vector<1x1x32x4xf32>,
    return
  }
  func.func @transform_0(%arg0: i32, %arg1: i32) -> (i32, i32, i32, i32) {
    %c0_i32 = arith.constant 0 : i32
    %c0_i32_0 = arith.constant 0 : i32
    %c0_i32_1 = arith.constant 0 : i32
    %c0_i32_2 = arith.constant 0 : i32
    return %c0_i32, %arg1, %c0_i32_0, %c0_i32_1 : i32, i32, i32, i32
  }
  func.func @transform_1(%arg0: i32, %arg1: i32) -> (i32, i32, i32, i32) {
    %c0_i32 = arith.constant 0 : i32
    %c0_i32_0 = arith.constant 0 : i32
    %c0_i32_1 = arith.constant 0 : i32
    %c0_i32_2 = arith.constant 0 : i32
    return %arg0, %c0_i32, %c0_i32_0, %c0_i32_1 : i32, i32, i32, i32
  }
  func.func @transform_2(%arg0: i32, %arg1: i32) -> (i32, i32, i32) {
    %c0_i32 = arith.constant 0 : i32
    %c0_i32_0 = arith.constant 0 : i32
    %c0_i32_1 = arith.constant 0 : i32
    return %arg0, %c0_i32, %c0_i32_0 : i32, i32, i32
  }
  func.func @transform_3(%arg0: i32, %arg1: i32) -> (i32, i32, i32) {
    %c0_i32 = arith.constant 0 : i32
    %c0_i32_0 = arith.constant 0 : i32
    %c0_i32_1 = arith.constant 0 : i32
    return %arg0, %c0_i32, %c0_i32_0 : i32, i32, i32
  }
  func.func @transform_4(%arg0: i32, %arg1: i32) -> (i32, i32, i32, i32) {
    %c0_i32 = arith.constant 0 : i32
    %c0_i32_0 = arith.constant 0 : i32
    %c0_i32_1 = arith.constant 0 : i32
    return %arg0, %arg1, %c0_i32, %c0_i32_0 : i32, i32, i32, i32
  }
}

module attributes {stable_mosaic.version = 11 : i64} {
  func.func @_conv_bn_relu_kernel(%arg0: i32, %arg1: i32, %arg2: memref<1x1x36x4xf32, #tpu.memory_space<vmem>>, %arg3: memref<1x5x4x16xf32, #tpu.memory_space<vmem>>, %arg4: memref<1x1x16xf32, #tpu.memory_space<vmem>>, %arg5: memref<1x1x16xf32, #tpu.memory_space<vmem>>, %arg6: memref<1x1x32x16xf32, #tpu.memory_space<vmem>>) attributes {dimension_semantics = [#tpu.dimension_semantics<parallel>, #tpu.dimension_semantics<parallel>], iteration_bounds = array<i64: 6, 2>, scalar_prefetch = 0 : i64, scratch_operands = 0 : i64, tpu.core_type = #tpu.core_type<tc>, window_params = [{transform_indices = @transform_0, window_bounds = array<i64: 1, 1, 36, 4>}, {transform_indices = @transform_1, window_bounds = array<i64: 1, 5, 4, 16>}, {transform_indices = @transform_2, window_bounds = array<i64: 1, 1, 16>}, {transform_indices = @transform_3, window_bounds = array<i64: 1, 1, 16>}, {transform_indices = @transform_4, window_bounds = array<i64: 1, 1, 32, 16>}]} {
    %cst = arith.constant 0.000000e+00 : f32
    %0 = vector.broadcast %cst : f32 to vector<32x16xf32>
    %c0 = arith.constant 0 : index
    %c0_0 = arith.constant 0 : index
    %c0_1 = arith.constant 0 : index
    %c0_2 = arith.constant 0 : index
    %1 = vector.load %arg2[%c0, %c0_0, %c0_1, %c0_2] : memref<1x1x36x4xf32, #tpu.memory_space<vmem>>, vector<1x1x32x4xf32>
    %2 = vector.shape_cast %1 : vector<1x1x32x4xf32> to vector<32x4xf32>
    %c0_3 = arith.constant 0 : index
    %c0_4 = arith.constant 0 : index
    %c0_5 = arith.constant 0 : index
    %c0_6 = arith.constant 0 : index
    %3 = vector.load %arg3[%c0_3, %c0_4, %c0_5, %c0_6] : memref<1x5x4x16xf32, #tpu.memory_space<vmem>>, vector<1x1x4x16xf32>
    %4 = vector.shape_cast %3 : vector<1x1x4x16xf32> to vector<4x16xf32>
    %cst_7 = arith.constant dense<0.000000e+00> : vector<32x16xf32>
    %5 = tpu.matmul %2, %4, %cst_7 {dimension_numbers = #tpu.dot_dimension_numbers<[1], [0], [0], [1], [0, 0, 1, 1], [], []>} : vector<32x4xf32>, vector<4x16xf32>, vector<32x16xf32> -> vector<32x16xf32>
    %6 = arith.addf %0, %5 : vector<32x16xf32>
    %c0_8 = arith.constant 0 : index
    %c0_9 = arith.constant 0 : index
    %c1 = arith.constant 1 : index
    %c0_10 = arith.constant 0 : index
    %7 = vector.load %arg2[%c0_8, %c0_9, %c1, %c0_10] : memref<1x1x36x4xf32, #tpu.memory_space<vmem>>, vector<1x1x32x4xf32>
    %8 = vector.shape_cast %7 : vector<1x1x32x4xf32> to vector<32x4xf32>
    %c0_11 = arith.constant 0 : index
    %c1_12 = arith.constant 1 : index
    %c0_13 = arith.constant 0 : index
    %c0_14 = arith.constant 0 : index
    %9 = vector.load %arg3[%c0_11, %c1_12, %c0_13, %c0_14] : memref<1x5x4x16xf32, #tpu.memory_space<vmem>>, vector<1x1x4x16xf32>
    %10 = vector.shape_cast %9 : vector<1x1x4x16xf32> to vector<4x16xf32>
    %cst_15 = arith.constant dense<0.000000e+00> : vector<32x16xf32>
    %11 = tpu.matmul %8, %10, %cst_15 {dimension_numbers = #tpu.dot_dimension_numbers<[1], [0], [0], [1], [0, 0, 1, 1], [], []>} : vector<32x4xf32>, vector<4x16xf32>, vector<32x16xf32> -> vector<32x16xf32>
    %12 = arith.addf %6, %11 : vector<32x16xf32>
    %c0_16 = arith.constant 0 : index
    %c0_17 = arith.constant 0 : index
    %c2 = arith.constant 2 : index
    %c0_18 = arith.constant 0 : index
    %13 = vector.load %arg2[%c0_16, %c0_17, %c2, %c0_18] : memref<1x1x36x4xf32, #tpu.memory_space<vmem>>, vector<1x1x32x4xf32>
    %14 = vector.shape_cast %13 : vector<1x1x32x4xf32> to vector<32x4xf32>
    %c0_19 = arith.constant 0 : index
    %c2_20 = arith.constant 2 : index
    %c0_21 = arith.constant 0 : index
    %c0_22 = arith.constant 0 : index
    %15 = vector.load %arg3[%c0_19, %c2_20, %c0_21, %c0_22] : memref<1x5x4x16xf32, #tpu.memory_space<vmem>>, vector<1x1x4x16xf32>
    %16 = vector.shape_cast %15 : vector<1x1x4x16xf32> to vector<4x16xf32>
    %cst_23 = arith.constant dense<0.000000e+00> : vector<32x16xf32>
    %17 = tpu.matmul %14, %16, %cst_23 {dimension_numbers = #tpu.dot_dimension_numbers<[1], [0], [0], [1], [0, 0, 1, 1], [], []>} : vector<32x4xf32>, vector<4x16xf32>, vector<32x16xf32> -> vector<32x16xf32>
    %18 = arith.addf %12, %17 : vector<32x16xf32>
    %c0_24 = arith.constant 0 : index
    %c0_25 = arith.constant 0 : index
    %c3 = arith.constant 3 : index
    %c0_26 = arith.constant 0 : index
    %19 = vector.load %arg2[%c0_24, %c0_25, %c3, %c0_26] : memref<1x1x36x4xf32, #tpu.memory_space<vmem>>, vector<1x1x32x4xf32>
    %20 = vector.shape_cast %19 : vector<1x1x32x4xf32> to vector<32x4xf32>
    %c0_27 = arith.constant 0 : index
    %c3_28 = arith.constant 3 : index
    %c0_29 = arith.constant 0 : index
    %c0_30 = arith.constant 0 : index
    %21 = vector.load %arg3[%c0_27, %c3_28, %c0_29, %c0_30] : memref<1x5x4x16xf32, #tpu.memory_space<vmem>>, vector<1x1x4x16xf32>
    %22 = vector.shape_cast %21 : vector<1x1x4x16xf32> to vector<4x16xf32>
    %cst_31 = arith.constant dense<0.000000e+00> : vector<32x16xf32>
    %23 = tpu.matmul %20, %22, %cst_31 {dimension_numbers = #tpu.dot_dimension_numbers<[1], [0], [0], [1], [0, 0, 1, 1], [], []>} : vector<32x4xf32>, vector<4x16xf32>, vector<32x16xf32> -> vector<32x16xf32>
    %24 = arith.addf %18, %23 : vector<32x16xf32>
    %c0_32 = arith.constant 0 : index
    %c0_33 = arith.constant 0 : index
    %c4 = arith.constant 4 : index
    %c0_34 = arith.constant 0 : index
    %25 = vector.load %arg2[%c0_32, %c0_33, %c4, %c0_34] : memref<1x1x36x4xf32, #tpu.memory_space<vmem>>, vector<1x1x32x4xf32>
    %26 = vector.shape_cast %25 : vector<1x1x32x4xf32> to vector<32x4xf32>
    %c0_35 = arith.constant 0 : index
    %c4_36 = arith.constant 4 : index
    %c0_37 = arith.constant 0 : index
    %c0_38 = arith.constant 0 : index
    %27 = vector.load %arg3[%c0_35, %c4_36, %c0_37, %c0_38] : memref<1x5x4x16xf32, #tpu.memory_space<vmem>>, vector<1x1x4x16xf32>
    %28 = vector.shape_cast %27 : vector<1x1x4x16xf32> to vector<4x16xf32>
    %cst_39 = arith.constant dense<0.000000e+00> : vector<32x16xf32>
    %29 = tpu.matmul %26, %28, %cst_39 {dimension_numbers = #tpu.dot_dimension_numbers<[1], [0], [0], [1], [0, 0, 1, 1], [], []>} : vector<32x4xf32>, vector<4x16xf32>, vector<32x16xf32> -> vector<32x16xf32>
    %30 = arith.addf %24, %29 : vector<32x16xf32>
    %cst_40 = arith.constant 0.000000e+00 : f32
    %31 = vector.broadcast %cst_40 : f32 to vector<32x16xf32>
    %32 = arith.maximumf %30, %31 : vector<32x16xf32>
    %c0_41 = arith.constant 0 : index
    %c0_42 = arith.constant 0 : index
    %c0_43 = arith.constant 0 : index
    %33 = vector.load %arg4[%c0_41, %c0_42, %c0_43] : memref<1x1x16xf32, #tpu.memory_space<vmem>>, vector<1x1x16xf32>
    %34 = vector.shape_cast %33 : vector<1x1x16xf32> to vector<1x16xf32>
    %35 = vector.broadcast %34 : vector<1x16xf32> to vector<32x16xf32>
    %36 = arith.mulf %32, %35 : vector<32x16xf32>
    %c0_44 = arith.constant 0 : index
    %c0_45 = arith.constant 0 : index
    %c0_46 = arith.constant 0 : index
    %37 = vector.load %arg5[%c0_44, %c0_45, %c0_46] : memref<1x1x16xf32, #tpu.memory_space<vmem>>, vector<1x1x16xf32>
    %38 = vector.shape_cast %37 : vector<1x1x16xf32> to vector<1x16xf32>
    %39 = vector.broadcast %38 : vector<1x16xf32> to vector<32x16xf32>
    %40 = arith.addf %36, %39 : vector<32x16xf32>
    %41 = vector.shape_cast %40 : vector<32x16xf32> to vector<1x1x32x16xf32>
    %c0_47 = arith.constant 0 : index
    %c0_48 = arith.constant 0 : index
    %c0_49 = arith.constant 0 : index
    %c0_50 = arith.constant 0 : index
    %42 = vector.load %arg6[%c0_47, %c0_48, %c0_49, %c0_50] : memref<1x1x32x16xf32, #tpu.memory_space<vmem>>, vector<1x1x32x16xf32>
    tpu.vector_store %arg6[%c0_47, %c0_48, %c0_49, %c0_50], %41 {strides = array<i32>} : memref<1x1x32x16xf32, #tpu.memory_space<vmem>>, vector<1x1x32x16xf32>,
    return
  }
  func.func @transform_0(%arg0: i32, %arg1: i32) -> (i32, i32, i32, i32) {
    %c0_i32 = arith.constant 0 : i32
    %c0_i32_0 = arith.constant 0 : i32
    %c0_i32_1 = arith.constant 0 : i32
    return %arg0, %arg1, %c0_i32, %c0_i32_0 : i32, i32, i32, i32
  }
  func.func @transform_1(%arg0: i32, %arg1: i32) -> (i32, i32, i32, i32) {
    %c0_i32 = arith.constant 0 : i32
    %c0_i32_0 = arith.constant 0 : i32
    %c0_i32_1 = arith.constant 0 : i32
    %c0_i32_2 = arith.constant 0 : i32
    return %arg0, %c0_i32, %c0_i32_0, %c0_i32_1 : i32, i32, i32, i32
  }
  func.func @transform_2(%arg0: i32, %arg1: i32) -> (i32, i32, i32) {
    %c0_i32 = arith.constant 0 : i32
    %c0_i32_0 = arith.constant 0 : i32
    %c0_i32_1 = arith.constant 0 : i32
    return %arg0, %c0_i32, %c0_i32_0 : i32, i32, i32
  }
  func.func @transform_3(%arg0: i32, %arg1: i32) -> (i32, i32, i32) {
    %c0_i32 = arith.constant 0 : i32
    %c0_i32_0 = arith.constant 0 : i32
    %c0_i32_1 = arith.constant 0 : i32
    return %arg0, %c0_i32, %c0_i32_0 : i32, i32, i32
  }
  func.func @transform_4(%arg0: i32, %arg1: i32) -> (i32, i32, i32, i32) {
    %c0_i32 = arith.constant 0 : i32
    %c0_i32_0 = arith.constant 0 : i32
    %c0_i32_1 = arith.constant 0 : i32
    return %arg0, %arg1, %c0_i32, %c0_i32_0 : i32, i32, i32, i32
  }
}

module attributes {stable_mosaic.version = 11 : i64} {
  func.func @_conv_bn_relu_kernel(%arg0: i32, %arg1: i32, %arg2: memref<1x1x36x16xf32, #tpu.memory_space<vmem>>, %arg3: memref<1x5x16x16xf32, #tpu.memory_space<vmem>>, %arg4: memref<1x1x16xf32, #tpu.memory_space<vmem>>, %arg5: memref<1x1x16xf32, #tpu.memory_space<vmem>>, %arg6: memref<1x1x32x16xf32, #tpu.memory_space<vmem>>) attributes {dimension_semantics = [#tpu.dimension_semantics<parallel>, #tpu.dimension_semantics<parallel>], iteration_bounds = array<i64: 6, 2>, scalar_prefetch = 0 : i64, scratch_operands = 0 : i64, tpu.core_type = #tpu.core_type<tc>, window_params = [{transform_indices = @transform_0, window_bounds = array<i64: 1, 1, 36, 16>}, {transform_indices = @transform_1, window_bounds = array<i64: 1, 5, 16, 16>}, {transform_indices = @transform_2, window_bounds = array<i64: 1, 1, 16>}, {transform_indices = @transform_3, window_bounds = array<i64: 1, 1, 16>}, {transform_indices = @transform_4, window_bounds = array<i64: 1, 1, 32, 16>}]} {
    %cst = arith.constant 0.000000e+00 : f32
    %0 = vector.broadcast %cst : f32 to vector<32x16xf32>
    %c0 = arith.constant 0 : index
    %c0_0 = arith.constant 0 : index
    %c0_1 = arith.constant 0 : index
    %c0_2 = arith.constant 0 : index
    %1 = vector.load %arg2[%c0, %c0_0, %c0_1, %c0_2] : memref<1x1x36x16xf32, #tpu.memory_space<vmem>>, vector<1x1x32x16xf32>
    %2 = vector.shape_cast %1 : vector<1x1x32x16xf32> to vector<32x16xf32>
    %c0_3 = arith.constant 0 : index
    %c0_4 = arith.constant 0 : index
    %c0_5 = arith.constant 0 : index
    %c0_6 = arith.constant 0 : index
    %3 = vector.load %arg3[%c0_3, %c0_4, %c0_5, %c0_6] : memref<1x5x16x16xf32, #tpu.memory_space<vmem>>, vector<1x1x16x16xf32>
    %4 = vector.shape_cast %3 : vector<1x1x16x16xf32> to vector<16x16xf32>
    %cst_7 = arith.constant dense<0.000000e+00> : vector<32x16xf32>
    %5 = tpu.matmul %2, %4, %cst_7 {dimension_numbers = #tpu.dot_dimension_numbers<[1], [0], [0], [1], [0, 0, 1, 1], [], []>} : vector<32x16xf32>, vector<16x16xf32>, vector<32x16xf32> -> vector<32x16xf32>
    %6 = arith.addf %0, %5 : vector<32x16xf32>
    %c0_8 = arith.constant 0 : index
    %c0_9 = arith.constant 0 : index
    %c1 = arith.constant 1 : index
    %c0_10 = arith.constant 0 : index
    %7 = vector.load %arg2[%c0_8, %c0_9, %c1, %c0_10] : memref<1x1x36x16xf32, #tpu.memory_space<vmem>>, vector<1x1x32x16xf32>
    %8 = vector.shape_cast %7 : vector<1x1x32x16xf32> to vector<32x16xf32>
    %c0_11 = arith.constant 0 : index
    %c1_12 = arith.constant 1 : index
    %c0_13 = arith.constant 0 : index
    %c0_14 = arith.constant 0 : index
    %9 = vector.load %arg3[%c0_11, %c1_12, %c0_13, %c0_14] : memref<1x5x16x16xf32, #tpu.memory_space<vmem>>, vector<1x1x16x16xf32>
    %10 = vector.shape_cast %9 : vector<1x1x16x16xf32> to vector<16x16xf32>
    %cst_15 = arith.constant dense<0.000000e+00> : vector<32x16xf32>
    %11 = tpu.matmul %8, %10, %cst_15 {dimension_numbers = #tpu.dot_dimension_numbers<[1], [0], [0], [1], [0, 0, 1, 1], [], []>} : vector<32x16xf32>, vector<16x16xf32>, vector<32x16xf32> -> vector<32x16xf32>
    %12 = arith.addf %6, %11 : vector<32x16xf32>
    %c0_16 = arith.constant 0 : index
    %c0_17 = arith.constant 0 : index
    %c2 = arith.constant 2 : index
    %c0_18 = arith.constant 0 : index
    %13 = vector.load %arg2[%c0_16, %c0_17, %c2, %c0_18] : memref<1x1x36x16xf32, #tpu.memory_space<vmem>>, vector<1x1x32x16xf32>
    %14 = vector.shape_cast %13 : vector<1x1x32x16xf32> to vector<32x16xf32>
    %c0_19 = arith.constant 0 : index
    %c2_20 = arith.constant 2 : index
    %c0_21 = arith.constant 0 : index
    %c0_22 = arith.constant 0 : index
    %15 = vector.load %arg3[%c0_19, %c2_20, %c0_21, %c0_22] : memref<1x5x16x16xf32, #tpu.memory_space<vmem>>, vector<1x1x16x16xf32>
    %16 = vector.shape_cast %15 : vector<1x1x16x16xf32> to vector<16x16xf32>
    %cst_23 = arith.constant dense<0.000000e+00> : vector<32x16xf32>
    %17 = tpu.matmul %14, %16, %cst_23 {dimension_numbers = #tpu.dot_dimension_numbers<[1], [0], [0], [1], [0, 0, 1, 1], [], []>} : vector<32x16xf32>, vector<16x16xf32>, vector<32x16xf32> -> vector<32x16xf32>
    %18 = arith.addf %12, %17 : vector<32x16xf32>
    %c0_24 = arith.constant 0 : index
    %c0_25 = arith.constant 0 : index
    %c3 = arith.constant 3 : index
    %c0_26 = arith.constant 0 : index
    %19 = vector.load %arg2[%c0_24, %c0_25, %c3, %c0_26] : memref<1x1x36x16xf32, #tpu.memory_space<vmem>>, vector<1x1x32x16xf32>
    %20 = vector.shape_cast %19 : vector<1x1x32x16xf32> to vector<32x16xf32>
    %c0_27 = arith.constant 0 : index
    %c3_28 = arith.constant 3 : index
    %c0_29 = arith.constant 0 : index
    %c0_30 = arith.constant 0 : index
    %21 = vector.load %arg3[%c0_27, %c3_28, %c0_29, %c0_30] : memref<1x5x16x16xf32, #tpu.memory_space<vmem>>, vector<1x1x16x16xf32>
    %22 = vector.shape_cast %21 : vector<1x1x16x16xf32> to vector<16x16xf32>
    %cst_31 = arith.constant dense<0.000000e+00> : vector<32x16xf32>
    %23 = tpu.matmul %20, %22, %cst_31 {dimension_numbers = #tpu.dot_dimension_numbers<[1], [0], [0], [1], [0, 0, 1, 1], [], []>} : vector<32x16xf32>, vector<16x16xf32>, vector<32x16xf32> -> vector<32x16xf32>
    %24 = arith.addf %18, %23 : vector<32x16xf32>
    %c0_32 = arith.constant 0 : index
    %c0_33 = arith.constant 0 : index
    %c4 = arith.constant 4 : index
    %c0_34 = arith.constant 0 : index
    %25 = vector.load %arg2[%c0_32, %c0_33, %c4, %c0_34] : memref<1x1x36x16xf32, #tpu.memory_space<vmem>>, vector<1x1x32x16xf32>
    %26 = vector.shape_cast %25 : vector<1x1x32x16xf32> to vector<32x16xf32>
    %c0_35 = arith.constant 0 : index
    %c4_36 = arith.constant 4 : index
    %c0_37 = arith.constant 0 : index
    %c0_38 = arith.constant 0 : index
    %27 = vector.load %arg3[%c0_35, %c4_36, %c0_37, %c0_38] : memref<1x5x16x16xf32, #tpu.memory_space<vmem>>, vector<1x1x16x16xf32>
    %28 = vector.shape_cast %27 : vector<1x1x16x16xf32> to vector<16x16xf32>
    %cst_39 = arith.constant dense<0.000000e+00> : vector<32x16xf32>
    %29 = tpu.matmul %26, %28, %cst_39 {dimension_numbers = #tpu.dot_dimension_numbers<[1], [0], [0], [1], [0, 0, 1, 1], [], []>} : vector<32x16xf32>, vector<16x16xf32>, vector<32x16xf32> -> vector<32x16xf32>
    %30 = arith.addf %24, %29 : vector<32x16xf32>
    %cst_40 = arith.constant 0.000000e+00 : f32
    %31 = vector.broadcast %cst_40 : f32 to vector<32x16xf32>
    %32 = arith.maximumf %30, %31 : vector<32x16xf32>
    %c0_41 = arith.constant 0 : index
    %c0_42 = arith.constant 0 : index
    %c0_43 = arith.constant 0 : index
    %33 = vector.load %arg4[%c0_41, %c0_42, %c0_43] : memref<1x1x16xf32, #tpu.memory_space<vmem>>, vector<1x1x16xf32>
    %34 = vector.shape_cast %33 : vector<1x1x16xf32> to vector<1x16xf32>
    %35 = vector.broadcast %34 : vector<1x16xf32> to vector<32x16xf32>
    %36 = arith.mulf %32, %35 : vector<32x16xf32>
    %c0_44 = arith.constant 0 : index
    %c0_45 = arith.constant 0 : index
    %c0_46 = arith.constant 0 : index
    %37 = vector.load %arg5[%c0_44, %c0_45, %c0_46] : memref<1x1x16xf32, #tpu.memory_space<vmem>>, vector<1x1x16xf32>
    %38 = vector.shape_cast %37 : vector<1x1x16xf32> to vector<1x16xf32>
    %39 = vector.broadcast %38 : vector<1x16xf32> to vector<32x16xf32>
    %40 = arith.addf %36, %39 : vector<32x16xf32>
    %41 = vector.shape_cast %40 : vector<32x16xf32> to vector<1x1x32x16xf32>
    %c0_47 = arith.constant 0 : index
    %c0_48 = arith.constant 0 : index
    %c0_49 = arith.constant 0 : index
    %c0_50 = arith.constant 0 : index
    %42 = vector.load %arg6[%c0_47, %c0_48, %c0_49, %c0_50] : memref<1x1x32x16xf32, #tpu.memory_space<vmem>>, vector<1x1x32x16xf32>
    tpu.vector_store %arg6[%c0_47, %c0_48, %c0_49, %c0_50], %41 {strides = array<i32>} : memref<1x1x32x16xf32, #tpu.memory_space<vmem>>, vector<1x1x32x16xf32>,
    return
  }
  func.func @transform_0(%arg0: i32, %arg1: i32) -> (i32, i32, i32, i32) {
    %c0_i32 = arith.constant 0 : i32
    %c0_i32_0 = arith.constant 0 : i32
    %c0_i32_1 = arith.constant 0 : i32
    return %arg0, %arg1, %c0_i32, %c0_i32_0 : i32, i32, i32, i32
  }
  func.func @transform_1(%arg0: i32, %arg1: i32) -> (i32, i32, i32, i32) {
    %c0_i32 = arith.constant 0 : i32
    %c0_i32_0 = arith.constant 0 : i32
    %c0_i32_1 = arith.constant 0 : i32
    %c0_i32_2 = arith.constant 0 : i32
    return %arg0, %c0_i32, %c0_i32_0, %c0_i32_1 : i32, i32, i32, i32
  }
  func.func @transform_2(%arg0: i32, %arg1: i32) -> (i32, i32, i32) {
    %c0_i32 = arith.constant 0 : i32
    %c0_i32_0 = arith.constant 0 : i32
    %c0_i32_1 = arith.constant 0 : i32
    return %arg0, %c0_i32, %c0_i32_0 : i32, i32, i32
  }
  func.func @transform_3(%arg0: i32, %arg1: i32) -> (i32, i32, i32) {
    %c0_i32 = arith.constant 0 : i32
    %c0_i32_0 = arith.constant 0 : i32
    %c0_i32_1 = arith.constant 0 : i32
    return %arg0, %c0_i32, %c0_i32_0 : i32, i32, i32
  }
  func.func @transform_4(%arg0: i32, %arg1: i32) -> (i32, i32, i32, i32) {
    %c0_i32 = arith.constant 0 : i32
    %c0_i32_0 = arith.constant 0 : i32
    %c0_i32_1 = arith.constant 0 : i32
    return %arg0, %arg1, %c0_i32, %c0_i32_0 : i32, i32, i32, i32
  }
}

module attributes {stable_mosaic.version = 11 : i64} {
  func.func @_bmm_bias_kernel(%arg0: i32, %arg1: i32, %arg2: memref<1x64x32xf32, #tpu.memory_space<vmem>>, %arg3: memref<1x32x32xf32, #tpu.memory_space<vmem>>, %arg4: memref<1x1x32xf32, #tpu.memory_space<vmem>>, %arg5: memref<1x64x32xf32, #tpu.memory_space<vmem>>) attributes {dimension_semantics = [#tpu.dimension_semantics<parallel>, #tpu.dimension_semantics<parallel>], iteration_bounds = array<i64: 3, 1>, scalar_prefetch = 0 : i64, scratch_operands = 0 : i64, tpu.core_type = #tpu.core_type<tc>, window_params = [{transform_indices = @transform_0, window_bounds = array<i64: 1, 64, 32>}, {transform_indices = @transform_1, window_bounds = array<i64: 1, 32, 32>}, {transform_indices = @transform_2, window_bounds = array<i64: 1, 1, 32>}, {transform_indices = @transform_3, window_bounds = array<i64: 1, 64, 32>}]} {
    %c0 = arith.constant 0 : index
    %c0_0 = arith.constant 0 : index
    %c0_1 = arith.constant 0 : index
    %0 = vector.load %arg2[%c0, %c0_0, %c0_1] : memref<1x64x32xf32, #tpu.memory_space<vmem>>, vector<1x64x32xf32>
    %1 = vector.shape_cast %0 : vector<1x64x32xf32> to vector<64x32xf32>
    %c0_2 = arith.constant 0 : index
    %c0_3 = arith.constant 0 : index
    %c0_4 = arith.constant 0 : index
    %2 = vector.load %arg3[%c0_2, %c0_3, %c0_4] : memref<1x32x32xf32, #tpu.memory_space<vmem>>, vector<1x32x32xf32>
    %3 = vector.shape_cast %2 : vector<1x32x32xf32> to vector<32x32xf32>
    %cst = arith.constant dense<0.000000e+00> : vector<64x32xf32>
    %4 = tpu.matmul %1, %3, %cst {dimension_numbers = #tpu.dot_dimension_numbers<[1], [0], [0], [1], [0, 0, 1, 1], [], []>} : vector<64x32xf32>, vector<32x32xf32>, vector<64x32xf32> -> vector<64x32xf32>
    %c0_5 = arith.constant 0 : index
    %c0_6 = arith.constant 0 : index
    %c0_7 = arith.constant 0 : index
    %5 = vector.load %arg4[%c0_5, %c0_6, %c0_7] : memref<1x1x32xf32, #tpu.memory_space<vmem>>, vector<1x1x32xf32>
    %6 = vector.shape_cast %5 : vector<1x1x32xf32> to vector<1x32xf32>
    %7 = vector.broadcast %6 : vector<1x32xf32> to vector<64x32xf32>
    %8 = arith.addf %4, %7 : vector<64x32xf32>
    %9 = vector.shape_cast %8 : vector<64x32xf32> to vector<1x64x32xf32>
    %c0_8 = arith.constant 0 : index
    %c0_9 = arith.constant 0 : index
    %c0_10 = arith.constant 0 : index
    %10 = vector.load %arg5[%c0_8, %c0_9, %c0_10] : memref<1x64x32xf32, #tpu.memory_space<vmem>>, vector<1x64x32xf32>
    tpu.vector_store %arg5[%c0_8, %c0_9, %c0_10], %9 {strides = array<i32>} : memref<1x64x32xf32, #tpu.memory_space<vmem>>, vector<1x64x32xf32>,
    return
  }
  func.func @transform_0(%arg0: i32, %arg1: i32) -> (i32, i32, i32) {
    %c0_i32 = arith.constant 0 : i32
    %c0_i32_0 = arith.constant 0 : i32
    return %arg0, %arg1, %c0_i32 : i32, i32, i32
  }
  func.func @transform_1(%arg0: i32, %arg1: i32) -> (i32, i32, i32) {
    %c0_i32 = arith.constant 0 : i32
    %c0_i32_0 = arith.constant 0 : i32
    %c0_i32_1 = arith.constant 0 : i32
    return %arg0, %c0_i32, %c0_i32_0 : i32, i32, i32
  }
  func.func @transform_2(%arg0: i32, %arg1: i32) -> (i32, i32, i32) {
    %c0_i32 = arith.constant 0 : i32
    %c0_i32_0 = arith.constant 0 : i32
    %c0_i32_1 = arith.constant 0 : i32
    return %arg0, %c0_i32, %c0_i32_0 : i32, i32, i32
  }
  func.func @transform_3(%arg0: i32, %arg1: i32) -> (i32, i32, i32) {
    %c0_i32 = arith.constant 0 : i32
    %c0_i32_0 = arith.constant 0 : i32
    return %arg0, %arg1, %c0_i32 : i32, i32, i32
  }
}

module attributes {stable_mosaic.version = 11 : i64} {
  func.func @_global_attn_kernel(%arg0: i32, %arg1: memref<4x4x16xf32, #tpu.memory_space<vmem>>, %arg2: memref<4x32x16xf32, #tpu.memory_space<vmem>>, %arg3: memref<4x32x16xf32, #tpu.memory_space<vmem>>, %arg4: memref<4x4x16xf32, #tpu.memory_space<vmem>>) attributes {dimension_semantics = [#tpu.dimension_semantics<parallel>], iteration_bounds = array<i64: 1>, scalar_prefetch = 0 : i64, scratch_operands = 0 : i64, tpu.core_type = #tpu.core_type<tc>, window_params = [{transform_indices = @transform_0, window_bounds = array<i64: 4, 4, 16>}, {transform_indices = @transform_1, window_bounds = array<i64: 4, 32, 16>}, {transform_indices = @transform_2, window_bounds = array<i64: 4, 32, 16>}, {transform_indices = @transform_3, window_bounds = array<i64: 4, 4, 16>}]} {
    %c0 = arith.constant 0 : index
    %c0_0 = arith.constant 0 : index
    %c0_1 = arith.constant 0 : index
    %0 = vector.load %arg1[%c0, %c0_0, %c0_1] : memref<4x4x16xf32, #tpu.memory_space<vmem>>, vector<4x4x16xf32>
    %cst = arith.constant 2.500000e-01 : f32
    %1 = vector.broadcast %cst : f32 to vector<4x4x16xf32>
    %2 = arith.mulf %0, %1 : vector<4x4x16xf32>
    %c0_2 = arith.constant 0 : index
    %c0_3 = arith.constant 0 : index
    %c0_4 = arith.constant 0 : index
    %3 = vector.load %arg2[%c0_2, %c0_3, %c0_4] : memref<4x32x16xf32, #tpu.memory_space<vmem>>, vector<4x32x16xf32>
    "tpu.trace_start"() <{level = 10 : i32, message = "ngd,nld->ngl"}> : () -> ()
    %cst_5 = arith.constant dense<0.000000e+00> : vector<4x4x32xf32>
    %4 = tpu.matmul %2, %3, %cst_5 {dimension_numbers = #tpu.dot_dimension_numbers<[2], [2], [1], [1], [0, 0, 0, 1, 1, 1], [0], [0]>} : vector<4x4x16xf32>, vector<4x32x16xf32>, vector<4x4x32xf32> -> vector<4x4x32xf32>
    "tpu.trace_stop"() : () -> ()
    %cst_6 = arith.constant dense<0xFF800000> : vector<4x4xf32>
    %5 = vector.multi_reduction <maximumf>, %4, %cst_6 [2] : vector<4x4x32xf32> to vector<4x4xf32>
    %6 = vector.shape_cast %5 : vector<4x4xf32> to vector<4x4x1xf32>
    %7 = vector.broadcast %6 : vector<4x4x1xf32> to vector<4x4x32xf32>
    %8 = arith.subf %4, %7 : vector<4x4x32xf32>
    %9 = math.exp %8 : vector<4x4x32xf32>
    %cst_7 = arith.constant dense<0.000000e+00> : vector<4x4xf32>
    %10 = vector.multi_reduction <add>, %9, %cst_7 [2] : vector<4x4x32xf32> to vector<4x4xf32>
    %11 = vector.shape_cast %10 : vector<4x4xf32> to vector<4x4x1xf32>
    %c0_8 = arith.constant 0 : index
    %c0_9 = arith.constant 0 : index
    %c0_10 = arith.constant 0 : index
    %12 = vector.load %arg3[%c0_8, %c0_9, %c0_10] : memref<4x32x16xf32, #tpu.memory_space<vmem>>, vector<4x32x16xf32>
    "tpu.trace_start"() <{level = 10 : i32, message = "ngl,nld->ngd"}> : () -> ()
    %cst_11 = arith.constant dense<0.000000e+00> : vector<4x4x16xf32>
    %13 = tpu.matmul %9, %12, %cst_11 {dimension_numbers = #tpu.dot_dimension_numbers<[2], [1], [1], [2], [0, 0, 0, 1, 1, 2], [0], [0]>} : vector<4x4x32xf32>, vector<4x32x16xf32>, vector<4x4x16xf32> -> vector<4x4x16xf32>
    "tpu.trace_stop"() : () -> ()
    %14 = tpu.reciprocal %11 {approx = true} : vector<4x4x1xf32> -> vector<4x4x1xf32>
    %15 = vector.broadcast %14 : vector<4x4x1xf32> to vector<4x4x16xf32>
    %16 = arith.mulf %13, %15 : vector<4x4x16xf32>
    %c0_12 = arith.constant 0 : index
    %c0_13 = arith.constant 0 : index
    %c0_14 = arith.constant 0 : index
    %17 = vector.load %arg4[%c0_12, %c0_13, %c0_14] : memref<4x4x16xf32, #tpu.memory_space<vmem>>, vector<4x4x16xf32>
    tpu.vector_store %arg4[%c0_12, %c0_13, %c0_14], %16 {strides = array<i32>} : memref<4x4x16xf32, #tpu.memory_space<vmem>>, vector<4x4x16xf32>,
    return
  }
  func.func @transform_0(%arg0: i32) -> (i32, i32, i32) {
    %c0_i32 = arith.constant 0 : i32
    %c0_i32_0 = arith.constant 0 : i32
    %c0_i32_1 = arith.constant 0 : i32
    return %arg0, %c0_i32, %c0_i32_0 : i32, i32, i32
  }
  func.func @transform_1(%arg0: i32) -> (i32, i32, i32) {
    %c0_i32 = arith.constant 0 : i32
    %c0_i32_0 = arith.constant 0 : i32
    %c0_i32_1 = arith.constant 0 : i32
    return %arg0, %c0_i32, %c0_i32_0 : i32, i32, i32
  }
  func.func @transform_2(%arg0: i32) -> (i32, i32, i32) {
    %c0_i32 = arith.constant 0 : i32
    %c0_i32_0 = arith.constant 0 : i32
    %c0_i32_1 = arith.constant 0 : i32
    return %arg0, %c0_i32, %c0_i32_0 : i32, i32, i32
  }
  func.func @transform_3(%arg0: i32) -> (i32, i32, i32) {
    %c0_i32 = arith.constant 0 : i32
    %c0_i32_0 = arith.constant 0 : i32
    %c0_i32_1 = arith.constant 0 : i32
    return %arg0, %c0_i32, %c0_i32_0 : i32, i32, i32
  }
}

module attributes {stable_mosaic.version = 11 : i64} {
  func.func @_local_attn_kernel(%arg0: i32, %arg1: i32, %arg2: memref<4x32x16xf32, #tpu.memory_space<vmem>>, %arg3: memref<4x40x16xf32, #tpu.memory_space<vmem>>, %arg4: memref<4x40x16xf32, #tpu.memory_space<vmem>>, %arg5: memref<4x4x16xf32, #tpu.memory_space<vmem>>, %arg6: memref<4x4x16xf32, #tpu.memory_space<vmem>>, %arg7: memref<4x32x16xf32, #tpu.memory_space<vmem>>) attributes {dimension_semantics = [#tpu.dimension_semantics<parallel>, #tpu.dimension_semantics<parallel>], iteration_bounds = array<i64: 1, 1>, scalar_prefetch = 0 : i64, scratch_operands = 0 : i64, tpu.core_type = #tpu.core_type<tc>, window_params = [{transform_indices = @transform_0, window_bounds = array<i64: 4, 32, 16>}, {transform_indices = @transform_1, window_bounds = array<i64: 4, 40, 16>}, {transform_indices = @transform_2, window_bounds = array<i64: 4, 40, 16>}, {transform_indices = @transform_3, window_bounds = array<i64: 4, 4, 16>}, {transform_indices = @transform_4, window_bounds = array<i64: 4, 4, 16>}, {transform_indices = @transform_5, window_bounds = array<i64: 4, 32, 16>}]} {
    %c32_i32 = arith.constant 32 : i32
    %0 = arith.muli %arg1, %c32_i32 : i32
    %1 = tpu.assume_multiple %0, 32 : i32
    %c0 = arith.constant 0 : index
    %c0_0 = arith.constant 0 : index
    %c0_1 = arith.constant 0 : index
    %2 = vector.load %arg2[%c0, %c0_0, %c0_1] : memref<4x32x16xf32, #tpu.memory_space<vmem>>, vector<4x32x16xf32>
    %c0_2 = arith.constant 0 : index
    %3 = arith.index_cast %1 : i32 to index
    %c0_3 = arith.constant 0 : index
    %4 = vector.load %arg3[%c0_2, %3, %c0_3] : memref<4x40x16xf32, #tpu.memory_space<vmem>>, vector<4x40x16xf32>
    %c0_4 = arith.constant 0 : index
    %5 = arith.index_cast %1 : i32 to index
    %c0_5 = arith.constant 0 : index
    %6 = vector.load %arg4[%c0_4, %5, %c0_5] : memref<4x40x16xf32, #tpu.memory_space<vmem>>, vector<4x40x16xf32>
    %c0_6 = arith.constant 0 : index
    %c0_7 = arith.constant 0 : index
    %c0_8 = arith.constant 0 : index
    %7 = vector.load %arg5[%c0_6, %c0_7, %c0_8] : memref<4x4x16xf32, #tpu.memory_space<vmem>>, vector<4x4x16xf32>
    %c0_9 = arith.constant 0 : index
    %c0_10 = arith.constant 0 : index
    %c0_11 = arith.constant 0 : index
    %8 = vector.load %arg6[%c0_9, %c0_10, %c0_11] : memref<4x4x16xf32, #tpu.memory_space<vmem>>, vector<4x4x16xf32>
    "tpu.trace_start"() <{level = 10 : i32, message = "nqd,ngd->nqg"}> : () -> ()
    %cst = arith.constant dense<0.000000e+00> : vector<4x32x4xf32>
    %9 = tpu.matmul %2, %7, %cst {dimension_numbers = #tpu.dot_dimension_numbers<[2], [2], [1], [1], [0, 0, 0, 1, 1, 1], [0], [0]>} : vector<4x32x16xf32>, vector<4x4x16xf32>, vector<4x32x4xf32> -> vector<4x32x4xf32>
    "tpu.trace_stop"() : () -> ()
    "tpu.trace_start"() <{level = 10 : i32, message = "nqd,nsd->nqs"}> : () -> ()
    %cst_12 = arith.constant dense<0.000000e+00> : vector<4x32x40xf32>
    %10 = tpu.matmul %2, %4, %cst_12 {dimension_numbers = #tpu.dot_dimension_numbers<[2], [2], [1], [1], [0, 0, 0, 1, 1, 1], [0], [0]>} : vector<4x32x16xf32>, vector<4x40x16xf32>, vector<4x32x40xf32> -> vector<4x32x40xf32>
    "tpu.trace_stop"() : () -> ()
    %11 = tpu.iota {dimensions = array<i32: 0>} : vector<32x40xi32>
    %12 = tpu.iota {dimensions = array<i32: 1>} : vector<32x40xi32>
    %13 = vector.broadcast %1 : i32 to vector<32x40xi32>
    %14 = arith.addi %13, %12 : vector<32x40xi32>
    %c4_i32 = arith.constant 4 : i32
    %15 = vector.broadcast %c4_i32 : i32 to vector<32x40xi32>
    %16 = arith.subi %14, %15 : vector<32x40xi32>
    %17 = arith.cmpi sge, %12, %11 : vector<32x40xi32>
    %c8_i32 = arith.constant 8 : i32
    %18 = vector.broadcast %c8_i32 : i32 to vector<32x40xi32>
    %19 = arith.addi %11, %18 : vector<32x40xi32>
    %20 = arith.cmpi sle, %12, %19 : vector<32x40xi32>
    %21 = arith.andi %17, %20 : vector<32x40xi1>
    %c0_i32 = arith.constant 0 : i32
    %22 = vector.broadcast %c0_i32 : i32 to vector<32x40xi32>
    %23 = arith.cmpi sge, %16, %22 : vector<32x40xi32>
    %24 = arith.andi %21, %23 : vector<32x40xi1>
    %c32_i32_13 = arith.constant 32 : i32
    %25 = vector.broadcast %c32_i32_13 : i32 to vector<32x40xi32>
    %26 = arith.cmpi slt, %16, %25 : vector<32x40xi32>
    %27 = arith.andi %24, %26 : vector<32x40xi1>
    %c8_i32_14 = arith.constant 8 : i32
    %c0_i32_15 = arith.constant 0 : i32
    %28 = arith.cmpi eq, %c8_i32_14, %c0_i32_15 : i32
    %c1_i32 = arith.constant 1 : i32
    %29 = arith.select %28, %c1_i32, %c8_i32_14 : i32
    %30 = vector.broadcast %29 : i32 to vector<32x40xi32>
    %31 = arith.remsi %16, %30 : vector<32x40xi32>
    %c0_i32_16 = arith.constant 0 : i32
    %32 = vector.broadcast %c0_i32_16 : i32 to vector<32x40xi32>
    %33 = arith.cmpi ne, %31, %32 : vector<32x40xi32>
    %c0_i32_17 = arith.constant 0 : i32
    %34 = vector.broadcast %c0_i32_17 : i32 to vector<32x40xi32>
    %35 = arith.cmpi slt, %31, %34 : vector<32x40xi32>
    %c0_i32_18 = arith.constant 0 : i32
    %36 = arith.cmpi slt, %29, %c0_i32_18 : i32
    %37 = vector.broadcast %36 : i1 to vector<32x40xi1>
    %38 = vector.broadcast %37 : vector<32x40xi1> to vector<32x40xi1>
    %39 = arith.xori %35, %38 : vector<32x40xi1>
    %40 = arith.andi %39, %33 : vector<32x40xi1>
    %41 = vector.broadcast %29 : i32 to vector<32x40xi32>
    %42 = arith.addi %31, %41 : vector<32x40xi32>
    %43 = arith.select %40, %42, %31 : vector<32x40xi1>, vector<32x40xi32>
    %c0_i32_19 = arith.constant 0 : i32
    %44 = vector.broadcast %c0_i32_19 : i32 to vector<32x40xi32>
    %45 = arith.cmpi eq, %43, %44 : vector<32x40xi32>
    %cst_20 = arith.constant -1.000000e+04 : f32
    %cst_21 = arith.constant 0.000000e+00 : f32
    %46 = vector.broadcast %cst_20 : f32 to vector<32x40xf32>
    %47 = vector.broadcast %cst_21 : f32 to vector<32x40xf32>
    %48 = arith.select %45, %46, %47 : vector<32x40xi1>, vector<32x40xf32>
    %cst_22 = arith.constant 0xFF800000 : f32
    %49 = vector.broadcast %cst_22 : f32 to vector<32x40xf32>
    %50 = arith.select %27, %48, %49 : vector<32x40xi1>, vector<32x40xf32>
    %51 = vector.shape_cast %50 : vector<32x40xf32> to vector<1x32x40xf32>
    %52 = vector.broadcast %51 : vector<1x32x40xf32> to vector<4x32x40xf32>
    %53 = arith.addf %10, %52 : vector<4x32x40xf32>
    %cst_23 = arith.constant dense<0xFF800000> : vector<4x32xf32>
    %54 = vector.multi_reduction <maximumf>, %9, %cst_23 [2] : vector<4x32x4xf32> to vector<4x32xf32>
    %cst_24 = arith.constant dense<0xFF800000> : vector<4x32xf32>
    %55 = vector.multi_reduction <maximumf>, %53, %cst_24 [2] : vector<4x32x40xf32> to vector<4x32xf32>
    %56 = arith.maximumf %54, %55 : vector<4x32xf32>
    %57 = vector.shape_cast %56 : vector<4x32xf32> to vector<4x32x1xf32>
    %58 = vector.broadcast %57 : vector<4x32x1xf32> to vector<4x32x4xf32>
    %59 = arith.subf %9, %58 : vector<4x32x4xf32>
    %60 = math.exp %59 : vector<4x32x4xf32>
    %61 = vector.broadcast %57 : vector<4x32x1xf32> to vector<4x32x40xf32>
    %62 = arith.subf %53, %61 : vector<4x32x40xf32>
    %63 = math.exp %62 : vector<4x32x40xf32>
    %cst_25 = arith.constant dense<0.000000e+00> : vector<4x32xf32>
    %64 = vector.multi_reduction <add>, %60, %cst_25 [2] : vector<4x32x4xf32> to vector<4x32xf32>
    %65 = vector.shape_cast %64 : vector<4x32xf32> to vector<4x32x1xf32>
    %cst_26 = arith.constant dense<0.000000e+00> : vector<4x32xf32>
    %66 = vector.multi_reduction <add>, %63, %cst_26 [2] : vector<4x32x40xf32> to vector<4x32xf32>
    %67 = vector.shape_cast %66 : vector<4x32xf32> to vector<4x32x1xf32>
    %68 = arith.addf %65, %67 : vector<4x32x1xf32>
    "tpu.trace_start"() <{level = 10 : i32, message = "nqg,ngd->nqd"}> : () -> ()
    %cst_27 = arith.constant dense<0.000000e+00> : vector<4x32x16xf32>
    %69 = tpu.matmul %60, %8, %cst_27 {dimension_numbers = #tpu.dot_dimension_numbers<[2], [1], [1], [2], [0, 0, 0, 1, 1, 2], [0], [0]>} : vector<4x32x4xf32>, vector<4x4x16xf32>, vector<4x32x16xf32> -> vector<4x32x16xf32>
    "tpu.trace_stop"() : () -> ()
    "tpu.trace_start"() <{level = 10 : i32, message = "nqs,nsd->nqd"}> : () -> ()
    %cst_28 = arith.constant dense<0.000000e+00> : vector<4x32x16xf32>
    %70 = tpu.matmul %63, %6, %cst_28 {dimension_numbers = #tpu.dot_dimension_numbers<[2], [1], [1], [2], [0, 0, 0, 1, 1, 2], [0], [0]>} : vector<4x32x40xf32>, vector<4x40x16xf32>, vector<4x32x16xf32> -> vector<4x32x16xf32>
    "tpu.trace_stop"() : () -> ()
    %71 = arith.addf %69, %70 : vector<4x32x16xf32>
    %72 = tpu.reciprocal %68 {approx = true} : vector<4x32x1xf32> -> vector<4x32x1xf32>
    %73 = vector.broadcast %72 : vector<4x32x1xf32> to vector<4x32x16xf32>
    %74 = arith.mulf %71, %73 : vector<4x32x16xf32>
    %c0_29 = arith.constant 0 : index
    %c0_30 = arith.constant 0 : index
    %c0_31 = arith.constant 0 : index
    %75 = vector.load %arg7[%c0_29, %c0_30, %c0_31] : memref<4x32x16xf32, #tpu.memory_space<vmem>>, vector<4x32x16xf32>
    tpu.vector_store %arg7[%c0_29, %c0_30, %c0_31], %74 {strides = array<i32>} : memref<4x32x16xf32, #tpu.memory_space<vmem>>, vector<4x32x16xf32>,
    return
  }
  func.func @transform_0(%arg0: i32, %arg1: i32) -> (i32, i32, i32) {
    %c0_i32 = arith.constant 0 : i32
    %c0_i32_0 = arith.constant 0 : i32
    return %arg0, %arg1, %c0_i32 : i32, i32, i32
  }
  func.func @transform_1(%arg0: i32, %arg1: i32) -> (i32, i32, i32) {
    %c0_i32 = arith.constant 0 : i32
    %c0_i32_0 = arith.constant 0 : i32
    %c0_i32_1 = arith.constant 0 : i32
    return %arg0, %c0_i32, %c0_i32_0 : i32, i32, i32
  }
  func.func @transform_2(%arg0: i32, %arg1: i32) -> (i32, i32, i32) {
    %c0_i32 = arith.constant 0 : i32
    %c0_i32_0 = arith.constant 0 : i32
    %c0_i32_1 = arith.constant 0 : i32
    return %arg0, %c0_i32, %c0_i32_0 : i32, i32, i32
  }
  func.func @transform_3(%arg0: i32, %arg1: i32) -> (i32, i32, i32) {
    %c0_i32 = arith.constant 0 : i32
    %c0_i32_0 = arith.constant 0 : i32
    %c0_i32_1 = arith.constant 0 : i32
    return %arg0, %c0_i32, %c0_i32_0 : i32, i32, i32
  }
  func.func @transform_4(%arg0: i32, %arg1: i32) -> (i32, i32, i32) {
    %c0_i32 = arith.constant 0 : i32
    %c0_i32_0 = arith.constant 0 : i32
    %c0_i32_1 = arith.constant 0 : i32
    return %arg0, %c0_i32, %c0_i32_0 : i32, i32, i32
  }
  func.func @transform_5(%arg0: i32, %arg1: i32) -> (i32, i32, i32) {
    %c0_i32 = arith.constant 0 : i32
    %c0_i32_0 = arith.constant 0 : i32
    return %arg0, %arg1, %c0_i32 : i32, i32, i32
  }
}

</mosaic_0001>

<bundles_post_ra>
// kernel: basic_layer_forward.6
= control target key start
LH: loop header
LB: loop body
LE: loop exit
PB: predicated region body
PF: predicated region fallthrough
CT: control target
= control target key end

     0   :  { %s678_s15 = smov 0   ;;  %s680_s16 = smov 0   ;;  %s747_s0 = inlined_call_operand.vmem [shape: f32[1,2,32,32], index: 0, kind: input, shape index: {}]   ;;  %s748_s1 = inlined_call_operand.vmem [shape: f32[6,1,32,4], index: 1, kind: input, shape index: {}]   ;;  %s749_s2 = inlined_call_operand.vmem [shape: f32[6,1,4], index: 2, kind: input, shape index: {}]   ;;  %s750_s3 = inlined_call_operand.vmem [shape: f32[6,1,4], index: 3, kind: input, shape index: {}]   ;;  %s751_s4 = inlined_call_operand.vmem [shape: f32[6,2,32,4], index: 4, kind: output, shape index: {}]  }
   0x1   :  { %s682_s17 = smov 0   ;;  %s684_s18 = smov 0  }
   0x2   :  { %s686_s19 = smov 0  }
   0x3 LB: > { %s23_s20 = sadd.s32 1, %s643_s17  ;;  %s26_s21 = sadd.s32 1, %s647_s18  ;;  %s651_s19 = sphi %s686_s19, %s14_s19   ;;  %s647_s18 = sphi %s684_s18, %s755_s18   ;;  %s643_s17 = sphi %s682_s17, %s754_s17   ;;  %s639_s16 = sphi %s680_s16, %s753_s16   ;;  %s635_s15 = sphi %s678_s15, %s752_s15  }
   0x4   : > { %p24_p0 = scmp.ge.s32.totalorder %s23_s20, 2  ;;  %p525_p1 = scmp.ge.s32.totalorder %s651_s19, 1 }
   0x5   : > { %p202_p2 = scmp.lt.s32.totalorder %s651_s19, 13 }
   0x6   : > { %s757_s20 = smov (%p24_p0, %s23_s20), 0  ;;  %s759_s21 = smov (!%p24_p0, %s26_s21), %s647_s18 }
   0x7   : > { %p203_p3 = pnand %p525_p1, %p202_p2  ;;  %p28_p4 = scmp.ge.s32.totalorder %s759_s21, 6 }
   0x8   : > { %p248_p5 = scmp.lt.s32.totalorder (!%p203_p3), %s639_s16, 5  ;;  %p243_p6 = scmp.lt.s32.totalorder (!%p203_p3), %s635_s15, 1 }
   0x9   : > { %s761_s21 = smov (%p28_p4, %s759_s21), 0  ;;  %206 = sbr.rel (%p203_p3) target bundleno = 229 (0xe5), region = 36 }
   0xe   : > { %s763_s16 = smov (!%p248_p5, %s639_s16), 5  ;;  %s765_s15 = smov (!%p243_p6, %s635_s15), 1  ;;  %vm276_vm0 = vcmask 261120   ;;  %vm400_vm1 = vcmask 31744  }
   0xf   : > { %s542_s22 = sshll.u32 %s763_s16, 5  ;;  %s531_s23 = sshll.u32 %s763_s16, 3 }
  0x10   : > { %s252_s26 = scalar_lea.vmem %s748_s1, %s542_s22  ;;  %s541_s27 = sshll.u32 %s765_s15, 5 }
  0x11   : > { %v275_v0 = vld [vmem:[%s252_s26 + $0x18] sm:$0xff]  ;;  %v274_v1 = vld [vmem:[%s252_s26 + $0x10] sm:$0xff]  ;;  %s530_s28 = sshll.u32 %s765_s15, 2  ;;  %v273_v2 = vld [vmem:[%s252_s26 + $0x8] sm:$0xff]  ;;  %s247_s6 = scalar_lea.vmem %s747_s0, %s541_s27 }
  0x12   : > { %551 = vmatprep.subr.mxu0 %v275_v0  ;;  %565 = vmatprep.subr.mxu1 %v275_v0  ;;  %s715_s29 = sadd.s32 %s531_s23, %s530_s28  ;;  %v272_v3 = vld [vmem:[%s252_s26] sm:$0xff]  ;;  %v270_v5 = vld [vmem:[%s247_s6 + $0x10] sm:$0xff]  ;;  %v269_v6 = vld [vmem:[%s247_s6 + $0x8] sm:$0xff]  ;;  %s255_s9 = scalar_lea.vmem %s749_s2, %s763_s16 }
  0x13   : > { %552 = vmatpush3.msra.mxu0 %v275_v0  ;;  %569 = vmatpush3.msra.mxu1 %v275_v0  ;;  %v268_v4 = vld [vmem:[%s247_s6] sm:$0xff]  ;;  %v271_v7 = vld [vmem:[%s247_s6 + $0x18] sm:$0xff]  ;;  %s258_s12 = scalar_lea.vmem %s750_s3, %s763_s16  ;;  %s532_s13 = sshll.u32 %s715_s29, 3 }
  0x14   : > { %553 = vmatprep.subr.mxu0 %v274_v1  ;;  %566 = vmatprep.subr.mxu1 %v274_v1  ;;  %v537_v9 = vld [vmem:[%s255_s9] ss:$0 sm:$0xff]  ;;  %s267_s22 = scalar_lea.vmem %s751_s4, %s532_s13 }
  0x15   : > { %554 = vmatpush3.msra.mxu0 %v274_v1  ;;  %570 = vmatpush3.msra.mxu1 %v274_v1  ;;  %v538_v13 = vld [vmem:[%s258_s12] ss:$0 sm:$0xff] }
  0x16   : > { %555 = vmatprep.subr.mxu0 %v273_v2  ;;  %567 = vmatprep.subr.mxu1 %v273_v2 }
  0x17   : > { %556 = vmatpush3.msra.mxu0 %v273_v2  ;;  %571 = vmatpush3.msra.mxu1 %v273_v2 }
  0x18   : > { %557 = vmatprep.subr.mxu0 %v272_v3  ;;  %568 = vmatprep.subr.mxu1 %v272_v3 }
  0x19   : > { %558 = vmatpush3.msra.mxu0 %v272_v3  ;;  %572 = vmatpush3.msra.mxu1 %v272_v3 }
  0x1a   : > { %559 = vmatprep.mubr.msk.f32.mxu0 %vm276_vm0, %v268_v4  ;;  %562 = vmatprep.mubr.msk.f32.mxu1 %vm276_vm0, %v270_v5 }
  0x1b   : > { %560 = vmatmul.mubr.msk.f32.vlgmr.msra.gmra.mxu0 %vm276_vm0, %v269_v6  ;;  %563 = vmatmul.mubr.msk.f32.vlgmr.msra.gmra.mxu1 %vm276_vm0, %v271_v7 }
  0xdb   : > { %v561_v8 = vpop.f32.mrf.mxu0  ;;  %v564_v10 = vpop.f32.mrf.mxu1 }
  0xdc   : > { %v375_v11 = vmax.f32 %v561_v8, 0.0  ;;  %v377_v12 = vmax.f32 %v564_v10, 0.0 }
  0xdd   : > { %v355_v14 = vpop.f32.mrf.mxu0  ;;  %v365_v15 = vpop.f32.mrf.mxu1 }
  0xde   : > { %v386_v16 = vmul.f32 %v537_v9, %v375_v11  ;;  %v388_v17 = vmul.f32 %v537_v9, %v377_v12  ;;  %v374_v18 = vmax.f32 %v355_v14, 0.0  ;;  %v376_v19 = vmax.f32 %v365_v15, 0.0 }
  0xe0   : > { %v397_v20 = vadd.f32 %v538_v13, %v386_v16  ;;  %v399_v21 = vadd.f32 %v538_v13, %v388_v17  ;;  %v385_v22 = vmul.f32 %v537_v9, %v374_v18  ;;  %v387_v23 = vmul.f32 %v537_v9, %v376_v19 }
  0xe2   : > { %402 = vst.msk [vmem:[%s267_s22 + $0x8] sm:$0xff] %vm400_vm1, %v397_v20  ;;  %404 = vst.msk [vmem:[%s267_s22 + $0x18] sm:$0xff] %vm400_vm1, %v399_v21  ;;  %v396_v24 = vadd.f32 %v538_v13, %v385_v22  ;;  %v398_v25 = vadd.f32 %v538_v13, %v387_v23 }
  0xe4   : > { %401 = vst.msk [vmem:[%s267_s22] sm:$0xff] %vm400_vm1, %v396_v24  ;;  %403 = vst.msk [vmem:[%s267_s22 + $0x10] sm:$0xff] %vm400_vm1, %v398_v25 }
  0xe5 PF: > { %s14_s19 = sadd.s32 1, %s651_s19   ;;  %s752_s15 = smov %s643_s17 }
  0xe6   : > { %p11_p7 = scmp.ge.s32.totalorder %s14_s19, 14   ;;  %s753_s16 = smov %s647_s18 }
  0xe7   : > { %s754_s17 = smov %s757_s20  ;;  %s755_s18 = smov %s761_s21 }
  0xe8   :  { %13 = sbr.rel (!%p11_p7) target bundleno = 3 (0x3), region = 75 }

// kernel: basic_layer_forward.7
= control target key start
LH: loop header
LB: loop body
LE: loop exit
PB: predicated region body
PF: predicated region fallthrough
CT: control target
= control target key end

     0   :  { %s1199_s15 = smov 0   ;;  %s1201_s16 = smov 0   ;;  %s1324_s0 = inlined_call_operand.vmem [shape: f32[6,2,36,4], index: 0, kind: input, shape index: {}]   ;;  %s1325_s1 = inlined_call_operand.vmem [shape: f32[6,5,4,16], index: 1, kind: input, shape index: {}]   ;;  %s1326_s2 = inlined_call_operand.vmem [shape: f32[6,1,16], index: 2, kind: input, shape index: {}]   ;;  %s1327_s3 = inlined_call_operand.vmem [shape: f32[6,1,16], index: 3, kind: input, shape index: {}]   ;;  %s1328_s4 = inlined_call_operand.vmem [shape: f32[6,2,32,16], index: 4, kind: output, shape index: {}]  }
   0x1   :  { %s1203_s17 = smov 0   ;;  %s1205_s18 = smov 0  }
   0x2   :  { %s1207_s19 = smov 0  }
   0x3 LB: > { %s23_s20 = sadd.s32 1, %s1164_s17  ;;  %s26_s21 = sadd.s32 1, %s1168_s18  ;;  %s1172_s19 = sphi %s1207_s19, %s14_s19   ;;  %s1168_s18 = sphi %s1205_s18, %s1332_s18   ;;  %s1164_s17 = sphi %s1203_s17, %s1331_s17   ;;  %s1160_s16 = sphi %s1201_s16, %s1330_s16   ;;  %s1156_s15 = sphi %s1199_s15, %s1329_s15  }
   0x4   : > { %p24_p0 = scmp.ge.s32.totalorder %s23_s20, 2  ;;  %p985_p1 = scmp.ge.s32.totalorder %s1172_s19, 1 }
   0x5   : > { %p208_p2 = scmp.lt.s32.totalorder %s1172_s19, 13 }
   0x6   : > { %s1334_s20 = smov (%p24_p0, %s23_s20), 0  ;;  %s1336_s21 = smov (!%p24_p0, %s26_s21), %s1168_s18 }
   0x7   : > { %p209_p3 = pnand %p985_p1, %p208_p2  ;;  %p28_p4 = scmp.ge.s32.totalorder %s1336_s21, 6 }
   0x8   : > { %p253_p5 = scmp.lt.s32.totalorder (!%p209_p3), %s1160_s16, 5  ;;  %p255_p6 = scmp.lt.s32.totalorder (!%p209_p3), %s1156_s15, 1 }
   0x9   : > { %s1338_s21 = smov (%p28_p4, %s1336_s21), 0  ;;  %212 = sbr.rel (%p209_p3) target bundleno = 247 (0xf7), region = 36 }
   0xe   : > { %s1340_s16 = smov (!%p253_p5, %s1160_s16), 5  ;;  %s1342_s15 = smov (!%p255_p6, %s1156_s15), 1  ;;  %vm306_vm0 = vcmask 1043456   ;;  %vm293_vm1 = vcmask 31744   ;;  %vm851_vm2 = vcmask 130048  }
   0xf   : > { %s1092_s22 = smul.u32 10, %s1340_s16  ;;  %s988_s7 = sshll.u32 %s1342_s15, 2 }
  0x10   : > { %s1091_s23 = smul.u32 5, %s1342_s15  ;;  %s989_s8 = sshll.u32 %s1340_s16, 3 }
  0x11   : > { %s1093_s24 = smul.u32 20, %s1340_s16  ;;  %s269_s11 = scalar_lea.vmem %s1326_s2, %s1340_s16 }
  0x12   : > { %s259_s25 = sadd.s32 %s1092_s22, %s1091_s23  ;;  %s279_s12 = sadd.s32 %s989_s8, %s988_s7  ;;  %v1020_v51 = vld [vmem:[%s269_s11] ss:$0 sm:$0xff] }
  0x13   : > { %s986_s26 = sshll.u32 %s259_s25, 3  ;;  %s266_s29 = scalar_lea.vmem %s1325_s1, %s1093_s24 }
  0x14   : > { %s1242_s6 = scalar_lea.vmem %s1324_s0, %s986_s26  ;;  %v991_v0 = vld [vmem:[%s266_s29 + $0x4] sm:$0xf]  ;;  %v286_v1 = vld [vmem:[%s266_s29] sm:$0xf]  ;;  %v1002_v6 = vld [vmem:[%s266_s29 + $0x8] sm:$0xf]  ;;  %s272_s22 = scalar_lea.vmem %s1327_s3, %s1340_s16 }
  0x15   : > { %1089 = vmatprep.subr.msk.mxu1 %vm306_vm0, %v991_v0  ;;  %1049 = vmatprep.subr.msk.mxu0 %vm306_vm0, %v991_v0  ;;  %v287_v2 = vld [vmem:[%s1242_s6 + $0x1] sm:$0xff]  ;;  %v289_v3 = vld [vmem:[%s1242_s6 + $0x11] sm:$0xff]  ;;  %v288_v4 = vld [vmem:[%s1242_s6 + $0x9] sm:$0xff]  ;;  %s990_s15 = sshll.u32 %s279_s12, 3 }
  0x16   : > { %1090 = vmatpush3.msk.msra.mxu1 %vm306_vm0, %v991_v0  ;;  %1050 = vmatpush3.msk.msra.mxu0 %vm306_vm0, %v991_v0  ;;  %v290_v5 = vld [vmem:[%s1242_s6 + $0x19] sm:$0xff]  ;;  %v495_v8 = vld [vmem:[%s1242_s6 + $0x2] sm:$0xff]  ;;  %v1008_v9 = vld [vmem:[%s266_s29 + $0xc] sm:$0xf]  ;;  %s281_s16 = scalar_lea.vmem %s1328_s4, %s990_s15 }
  0x17   : > { %1051 = vmatprep.mubr.msk.f32.mxu0 %vm293_vm1, %v287_v2  ;;  %1054 = vmatprep.mubr.msk.f32.mxu1 %vm293_vm1, %v289_v3  ;;  %v282_v7 = vld [vmem:[%s1242_s6] sm:$0xff]  ;;  %v496_v10 = vld [vmem:[%s1242_s6 + $0xa] sm:$0xff]  ;;  %v497_v14 = vld [vmem:[%s1242_s6 + $0x12] sm:$0xff] }
  0x18   : > { %1057 = vmatprep.subr.msk.mxu1 %vm306_vm0, %v286_v1  ;;  %1052 = vmatmul.mubr.msk.f32.vlgmr.msra.gmra.mxu0 %vm293_vm1, %v288_v4  ;;  %v283_v11 = vld [vmem:[%s1242_s6 + $0x8] sm:$0xff]  ;;  %v1014_v12 = vld [vmem:[%s266_s29 + $0x10] sm:$0xf]  ;;  %v498_v15 = vld [vmem:[%s1242_s6 + $0x1a] sm:$0xff] }
  0x19   : > { %1055 = vmatmul.mubr.msk.f32.vlgmr.msra.gmra.mxu1 %vm293_vm1, %v290_v5  ;;  %1065 = vmatprep.subr.msk.mxu0 %vm306_vm0, %v1002_v6  ;;  %v284_v13 = vld [vmem:[%s1242_s6 + $0x10] sm:$0xff]  ;;  %v285_v16 = vld [vmem:[%s1242_s6 + $0x18] sm:$0xff]  ;;  %v715_v17 = vld [vmem:[%s1242_s6 + $0x4] sm:$0xff] }
  0x1a   : > { %1058 = vmatpush3.msk.msra.mxu1 %vm306_vm0, %v286_v1  ;;  %1066 = vmatpush3.msk.msra.mxu0 %vm306_vm0, %v1002_v6  ;;  %v605_v18 = vld [vmem:[%s1242_s6 + $0x3] sm:$0xff]  ;;  %v716_v19 = vld [vmem:[%s1242_s6 + $0xc] sm:$0xff]  ;;  %v717_v21 = vld [vmem:[%s1242_s6 + $0x14] sm:$0xff] }
  0x1b   : > { %1059 = vmatprep.mubr.msk.f32.mxu1 %vm293_vm1, %v282_v7  ;;  %1067 = vmatprep.mubr.msk.f32.mxu0 %vm293_vm1, %v495_v8  ;;  %v606_v20 = vld [vmem:[%s1242_s6 + $0xb] sm:$0xff]  ;;  %v607_v22 = vld [vmem:[%s1242_s6 + $0x13] sm:$0xff]  ;;  %v718_v23 = vld [vmem:[%s1242_s6 + $0x1c] sm:$0xff] }
  0x1c   : > { %1073 = vmatprep.subr.msk.mxu1 %vm306_vm0, %v1008_v9  ;;  %1068 = vmatmul.mubr.msk.f32.vlgmr.msra.gmra.mxu0 %vm293_vm1, %v496_v10  ;;  %v608_v24 = vld [vmem:[%s1242_s6 + $0x1b] sm:$0xff] }
  0x1d   : > { %1060 = vmatmul.mubr.msk.f32.vlgmr.msra.gmra.mxu1 %vm293_vm1, %v283_v11  ;;  %1081 = vmatprep.subr.msk.mxu0 %vm306_vm0, %v1014_v12  ;;  %v1021_v58 = vld [vmem:[%s272_s22] ss:$0 sm:$0xff] }
  0x1e   : > { %1074 = vmatpush3.msk.msra.mxu1 %vm306_vm0, %v1008_v9  ;;  %1082 = vmatpush3.msk.msra.mxu0 %vm306_vm0, %v1014_v12 }
  0x1f   : > { %1062 = vmatprep.mubr.msk.f32.mxu1 %vm293_vm1, %v284_v13  ;;  %1070 = vmatprep.mubr.msk.f32.mxu0 %vm293_vm1, %v497_v14 }
  0x20   : > { %1071 = vmatmul.mubr.msk.f32.gmra.mxu0 %vm293_vm1, %v498_v15 }
  0x21   : > { %1063 = vmatmul.mubr.msk.f32.gmra.mxu1 %vm293_vm1, %v285_v16  ;;  %1083 = vmatprep.mubr.msk.f32.mxu0 %vm293_vm1, %v715_v17 }
  0x22   : > { %1075 = vmatprep.mubr.msk.f32.mxu1 %vm293_vm1, %v605_v18 }
  0x24   : > { %1084 = vmatmul.mubr.msk.f32.vlgmr.msra.gmra.mxu0 %vm293_vm1, %v716_v19 }
  0x25   : > { %1076 = vmatmul.mubr.msk.f32.vlgmr.msra.gmra.mxu1 %vm293_vm1, %v606_v20  ;;  %1086 = vmatprep.mubr.msk.f32.mxu0 %vm293_vm1, %v717_v21 }
  0x26   : > { %1078 = vmatprep.mubr.msk.f32.mxu1 %vm293_vm1, %v607_v22 }
  0x28   : > { %1087 = vmatmul.mubr.msk.f32.gmra.mxu0 %vm293_vm1, %v718_v23 }
  0x29   : > { %1079 = vmatmul.mubr.msk.f32.gmra.mxu1 %vm293_vm1, %v608_v24 }
  0xd8   : > { %v1053_v25 = vpop.f32.mrf.mxu0 }
  0xd9   : > { %v1056_v26 = vpop.f32.mrf.mxu1 }
  0xda   : > { %v376_v27 = vpop.f32.mrf.mxu0 }
  0xdb   : > { %v386_v28 = vpop.f32.mrf.mxu1 }
  0xdc   : > { %v1069_v29 = vpop.f32.mrf.mxu0 }
  0xdd   : > { %v1061_v30 = vpop.f32.mrf.mxu1 }
  0xde   : > { %v582_v31 = vpop.f32.mrf.mxu0  ;;  %v482_v33 = vadd.f32 %v1061_v30, %v1053_v25 }
  0xdf   : > { %v476_v32 = vpop.f32.mrf.mxu1 }
  0xe0   : > { %v1072_v34 = vpop.f32.mrf.mxu0  ;;  %v477_v36 = vadd.f32 %v476_v32, %v376_v27  ;;  %v602_v39 = vadd.f32 %v1069_v29, %v482_v33 }
  0xe1   : > { %v1064_v35 = vpop.f32.mrf.mxu1 }
  0xe2   : > { %v592_v37 = vpop.f32.mrf.mxu0  ;;  %v492_v40 = vadd.f32 %v1064_v35, %v1056_v26  ;;  %v601_v43 = vadd.f32 %v582_v31, %v477_v36 }
  0xe3   : > { %v486_v38 = vpop.f32.mrf.mxu1 }
  0xe4   : > { %v1085_v41 = vpop.f32.mrf.mxu0  ;;  %v487_v44 = vadd.f32 %v486_v38, %v386_v28  ;;  %v604_v48 = vadd.f32 %v1072_v34, %v492_v40 }
  0xe5   : > { %v1077_v42 = vpop.f32.mrf.mxu1 }
  0xe6   : > { %v712_v45 = vadd.f32 %v1077_v42, %v602_v39  ;;  %v802_v46 = vpop.f32.mrf.mxu0  ;;  %v603_v54 = vadd.f32 %v592_v37, %v487_v44 }
  0xe7   : > { %v692_v47 = vpop.f32.mrf.mxu1 }
  0xe8   : > { %v822_v49 = vadd.f32 %v1085_v41, %v712_v45  ;;  %v711_v50 = vadd.f32 %v692_v47, %v601_v43  ;;  %v1088_v53 = vpop.f32.mrf.mxu0 }
  0xe9   : > { %v1080_v52 = vpop.f32.mrf.mxu1 }
  0xea   : > { %v826_v55 = vmax.f32 %v822_v49, 0.0  ;;  %v821_v56 = vadd.f32 %v802_v46, %v711_v50  ;;  %v714_v57 = vadd.f32 %v1080_v52, %v604_v48  ;;  %v812_v0 = vpop.f32.mrf.mxu0 }
  0xeb   : > { %v702_v59 = vpop.f32.mrf.mxu1 }
  0xec   : > { %v837_v60 = vmul.f32 %v1020_v51, %v826_v55  ;;  %v825_v61 = vmax.f32 %v821_v56, 0.0  ;;  %v824_v62 = vadd.f32 %v1088_v53, %v714_v57  ;;  %v713_v63 = vadd.f32 %v702_v59, %v603_v54 }
  0xee   : > { %v848_v1 = vadd.f32 %v1021_v58, %v837_v60  ;;  %v836_v2 = vmul.f32 %v1020_v51, %v825_v61  ;;  %v828_v3 = vmax.f32 %v824_v62, 0.0  ;;  %v823_v4 = vadd.f32 %v812_v0, %v713_v63 }
  0xf0   : > { %853 = vst.msk [vmem:[%s281_s16 + $0x8] sm:$0xff] %vm851_vm2, %v848_v1  ;;  %v847_v5 = vadd.f32 %v1021_v58, %v836_v2  ;;  %v839_v6 = vmul.f32 %v1020_v51, %v828_v3  ;;  %v827_v7 = vmax.f32 %v823_v4, 0.0 }
  0xf2   : > { %852 = vst.msk [vmem:[%s281_s16] sm:$0xff] %vm851_vm2, %v847_v5  ;;  %v850_v8 = vadd.f32 %v1021_v58, %v839_v6  ;;  %v838_v9 = vmul.f32 %v1020_v51, %v827_v7 }
  0xf4   : > { %855 = vst.msk [vmem:[%s281_s16 + $0x18] sm:$0xff] %vm851_vm2, %v850_v8  ;;  %v849_v10 = vadd.f32 %v1021_v58, %v838_v9 }
  0xf6   : > { %854 = vst.msk [vmem:[%s281_s16 + $0x10] sm:$0xff] %vm851_vm2, %v849_v10 }
  0xf7 PF: > { %s14_s19 = sadd.s32 1, %s1172_s19   ;;  %s1329_s15 = smov %s1164_s17 }
  0xf8   : > { %p11_p7 = scmp.ge.s32.totalorder %s14_s19, 14   ;;  %s1330_s16 = smov %s1168_s18 }
  0xf9   : > { %s1331_s17 = smov %s1334_s20  ;;  %s1332_s18 = smov %s1338_s21 }
  0xfa   :  { %13 = sbr.rel (!%p11_p7) target bundleno = 3 (0x3), region = 79 }

// kernel: basic_layer_forward.8
= control target key start
LH: loop header
LB: loop body
LE: loop exit
PB: predicated region body
PF: predicated region fallthrough
CT: control target
= control target key end

     0   :  { %s1203_s15 = smov 0   ;;  %s1205_s16 = smov 0   ;;  %s1332_s0 = inlined_call_operand.vmem [shape: f32[6,2,36,16], index: 0, kind: input, shape index: {}]   ;;  %s1333_s1 = inlined_call_operand.vmem [shape: f32[6,5,16,16], index: 1, kind: input, shape index: {}]   ;;  %s1334_s2 = inlined_call_operand.vmem [shape: f32[6,1,16], index: 2, kind: input, shape index: {}]   ;;  %s1335_s3 = inlined_call_operand.vmem [shape: f32[6,1,16], index: 3, kind: input, shape index: {}]   ;;  %s1336_s4 = inlined_call_operand.vmem [shape: f32[6,2,32,16], index: 4, kind: output, shape index: {}]  }
   0x1   :  { %s1207_s17 = smov 0   ;;  %s1209_s18 = smov 0  }
   0x2   :  { %s1211_s19 = smov 0  }
   0x3 LB: > { %s23_s20 = sadd.s32 1, %s1168_s17  ;;  %s26_s21 = sadd.s32 1, %s1172_s18  ;;  %s1176_s19 = sphi %s1211_s19, %s14_s19   ;;  %s1172_s18 = sphi %s1209_s18, %s1340_s18   ;;  %s1168_s17 = sphi %s1207_s17, %s1339_s17   ;;  %s1164_s16 = sphi %s1205_s16, %s1338_s16   ;;  %s1160_s15 = sphi %s1203_s15, %s1337_s15  }
   0x4   : > { %p24_p0 = scmp.ge.s32.totalorder %s23_s20, 2  ;;  %p973_p1 = scmp.ge.s32.totalorder %s1176_s19, 1 }
   0x5   : > { %p208_p2 = scmp.lt.s32.totalorder %s1176_s19, 13 }
   0x6   : > { %s1342_s20 = smov (%p24_p0, %s23_s20), 0  ;;  %s1344_s21 = smov (!%p24_p0, %s26_s21), %s1172_s18 }
   0x7   : > { %p209_p3 = pnand %p973_p1, %p208_p2  ;;  %p28_p4 = scmp.ge.s32.totalorder %s1344_s21, 6 }
   0x8   : > { %p253_p5 = scmp.lt.s32.totalorder (!%p209_p3), %s1164_s16, 5  ;;  %p255_p6 = scmp.lt.s32.totalorder (!%p209_p3), %s1160_s15, 1 }
   0x9   : > { %s1346_s21 = smov (%p28_p4, %s1344_s21), 0  ;;  %212 = sbr.rel (%p209_p3) target bundleno = 249 (0xf9), region = 36 }
   0xe   : > { %s1348_s16 = smov (!%p253_p5, %s1164_s16), 5  ;;  %s1350_s15 = smov (!%p255_p6, %s1160_s15), 1  ;;  %vm295_vm0 = vcmask 130048  }
   0xf   : > { %s1096_s22 = smul.u32 10, %s1348_s16  ;;  %s976_s7 = sshll.u32 %s1350_s15, 2 }
  0x10   : > { %s1095_s23 = smul.u32 5, %s1350_s15  ;;  %s977_s8 = sshll.u32 %s1348_s16, 3 }
  0x11   : > { %s1097_s24 = smul.u32 80, %s1348_s16  ;;  %s269_s11 = scalar_lea.vmem %s1334_s2, %s1348_s16 }
  0x12   : > { %s259_s25 = sadd.s32 %s1096_s22, %s1095_s23  ;;  %s279_s12 = sadd.s32 %s977_s8, %s976_s7  ;;  %v1007_v55 = vld [vmem:[%s269_s11] ss:$0 sm:$0xff] }
  0x13   : > { %s974_s26 = sshll.u32 %s259_s25, 3  ;;  %s1243_s29 = scalar_lea.vmem %s1333_s1, %s1097_s24 }
  0x14   : > { %s1248_s6 = scalar_lea.vmem %s1332_s0, %s974_s26  ;;  %v980_v0 = vld [vmem:[%s1243_s29 + $0x18] sm:$0xff]  ;;  %v979_v1 = vld [vmem:[%s1243_s29 + $0x10] sm:$0xff]  ;;  %v287_v5 = vld [vmem:[%s1243_s29 + $0x8] sm:$0xff]  ;;  %s272_s22 = scalar_lea.vmem %s1335_s3, %s1348_s16 }
  0x15   : > { %1091 = vmatprep.subr.mxu1 %v980_v0  ;;  %1041 = vmatprep.subr.mxu0 %v980_v0  ;;  %v290_v2 = vld [vmem:[%s1248_s6 + $0x11] sm:$0xff]  ;;  %v288_v3 = vld [vmem:[%s1248_s6 + $0x1] sm:$0xff]  ;;  %v291_v4 = vld [vmem:[%s1248_s6 + $0x19] sm:$0xff]  ;;  %s978_s15 = sshll.u32 %s279_s12, 3 }
  0x16   : > { %1093 = vmatpush3.msra.mxu1 %v980_v0  ;;  %1042 = vmatpush3.msra.mxu0 %v980_v0  ;;  %v289_v6 = vld [vmem:[%s1248_s6 + $0x9] sm:$0xff]  ;;  %v286_v8 = vld [vmem:[%s1243_s29] sm:$0xff]  ;;  %v996_v13 = vld [vmem:[%s1243_s29 + $0x38] sm:$0xff]  ;;  %s281_s16 = scalar_lea.vmem %s1336_s4, %s978_s15 }
  0x17   : > { %1092 = vmatprep.subr.mxu1 %v979_v1  ;;  %1043 = vmatprep.subr.mxu0 %v979_v1  ;;  %v990_v7 = vld [vmem:[%s1243_s29 + $0x28] sm:$0xff]  ;;  %v282_v9 = vld [vmem:[%s1248_s6] sm:$0xff]  ;;  %v284_v16 = vld [vmem:[%s1248_s6 + $0x10] sm:$0xff] }
  0x18   : > { %1094 = vmatpush3.msra.mxu1 %v979_v1  ;;  %1048 = vmatprep.mubr.msk.f32.mxu1 %vm295_vm0, %v290_v2  ;;  %v989_v10 = vld [vmem:[%s1243_s29 + $0x20] sm:$0xff]  ;;  %v283_v11 = vld [vmem:[%s1248_s6 + $0x8] sm:$0xff]  ;;  %v285_v17 = vld [vmem:[%s1248_s6 + $0x18] sm:$0xff] }
  0x19   : > { %1044 = vmatpush3.msra.mxu0 %v979_v1  ;;  %1045 = vmatprep.mubr.msk.f32.mxu0 %vm295_vm0, %v288_v3  ;;  %v490_v12 = vld [vmem:[%s1248_s6 + $0x2] sm:$0xff]  ;;  %v491_v14 = vld [vmem:[%s1248_s6 + $0xa] sm:$0xff]  ;;  %v492_v18 = vld [vmem:[%s1248_s6 + $0x12] sm:$0xff] }
  0x1a   : > { %1049 = vmatmul.mubr.msk.f32.vlgmr.msra.gmra.mxu1 %vm295_vm0, %v291_v4  ;;  %1051 = vmatprep.subr.mxu1 %v287_v5  ;;  %v1002_v15 = vld [vmem:[%s1243_s29 + $0x48] sm:$0xff]  ;;  %v995_v19 = vld [vmem:[%s1243_s29 + $0x30] sm:$0xff]  ;;  %v493_v20 = vld [vmem:[%s1248_s6 + $0x1a] sm:$0xff] }
  0x1b   : > { %1046 = vmatmul.mubr.msk.f32.vlgmr.msra.gmra.mxu0 %vm295_vm0, %v289_v6  ;;  %1052 = vmatpush3.msra.mxu1 %v287_v5  ;;  %v1001_v21 = vld [vmem:[%s1243_s29 + $0x40] sm:$0xff]  ;;  %v599_v23 = vld [vmem:[%s1248_s6 + $0xb] sm:$0xff]  ;;  %v600_v25 = vld [vmem:[%s1248_s6 + $0x13] sm:$0xff] }
  0x1c   : > { %1061 = vmatprep.subr.mxu0 %v990_v7  ;;  %1053 = vmatprep.subr.mxu1 %v286_v8  ;;  %v598_v22 = vld [vmem:[%s1248_s6 + $0x3] sm:$0xff]  ;;  %v707_v26 = vld [vmem:[%s1248_s6 + $0xc] sm:$0xff]  ;;  %v708_v27 = vld [vmem:[%s1248_s6 + $0x14] sm:$0xff] }
  0x1d   : > { %1062 = vmatpush3.msra.mxu0 %v990_v7  ;;  %1054 = vmatpush3.msra.mxu1 %v286_v8  ;;  %v706_v24 = vld [vmem:[%s1248_s6 + $0x4] sm:$0xff]  ;;  %v601_v28 = vld [vmem:[%s1248_s6 + $0x1b] sm:$0xff] }
  0x1e   : > { %1055 = vmatprep.mubr.msk.f32.mxu1 %vm295_vm0, %v282_v9  ;;  %1063 = vmatprep.subr.mxu0 %v989_v10  ;;  %v709_v29 = vld [vmem:[%s1248_s6 + $0x1c] sm:$0xff] }
  0x1f   : > { %1056 = vmatmul.mubr.msk.f32.vlgmr.msra.gmra.mxu1 %vm295_vm0, %v283_v11  ;;  %1064 = vmatpush3.msra.mxu0 %v989_v10  ;;  %v1008_v62 = vld [vmem:[%s272_s22] ss:$0 sm:$0xff] }
  0x20   : > { %1065 = vmatprep.mubr.msk.f32.mxu0 %vm295_vm0, %v490_v12  ;;  %1071 = vmatprep.subr.mxu1 %v996_v13 }
  0x21   : > { %1066 = vmatmul.mubr.msk.f32.vlgmr.msra.gmra.mxu0 %vm295_vm0, %v491_v14  ;;  %1072 = vmatpush3.msra.mxu1 %v996_v13 }
  0x22   : > { %1081 = vmatprep.subr.mxu0 %v1002_v15  ;;  %1058 = vmatprep.mubr.msk.f32.mxu1 %vm295_vm0, %v284_v16 }
  0x23   : > { %1082 = vmatpush3.msra.mxu0 %v1002_v15  ;;  %1059 = vmatmul.mubr.msk.f32.gmra.mxu1 %vm295_vm0, %v285_v17 }
  0x24   : > { %1068 = vmatprep.mubr.msk.f32.mxu0 %vm295_vm0, %v492_v18  ;;  %1073 = vmatprep.subr.mxu1 %v995_v19 }
  0x25   : > { %1069 = vmatmul.mubr.msk.f32.gmra.mxu0 %vm295_vm0, %v493_v20  ;;  %1074 = vmatpush3.msra.mxu1 %v995_v19 }
  0x26   : > { %1083 = vmatprep.subr.mxu0 %v1001_v21  ;;  %1075 = vmatprep.mubr.msk.f32.mxu1 %vm295_vm0, %v598_v22 }
  0x27   : > { %1084 = vmatpush3.msra.mxu0 %v1001_v21  ;;  %1076 = vmatmul.mubr.msk.f32.vlgmr.msra.gmra.mxu1 %vm295_vm0, %v599_v23 }
  0x28   : > { %1085 = vmatprep.mubr.msk.f32.mxu0 %vm295_vm0, %v706_v24  ;;  %1078 = vmatprep.mubr.msk.f32.mxu1 %vm295_vm0, %v600_v25 }
  0x29   : > { %1086 = vmatmul.mubr.msk.f32.vlgmr.msra.gmra.mxu0 %vm295_vm0, %v707_v26 }
  0x2a   : > { %1088 = vmatprep.mubr.msk.f32.mxu0 %vm295_vm0, %v708_v27 }
  0x2b   : > { %1079 = vmatmul.mubr.msk.f32.gmra.mxu1 %vm295_vm0, %v601_v28 }
  0x2d   : > { %1089 = vmatmul.mubr.msk.f32.gmra.mxu0 %vm295_vm0, %v709_v29 }
  0xda   : > { %v1050_v30 = vpop.f32.mrf.mxu1 }
  0xdb   : > { %v1047_v31 = vpop.f32.mrf.mxu0 }
  0xdc   : > { %v384_v32 = vpop.f32.mrf.mxu1 }
  0xdd   : > { %v374_v33 = vpop.f32.mrf.mxu0 }
  0xdf   : > { %v1057_v34 = vpop.f32.mrf.mxu1 }
  0xe0   : > { %v477_v37 = vadd.f32 %v1057_v34, %v1047_v31 }
  0xe1   : > { %v1067_v35 = vpop.f32.mrf.mxu0  ;;  %v471_v36 = vpop.f32.mrf.mxu1 }
  0xe2   : > { %v472_v40 = vadd.f32 %v471_v36, %v374_v33  ;;  %v595_v43 = vadd.f32 %v1067_v35, %v477_v37 }
  0xe3   : > { %v575_v38 = vpop.f32.mrf.mxu0  ;;  %v1060_v39 = vpop.f32.mrf.mxu1 }
  0xe4   : > { %v487_v44 = vadd.f32 %v1060_v39, %v1050_v30  ;;  %v594_v47 = vadd.f32 %v575_v38, %v472_v40 }
  0xe5   : > { %v1070_v41 = vpop.f32.mrf.mxu0  ;;  %v481_v42 = vpop.f32.mrf.mxu1 }
  0xe6   : > { %v482_v48 = vadd.f32 %v481_v42, %v384_v32  ;;  %v597_v52 = vadd.f32 %v1070_v41, %v487_v44 }
  0xe7   : > { %v585_v45 = vpop.f32.mrf.mxu0  ;;  %v1077_v46 = vpop.f32.mrf.mxu1 }
  0xe8   : > { %v703_v49 = vadd.f32 %v1077_v46, %v595_v43  ;;  %v596_v58 = vadd.f32 %v585_v45, %v482_v48 }
  0xe9   : > { %v1087_v50 = vpop.f32.mrf.mxu0  ;;  %v683_v51 = vpop.f32.mrf.mxu1 }
  0xea   : > { %v811_v53 = vadd.f32 %v1087_v50, %v703_v49  ;;  %v702_v54 = vadd.f32 %v683_v51, %v594_v47 }
  0xeb   : > { %v791_v56 = vpop.f32.mrf.mxu0  ;;  %v1080_v57 = vpop.f32.mrf.mxu1 }
  0xec   : > { %v815_v59 = vmax.f32 %v811_v53, 0.0  ;;  %v810_v60 = vadd.f32 %v791_v56, %v702_v54  ;;  %v705_v61 = vadd.f32 %v1080_v57, %v597_v52 }
  0xed   : > { %v1090_v63 = vpop.f32.mrf.mxu0  ;;  %v693_v0 = vpop.f32.mrf.mxu1 }
  0xee   : > { %v826_v1 = vmul.f32 %v1007_v55, %v815_v59  ;;  %v814_v2 = vmax.f32 %v810_v60, 0.0  ;;  %v813_v3 = vadd.f32 %v1090_v63, %v705_v61  ;;  %v704_v4 = vadd.f32 %v693_v0, %v596_v58 }
  0xef   : > { %v801_v5 = vpop.f32.mrf.mxu0 }
  0xf0   : > { %v837_v6 = vadd.f32 %v1008_v62, %v826_v1  ;;  %v825_v7 = vmul.f32 %v1007_v55, %v814_v2  ;;  %v817_v8 = vmax.f32 %v813_v3, 0.0  ;;  %v812_v9 = vadd.f32 %v801_v5, %v704_v4 }
  0xf2   : > { %841 = vst.msk [vmem:[%s281_s16 + $0x8] sm:$0xff] %vm295_vm0, %v837_v6  ;;  %v836_v10 = vadd.f32 %v1008_v62, %v825_v7  ;;  %v828_v11 = vmul.f32 %v1007_v55, %v817_v8  ;;  %v816_v12 = vmax.f32 %v812_v9, 0.0 }
  0xf4   : > { %840 = vst.msk [vmem:[%s281_s16] sm:$0xff] %vm295_vm0, %v836_v10  ;;  %v839_v13 = vadd.f32 %v1008_v62, %v828_v11  ;;  %v827_v14 = vmul.f32 %v1007_v55, %v816_v12 }
  0xf6   : > { %843 = vst.msk [vmem:[%s281_s16 + $0x18] sm:$0xff] %vm295_vm0, %v839_v13  ;;  %v838_v15 = vadd.f32 %v1008_v62, %v827_v14 }
  0xf8   : > { %842 = vst.msk [vmem:[%s281_s16 + $0x10] sm:$0xff] %vm295_vm0, %v838_v15 }
  0xf9 PF: > { %s14_s19 = sadd.s32 1, %s1176_s19   ;;  %s1337_s15 = smov %s1168_s17 }
  0xfa   : > { %p11_p7 = scmp.ge.s32.totalorder %s14_s19, 14   ;;  %s1338_s16 = smov %s1172_s18 }
  0xfb   : > { %s1339_s17 = smov %s1342_s20  ;;  %s1340_s18 = smov %s1346_s21 }
  0xfc   :  { %13 = sbr.rel (!%p11_p7) target bundleno = 3 (0x3), region = 79 }

// kernel: basic_layer_forward.10
= control target key start
LH: loop header
LB: loop body
LE: loop exit
PB: predicated region body
PF: predicated region fallthrough
CT: control target
= control target key end

     0   :  { %s642_s12 = smov 0   ;;  %s644_s13 = smov 0   ;;  %s706_s0 = inlined_call_operand.vmem [shape: f32[3,64,32], index: 0, kind: input, shape index: {}]   ;;  %s707_s1 = inlined_call_operand.vmem [shape: f32[3,32,32], index: 1, kind: input, shape index: {}]   ;;  %s708_s2 = inlined_call_operand.vmem [shape: f32[3,1,32], index: 2, kind: input, shape index: {}]   ;;  %s709_s3 = inlined_call_operand.vmem [shape: f32[3,64,32], index: 3, kind: output, shape index: {}]  }
   0x1   :  { %s646_s14 = smov 0  }
   0x2 LB: > { %s25_s15 = sadd.s32 1, %s616_s13  ;;  %p513_p0 = scmp.ge.s32.totalorder %s620_s14, 1  ;;  %s620_s14 = sphi %s646_s14, %s13_s14   ;;  %s616_s13 = sphi %s644_s13, %s711_s13   ;;  %s612_s12 = sphi %s642_s12, %s710_s12  }
   0x3   : > { %p27_p1 = scmp.ge.s32.totalorder %s25_s15, 3  ;;  %p176_p2 = scmp.lt.s32.totalorder %s620_s14, 4 }
   0x5   : > { %s713_s15 = smov (%p27_p1, %s25_s15), 0  ;;  %p177_p3 = pnand %p513_p0, %p176_p2 }
   0x6   : > { %p217_p4 = scmp.lt.s32.totalorder (!%p177_p3), %s612_s12, 2 }
   0x7   : > { %180 = sbr.rel (%p177_p3) target bundleno = 227 (0xe3), region = 32 }
   0xc   : > { %s715_s12 = smov (!%p217_p4, %s612_s12), 2  ;;  %vm263_vm0 = vcmask 261120  }
   0xd   : > { %s532_s16 = sshll.u32 %s715_s12, 5  ;;  %s531_s20 = sshll.u32 %s715_s12, 6 }
   0xe   : > { %s230_s19 = scalar_lea.vmem %s707_s1, %s532_s16  ;;  %s224_s23 = scalar_lea.vmem %s706_s0, %s531_s20 }
   0xf   : > { %v255_v0 = vld [vmem:[%s230_s19 + $0x18] sm:$0xff]  ;;  %v254_v1 = vld [vmem:[%s230_s19 + $0x10] sm:$0xff]  ;;  %v253_v2 = vld [vmem:[%s230_s19 + $0x8] sm:$0xff]  ;;  %s233_s26 = scalar_lea.vmem %s708_s2, %s715_s12  ;;  %s242_s29 = scalar_lea.vmem %s709_s3, %s531_s20 }
  0x10   : > { %546 = vmatprep.subr.mxu0 %v255_v0  ;;  %566 = vmatprep.subr.mxu1 %v255_v0  ;;  %v252_v3 = vld [vmem:[%s230_s19] sm:$0xff]  ;;  %v245_v6 = vld [vmem:[%s224_s23 + $0x8] sm:$0xff]  ;;  %v246_v8 = vld [vmem:[%s224_s23 + $0x10] sm:$0xff] }
  0x11   : > { %547 = vmatpush3.msra.mxu0 %v255_v0  ;;  %570 = vmatpush3.msra.mxu1 %v255_v0  ;;  %v244_v4 = vld [vmem:[%s224_s23] sm:$0xff]  ;;  %v249_v7 = vld [vmem:[%s224_s23 + $0x28] sm:$0xff]  ;;  %v250_v9 = vld [vmem:[%s224_s23 + $0x30] sm:$0xff] }
  0x12   : > { %548 = vmatprep.subr.mxu0 %v254_v1  ;;  %567 = vmatprep.subr.mxu1 %v254_v1  ;;  %v248_v5 = vld [vmem:[%s224_s23 + $0x20] sm:$0xff]  ;;  %v247_v10 = vld [vmem:[%s224_s23 + $0x18] sm:$0xff] }
  0x13   : > { %549 = vmatpush3.msra.mxu0 %v254_v1  ;;  %571 = vmatpush3.msra.mxu1 %v254_v1  ;;  %v251_v11 = vld [vmem:[%s224_s23 + $0x38] sm:$0xff]  ;;  %v520_v12 = vld [vmem:[%s233_s26] ss:$0 sm:$0xff] }
  0x14   : > { %550 = vmatprep.subr.mxu0 %v253_v2  ;;  %568 = vmatprep.subr.mxu1 %v253_v2 }
  0x15   : > { %551 = vmatpush3.msra.mxu0 %v253_v2  ;;  %572 = vmatpush3.msra.mxu1 %v253_v2 }
  0x16   : > { %552 = vmatprep.subr.mxu0 %v252_v3  ;;  %569 = vmatprep.subr.mxu1 %v252_v3 }
  0x17   : > { %553 = vmatpush3.msra.mxu0 %v252_v3  ;;  %573 = vmatpush3.msra.mxu1 %v252_v3 }
  0x18   : > { %554 = vmatprep.mubr.msk.f32.mxu0 %vm263_vm0, %v244_v4  ;;  %560 = vmatprep.mubr.msk.f32.mxu1 %vm263_vm0, %v248_v5 }
  0x19   : > { %555 = vmatmul.mubr.msk.f32.vlgmr.msra.gmra.mxu0 %vm263_vm0, %v245_v6  ;;  %561 = vmatmul.mubr.msk.f32.vlgmr.msra.gmra.mxu1 %vm263_vm0, %v249_v7 }
  0x1a   : > { %557 = vmatprep.mubr.msk.f32.mxu0 %vm263_vm0, %v246_v8  ;;  %563 = vmatprep.mubr.msk.f32.mxu1 %vm263_vm0, %v250_v9 }
  0x1d   : > { %558 = vmatmul.mubr.msk.f32.gmra.mxu0 %vm263_vm0, %v247_v10  ;;  %564 = vmatmul.mubr.msk.f32.gmra.mxu1 %vm263_vm0, %v251_v11 }
  0xd9   : > { %v556_v13 = vpop.f32.mrf.mxu0  ;;  %v562_v14 = vpop.f32.mrf.mxu1 }
  0xda   : > { %v360_v15 = vadd.f32 %v556_v13, %v520_v12  ;;  %v380_v16 = vadd.f32 %v562_v14, %v520_v12 }
  0xdb   : > { %v354_v17 = vpop.f32.mrf.mxu0  ;;  %v374_v18 = vpop.f32.mrf.mxu1 }
  0xdc   : > { %394 = vst.msk [vmem:[%s242_s29 + $0x8] sm:$0xff] %vm263_vm0, %v360_v15  ;;  %398 = vst.msk [vmem:[%s242_s29 + $0x28] sm:$0xff] %vm263_vm0, %v380_v16  ;;  %v355_v19 = vadd.f32 %v520_v12, %v354_v17  ;;  %v375_v20 = vadd.f32 %v520_v12, %v374_v18 }
  0xdd   : > { %v559_v21 = vpop.f32.mrf.mxu0  ;;  %v565_v22 = vpop.f32.mrf.mxu1 }
  0xde   : > { %393 = vst.msk [vmem:[%s242_s29] sm:$0xff] %vm263_vm0, %v355_v19  ;;  %397 = vst.msk [vmem:[%s242_s29 + $0x20] sm:$0xff] %vm263_vm0, %v375_v20  ;;  %v370_v23 = vadd.f32 %v559_v21, %v520_v12  ;;  %v390_v24 = vadd.f32 %v565_v22, %v520_v12 }
  0xdf   : > { %v364_v25 = vpop.f32.mrf.mxu0  ;;  %v384_v26 = vpop.f32.mrf.mxu1 }
  0xe0   : > { %396 = vst.msk [vmem:[%s242_s29 + $0x18] sm:$0xff] %vm263_vm0, %v370_v23  ;;  %400 = vst.msk [vmem:[%s242_s29 + $0x38] sm:$0xff] %vm263_vm0, %v390_v24  ;;  %v365_v27 = vadd.f32 %v520_v12, %v364_v25  ;;  %v385_v28 = vadd.f32 %v520_v12, %v384_v26 }
  0xe2   : > { %395 = vst.msk [vmem:[%s242_s29 + $0x10] sm:$0xff] %vm263_vm0, %v365_v27  ;;  %399 = vst.msk [vmem:[%s242_s29 + $0x30] sm:$0xff] %vm263_vm0, %v385_v28 }
  0xe3 PF: > { %s13_s14 = sadd.s32 1, %s620_s14   ;;  %s710_s12 = smov %s616_s13 }
  0xe4   : > { %p10_p5 = scmp.ge.s32.totalorder %s13_s14, 5   ;;  %s711_s13 = smov %s713_s15 }
  0xe6   :  { %12 = sbr.rel (!%p10_p5) target bundleno = 2 (0x2), region = 68 }

// kernel: basic_layer_forward.11
= control target key start
LH: loop header
LB: loop body
LE: loop exit
PB: predicated region body
PF: predicated region fallthrough
CT: control target
= control target key end

     0   :  { %vm38_vm0 = vcmask 130048   ;;  %v912_v0 = vmov 0.0   ;;  %vm913_vm1 = vmmov 0   ;;  %vm379_vm2 = vcmask 257024   ;;  %s1138_s1 = inlined_call_operand.vmem [shape: f32[4,32,16], index: 1, kind: input, shape index: {}]   ;;  %s1139_s0 = inlined_call_operand.vmem [shape: f32[4,4,16], index: 0, kind: input, shape index: {}]   ;;  %s1140_s2 = inlined_call_operand.vmem [shape: f32[4,32,16], index: 2, kind: input, shape index: {}]   ;;  %s1141_s3 = inlined_call_operand.vmem [shape: f32[4,4,16], index: 3, kind: output, shape index: {}]  }
   0x1   :  { %806 = vmatprep.subr.mxu0 %v912_v0  ;;  %v25_v1 = vld [vmem:[%s1138_s1 + $0x18] sm:$0xff]  ;;  %817 = vmatprep.subr.mxu1 %v912_v0  ;;  %v24_v3 = vld [vmem:[%s1138_s1 + $0x10] sm:$0xff]  ;;  %v23_v5 = vld [vmem:[%s1138_s1 + $0x8] sm:$0xff]  ;;  %vm432_vm3 = vcmask 261120   ;;  %vm733_vm4 = vcmask 125952  }
   0x2   :  { %v29_v2 = vld [vmem:[%s1138_s1 + $0x38] sm:$0xff]  ;;  %807 = vmatpush3.xpose.msk.msra.mxu0 %vm38_vm0, %v25_v1  ;;  %v28_v4 = vld [vmem:[%s1138_s1 + $0x30] sm:$0xff]  ;;  %814 = vmatprep.mubr.msk.f32.mxu0 %vm913_vm1, %v912_v0  ;;  %v27_v6 = vld [vmem:[%s1138_s1 + $0x28] sm:$0xff] }
   0x3   :  { %818 = vmatpush3.xpose.msk.msra.mxu1 %vm38_vm0, %v29_v2  ;;  %808 = vmatprep.subr.mxu0 %v912_v0  ;;  %v14_v7 = vld [vmem:[%s1139_s0] sm:$0xf]  ;;  %v15_v8 = vld [vmem:[%s1139_s0 + $0x4] sm:$0xf]  ;;  %v33_v13 = vld [vmem:[%s1138_s1 + $0x58] sm:$0xff] }
   0x4   :  { %819 = vmatprep.subr.mxu1 %v912_v0  ;;  %825 = vmatprep.mubr.msk.f32.mxu1 %vm913_vm1, %v912_v0  ;;  %v22_v9 = vld [vmem:[%s1138_s1] sm:$0xff]  ;;  %v18_v11 = vmul.f32 0.25, %v14_v7  ;;  %v19_v12 = vmul.f32 0.25, %v15_v8  ;;  %v37_v14 = vld [vmem:[%s1138_s1 + $0x78] sm:$0xff]  ;;  %v32_v15 = vld [vmem:[%s1138_s1 + $0x50] sm:$0xff] }
   0x5   :  { %v26_v10 = vld [vmem:[%s1138_s1 + $0x20] sm:$0xff]  ;;  %v36_v16 = vld [vmem:[%s1138_s1 + $0x70] sm:$0xff]  ;;  %v31_v17 = vld [vmem:[%s1138_s1 + $0x48] sm:$0xff] }
   0x6   :  { %809 = vmatpush3.xpose.msk.msra.mxu0 %vm38_vm0, %v24_v3  ;;  %v35_v18 = vld [vmem:[%s1138_s1 + $0x68] sm:$0xff]  ;;  %v30_v21 = vld [vmem:[%s1138_s1 + $0x40] sm:$0xff]  ;;  %v419_v37 = vld [vmem:[%s1140_s2 + $0x18] sm:$0xff] }
   0x7   :  { %820 = vmatpush3.xpose.msk.msra.mxu1 %vm38_vm0, %v28_v4  ;;  %810 = vmatprep.subr.mxu0 %v912_v0  ;;  %v16_v19 = vld [vmem:[%s1139_s0 + $0x8] sm:$0xf]  ;;  %v17_v20 = vld [vmem:[%s1139_s0 + $0xc] sm:$0xf]  ;;  %v34_v22 = vld [vmem:[%s1138_s1 + $0x60] sm:$0xff] }
   0x8   :  { %821 = vmatprep.subr.mxu1 %v912_v0  ;;  %v20_v23 = vmul.f32 0.25, %v16_v19  ;;  %v21_v24 = vmul.f32 0.25, %v17_v20  ;;  %v418_v38 = vld [vmem:[%s1140_s2 + $0x10] sm:$0xff]  ;;  %v423_v39 = vld [vmem:[%s1140_s2 + $0x38] sm:$0xff]  ;;  %v417_v40 = vld [vmem:[%s1140_s2 + $0x8] sm:$0xff] }
   0x9   :  { %v416_v41 = vld [vmem:[%s1140_s2] sm:$0xff]  ;;  %v422_v42 = vld [vmem:[%s1140_s2 + $0x30] sm:$0xff]  ;;  %v421_v43 = vld [vmem:[%s1140_s2 + $0x28] sm:$0xff] }
   0xa   :  { %811 = vmatpush3.xpose.msk.msra.mxu0 %vm38_vm0, %v23_v5  ;;  %v420_v44 = vld [vmem:[%s1140_s2 + $0x20] sm:$0xff]  ;;  %v427_v53 = vld [vmem:[%s1140_s2 + $0x58] sm:$0xff]  ;;  %v426_v57 = vld [vmem:[%s1140_s2 + $0x50] sm:$0xff] }
   0xb   :  { %822 = vmatpush3.xpose.msk.msra.mxu1 %vm38_vm0, %v27_v6  ;;  %812 = vmatprep.subr.mxu0 %v912_v0  ;;  %v425_v60 = vld [vmem:[%s1140_s2 + $0x48] sm:$0xff]  ;;  %v431_v62 = vld [vmem:[%s1140_s2 + $0x78] sm:$0xff]  ;;  %v424_v2 = vld [vmem:[%s1140_s2 + $0x40] sm:$0xff] }
   0xc   :  { %823 = vmatprep.subr.mxu1 %v912_v0  ;;  %v430_v3 = vld [vmem:[%s1140_s2 + $0x70] sm:$0xff]  ;;  %v429_v4 = vld [vmem:[%s1140_s2 + $0x68] sm:$0xff]  ;;  %v428_v5 = vld [vmem:[%s1140_s2 + $0x60] sm:$0xff] }
   0xe   :  { %813 = vmatpush3.xpose.msk.msra.mxu0 %vm38_vm0, %v22_v9 }
   0xf   :  { %824 = vmatpush3.xpose.msk.msra.mxu1 %vm38_vm0, %v26_v10  ;;  %828 = vmatprep.subr.mxu0 %v912_v0 }
  0x10   :  { %839 = vmatprep.subr.mxu1 %v912_v0 }
  0x11   :  { %815 = vmatmul.mubr.msk.f32.vlgmr.msra.gmra.mxu0 %vm38_vm0, %v18_v11 }
  0x12   :  { %826 = vmatmul.mubr.msk.f32.vlgmr.msra.gmra.mxu1 %vm38_vm0, %v19_v12  ;;  %829 = vmatpush3.xpose.msk.msra.mxu0 %vm38_vm0, %v33_v13 }
  0x13   :  { %840 = vmatpush3.xpose.msk.msra.mxu1 %vm38_vm0, %v37_v14  ;;  %830 = vmatprep.subr.mxu0 %v912_v0 }
  0x14   :  { %841 = vmatprep.subr.mxu1 %v912_v0  ;;  %836 = vmatprep.mubr.msk.f32.mxu0 %vm913_vm1, %v912_v0 }
  0x15   :  { %847 = vmatprep.mubr.msk.f32.mxu1 %vm913_vm1, %v912_v0 }
  0x16   :  { %831 = vmatpush3.xpose.msk.msra.mxu0 %vm38_vm0, %v32_v15 }
  0x17   :  { %842 = vmatpush3.xpose.msk.msra.mxu1 %vm38_vm0, %v36_v16  ;;  %832 = vmatprep.subr.mxu0 %v912_v0 }
  0x18   :  { %843 = vmatprep.subr.mxu1 %v912_v0 }
  0x1a   :  { %833 = vmatpush3.xpose.msk.msra.mxu0 %vm38_vm0, %v31_v17 }
  0x1b   :  { %844 = vmatpush3.xpose.msk.msra.mxu1 %vm38_vm0, %v35_v18  ;;  %834 = vmatprep.subr.mxu0 %v912_v0 }
  0x1c   :  { %845 = vmatprep.subr.mxu1 %v912_v0 }
  0x1e   :  { %835 = vmatpush3.xpose.msk.msra.mxu0 %vm38_vm0, %v30_v21 }
  0x1f   :  { %846 = vmatpush3.xpose.msk.msra.mxu1 %vm38_vm0, %v34_v22  ;;  %850 = vmatprep.subr.mxu0 %v912_v0 }
  0x20   :  { %861 = vmatprep.subr.mxu1 %v912_v0 }
  0x21   :  { %837 = vmatmul.mubr.msk.f32.vlgmr.msra.gmra.mxu0 %vm38_vm0, %v20_v23 }
  0x22   :  { %848 = vmatmul.mubr.msk.f32.vlgmr.msra.gmra.mxu1 %vm38_vm0, %v21_v24  ;;  %858 = vmatprep.mubr.msk.f32.mxu0 %vm913_vm1, %v912_v0 }
  0x23   :  { %869 = vmatprep.mubr.msk.f32.mxu1 %vm913_vm1, %v912_v0  ;;  %851 = vmatpush3.msra.mxu0 %v419_v37 }
  0x24   :  { %852 = vmatprep.subr.mxu0 %v912_v0  ;;  %862 = vmatpush3.msra.mxu1 %v423_v39 }
  0x25   :  { %853 = vmatpush3.msra.mxu0 %v418_v38  ;;  %863 = vmatprep.subr.mxu1 %v912_v0 }
  0x26   :  { %854 = vmatprep.subr.mxu0 %v912_v0  ;;  %864 = vmatpush3.msra.mxu1 %v422_v42 }
  0x27   :  { %855 = vmatpush3.msra.mxu0 %v417_v40  ;;  %865 = vmatprep.subr.mxu1 %v912_v0 }
  0x28   :  { %856 = vmatprep.subr.mxu0 %v912_v0  ;;  %866 = vmatpush3.msra.mxu1 %v421_v43 }
  0x29   :  { %857 = vmatpush3.msra.mxu0 %v416_v41  ;;  %867 = vmatprep.subr.mxu1 %v912_v0 }
  0x2a   :  { %872 = vmatprep.subr.mxu0 %v912_v0  ;;  %868 = vmatpush3.msra.mxu1 %v420_v44 }
  0x2b   :  { %883 = vmatprep.subr.mxu1 %v912_v0 }
  0xd1   :  { %v120_v25 = vpop.f32.mrf.mxu0 }
  0xd2   :  { %v205_v26 = vpop.f32.mrf.mxu1  ;;  %v380_v27 = vsel %vm379_vm2, %v120_v25, -inf }
  0xd3   :  { %381 = vmax.xlane.f32.xlu0 %v380_v27  ;;  %v816_v28 = vpop.f32.mrf.mxu0  ;;  %v383_v30 = vsel %vm379_vm2, %v205_v26, -inf }
  0xd4   :  { %v827_v29 = vpop.f32.mrf.mxu1 }
  0xd7   :  { %384 = vmax.xlane.f32.xlu0 %v383_v30 }
  0xe1   :  { %v290_v31 = vpop.f32.mrf.mxu0 }
  0xe2   :  { %v375_v32 = vpop.f32.mrf.mxu1  ;;  %v386_v33 = vsel %vm379_vm2, %v290_v31, -inf }
  0xe3   :  { %387 = vmax.xlane.f32.xlu1 %v386_v33  ;;  %v838_v34 = vpop.f32.mrf.mxu0  ;;  %v389_v36 = vsel %vm379_vm2, %v375_v32, -inf }
  0xe4   :  { %v849_v35 = vpop.f32.mrf.mxu1 }
  0xe7   :  { %390 = vmax.xlane.f32.xlu1 %v389_v36 }
 0x15c   :  { %v382_v45 = vpop.xlane.xlu0 %381 }
 0x15d   :  { %v392_v46 = vsub.f32 %v120_v25, %v382_v45 }
 0x15f   :  { %v396_v47 = vmul.f32 1.442695, %v392_v46 }
 0x160   :  { %v385_v48 = vpop.xlane.xlu0 %384 }
 0x161   :  { %896 = vpow2.f32 %v396_v47  ;;  %v393_v49 = vsub.f32 %v205_v26, %v385_v48 }
 0x163   :  { %v398_v50 = vmul.f32 1.442695, %v393_v49 }
 0x165   :  { %898 = vpow2.f32 %v398_v50 }
 0x16c   :  { %v388_v51 = vpop.xlane.xlu1 %387 }
 0x16d   :  { %v394_v52 = vsub.f32 %v290_v31, %v388_v51 }
 0x16e   :  { %v897_v54 = vpop.eup %896 }
 0x16f   :  { %v400_v55 = vmul.f32 1.442695, %v394_v52  ;;  %859 = vmatmul.mubr.msk.f32.vlgmr.msra.gmra.mxu0 %vm432_vm3, %v897_v54  ;;  %v404_v56 = vsel %vm379_vm2, %v897_v54, 0.0 }
 0x170   :  { %405 = vadd.xlane.f32.xlu0 %v404_v56  ;;  %v391_v58 = vpop.xlane.xlu1 %390  ;;  %873 = vmatpush3.msra.mxu0 %v427_v53 }
 0x171   :  { %900 = vpow2.f32 %v400_v55  ;;  %v395_v59 = vsub.f32 %v375_v32, %v391_v58  ;;  %874 = vmatprep.subr.mxu0 %v912_v0  ;;  %880 = vmatprep.mubr.msk.f32.mxu0 %vm913_vm1, %v912_v0 }
 0x172   :  { %v899_v61 = vpop.eup %898  ;;  %875 = vmatpush3.msra.mxu0 %v426_v57 }
 0x173   :  { %v402_v63 = vmul.f32 1.442695, %v395_v59  ;;  %870 = vmatmul.mubr.msk.f32.vlgmr.msra.gmra.mxu1 %vm432_vm3, %v899_v61  ;;  %v407_v1 = vsel %vm379_vm2, %v899_v61, 0.0  ;;  %876 = vmatprep.subr.mxu0 %v912_v0 }
 0x174   :  { %408 = vadd.xlane.f32.xlu1 %v407_v1  ;;  %877 = vmatpush3.msra.mxu0 %v425_v60 }
 0x175   :  { %902 = vpow2.f32 %v402_v63  ;;  %884 = vmatpush3.msra.mxu1 %v431_v62  ;;  %878 = vmatprep.subr.mxu0 %v912_v0 }
 0x176   :  { %885 = vmatprep.subr.mxu1 %v912_v0  ;;  %879 = vmatpush3.msra.mxu0 %v424_v2 }
 0x177   :  { %886 = vmatpush3.msra.mxu1 %v430_v3  ;;  %891 = vmatprep.mubr.msk.f32.mxu1 %vm913_vm1, %v912_v0 }
 0x178   :  { %887 = vmatprep.subr.mxu1 %v912_v0 }
 0x179   :  { %888 = vmatpush3.msra.mxu1 %v429_v4 }
 0x17a   :  { %889 = vmatprep.subr.mxu1 %v912_v0 }
 0x17b   :  { %890 = vmatpush3.msra.mxu1 %v428_v5 }
 0x17e   :  { %v901_v6 = vpop.eup %900 }
 0x17f   :  { %881 = vmatmul.mubr.msk.f32.vlgmr.msra.gmra.mxu0 %vm432_vm3, %v901_v6  ;;  %v410_v7 = vsel %vm379_vm2, %v901_v6, 0.0 }
 0x180   :  { %411 = vadd.xlane.f32.xlu0 %v410_v7 }
 0x182   :  { %v903_v8 = vpop.eup %902 }
 0x183   :  { %892 = vmatmul.mubr.msk.f32.vlgmr.msra.gmra.mxu1 %vm432_vm3, %v903_v8  ;;  %v413_v9 = vsel %vm379_vm2, %v903_v8, 0.0 }
 0x184   :  { %414 = vadd.xlane.f32.xlu1 %v413_v9 }
 0x1f9   :  { %v406_v10 = vpop.xlane.xlu0 %405 }
 0x1fa   :  { %904 = vrcp.f32 %v406_v10 }
 0x1fd   :  { %v409_v11 = vpop.xlane.xlu1 %408 }
 0x1fe   :  { %906 = vrcp.f32 %v409_v11 }
 0x207   :  { %v905_v12 = vpop.eup %904 }
 0x209   :  { %v412_v13 = vpop.xlane.xlu0 %411 }
 0x20a   :  { %908 = vrcp.f32 %v412_v13 }
 0x20b   :  { %v907_v16 = vpop.eup %906 }
 0x20d   :  { %v415_v17 = vpop.xlane.xlu1 %414 }
 0x20e   :  { %910 = vrcp.f32 %v415_v17 }
 0x217   :  { %v909_v21 = vpop.eup %908 }
 0x21b   :  { %v911_v25 = vpop.eup %910 }
 0x22f   :  { %v502_v0 = vpop.f32.mrf.mxu0 }
 0x230   :  { %v729_v14 = vmul.f32 %v905_v12, %v502_v0 }
 0x231   :  { %v860_v15 = vpop.f32.mrf.mxu0 }
 0x232   :  { %734 = vst.msk [vmem:[%s1141_s3] sm:$0xf] %vm733_vm4, %v729_v14 }
 0x233   :  { %v575_v18 = vpop.f32.mrf.mxu1 }
 0x234   :  { %v730_v19 = vmul.f32 %v907_v16, %v575_v18 }
 0x235   :  { %v871_v20 = vpop.f32.mrf.mxu1 }
 0x236   :  { %735 = vst.msk [vmem:[%s1141_s3 + $0x4] sm:$0xf] %vm733_vm4, %v730_v19 }
 0x23f   :  { %v648_v22 = vpop.f32.mrf.mxu0 }
 0x240   :  { %v731_v23 = vmul.f32 %v909_v21, %v648_v22 }
 0x241   :  { %v882_v24 = vpop.f32.mrf.mxu0 }
 0x242   :  { %736 = vst.msk [vmem:[%s1141_s3 + $0x8] sm:$0xf] %vm733_vm4, %v731_v23 }
 0x243   :  { %v721_v26 = vpop.f32.mrf.mxu1 }
 0x244   :  { %v732_v27 = vmul.f32 %v911_v25, %v721_v26 }
 0x245   :  { %v893_v28 = vpop.f32.mrf.mxu1 }
 0x246   :  { %737 = vst.msk [vmem:[%s1141_s3 + $0xc] sm:$0xf] %vm733_vm4, %v732_v27 }

// kernel: basic_layer_forward.9
= control target key start
LH: loop header
LB: loop body
LE: loop exit
PB: predicated region body
PF: predicated region fallthrough
CT: control target
= control target key end

     0   :  { %vm87_vm0 = vcmask 130048   ;;  %v488_v40 = vlaneseq  ;;  %vm941_vm1 = vcmask 31744   ;;  %s3478_s3 = inlined_call_operand.vmem [shape: f32[4,4,16], index: 3, kind: input, shape index: {}]   ;;  %s3479_s0 = inlined_call_operand.vmem [shape: f32[4,32,16], index: 0, kind: input, shape index: {}]   ;;  %s3480_s1 = inlined_call_operand.vmem [shape: f32[4,40,16], index: 1, kind: input, shape index: {}]   ;;  %s3481_s2 = inlined_call_operand.vmem [shape: f32[4,40,16], index: 2, kind: input, shape index: {}]   ;;  %s3482_s4 = inlined_call_operand.vmem [shape: f32[4,4,16], index: 4, kind: input, shape index: {}]   ;;  %s3483_s5 = inlined_call_operand.vmem [shape: f32[4,32,16], index: 5, kind: output, shape index: {}]  }
   0x1   :  { %v79_v0 = vld [vmem:[%s3478_s3] sm:$0xf]  ;;  %v80_v1 = vld [vmem:[%s3478_s3 + $0x4] sm:$0xf]  ;;  %v2647_v4 = vld [vmem:[%s3479_s0 + $0x8] sm:$0xff] }
   0x2   :  { %v21_v2 = vld [vmem:[%s3479_s0] sm:$0xff]  ;;  %2310 = vmatprep.subr.msk.mxu0 %vm87_vm0, %v79_v0  ;;  %2318 = vmatprep.subr.msk.mxu1 %vm87_vm0, %v80_v1  ;;  %v2654_v5 = vld [vmem:[%s3479_s0 + $0x28] sm:$0xff]  ;;  %v2669_v8 = vld [vmem:[%s3479_s0 + $0x10] sm:$0xff]  ;;  %v2886_v41 = vand.u32 127, %v488_v40  ;;  %v489_v52 = vshrl.u32 %v488_v40, 7 }
   0x3   :  { %v25_v3 = vld [vmem:[%s3479_s0 + $0x20] sm:$0xff]  ;;  %2311 = vmatpush3.xpose.msk.msra.mxu0 %vm87_vm0, %v79_v0  ;;  %2319 = vmatpush3.xpose.msk.msra.mxu1 %vm87_vm0, %v80_v1  ;;  %v81_v6 = vld [vmem:[%s3478_s3 + $0x8] sm:$0xf]  ;;  %v82_v7 = vld [vmem:[%s3478_s3 + $0xc] sm:$0xf] }
   0x4   :  { %2312 = vmatprep.mubr.msk.f32.mxu0 %vm87_vm0, %v21_v2  ;;  %2320 = vmatprep.mubr.msk.f32.mxu1 %vm87_vm0, %v25_v3  ;;  %v2674_v9 = vld [vmem:[%s3479_s0 + $0x30] sm:$0xff]  ;;  %v42_v10 = vld [vmem:[%s3480_s1 + $0x20] sm:$0xff]  ;;  %v47_v11 = vld [vmem:[%s3480_s1 + $0x48] sm:$0xff]  ;;  %v2889_v42 = vadd.s32 4294967292, %v2886_v41  ;;  %v490_v59 = vadd.s32 8, %v489_v52  ;;  %vm498_vm8 = vcmp.ge.s32.totalorder %v2886_v41, %v489_v52 }
   0x5   :  { %2326 = vmatprep.subr.msk.mxu0 %vm87_vm0, %v81_v6  ;;  %2334 = vmatprep.subr.msk.mxu1 %vm87_vm0, %v82_v7  ;;  %v2691_v12 = vld [vmem:[%s3479_s0 + $0x18] sm:$0xff]  ;;  %v2705_v14 = vld [vmem:[%s3479_s0 + $0x40] sm:$0xff]  ;;  %v2725_v16 = vld [vmem:[%s3479_s0 + $0x48] sm:$0xff] }
   0x6   :  { %2313 = vmatmul.mubr.msk.f32.vlgmr.msra.gmra.mxu0 %vm87_vm0, %v2647_v4  ;;  %2321 = vmatmul.mubr.msk.f32.vlgmr.msra.gmra.mxu1 %vm87_vm0, %v2654_v5  ;;  %v2696_v13 = vld [vmem:[%s3479_s0 + $0x38] sm:$0xff]  ;;  %v2710_v15 = vld [vmem:[%s3479_s0 + $0x60] sm:$0xff]  ;;  %v2730_v17 = vld [vmem:[%s3479_s0 + $0x68] sm:$0xff]  ;;  %v524_v43 = vsub.s32 0, %v2889_v42  ;;  %vm523_vm2 = vcmp.lt.s32.totalorder %v2889_v42, 0  ;;  %v502_v1 = vadd.s32 8, %v490_v59  ;;  %vm499_vm5 = vcmp.ge.s32.totalorder %v2886_v41, %v490_v59 }
   0x7   :  { %2327 = vmatpush3.xpose.msk.msra.mxu0 %vm87_vm0, %v81_v6  ;;  %2335 = vmatpush3.xpose.msk.msra.mxu1 %vm87_vm0, %v82_v7  ;;  %v41_v18 = vld [vmem:[%s3480_s1 + $0x18] sm:$0xff]  ;;  %v46_v19 = vld [vmem:[%s3480_s1 + $0x40] sm:$0xff]  ;;  %v2745_v20 = vld [vmem:[%s3479_s0 + $0x70] sm:$0xff]  ;;  %vm505_vm9 = vcmp.le.s32.totalorder %v2886_v41, %v490_v59  ;;  %vm513_vm11 = vcmp.ge.s32.totalorder %v2889_v42, 0 }
   0x8   :  { %2315 = vmatprep.mubr.msk.f32.mxu0 %vm87_vm0, %v2669_v8  ;;  %2323 = vmatprep.mubr.msk.f32.mxu1 %vm87_vm0, %v2674_v9  ;;  %v2750_v21 = vld [vmem:[%s3479_s0 + $0x50] sm:$0xff]  ;;  %v2757_v22 = vld [vmem:[%s3479_s0 + $0x78] sm:$0xff]  ;;  %v39_v26 = vld [vmem:[%s3480_s1 + $0x8] sm:$0xff]  ;;  %v2125_v44 = vmin.u32 %v2889_v42, %v524_v43  ;;  %vm506_vm6 = vcmp.le.s32.totalorder %v2886_v41, %v502_v1 }
   0x9   :  { %2342 = vmatprep.subr.msk.mxu0 %vm87_vm0, %v42_v10  ;;  %2358 = vmatprep.subr.msk.mxu1 %vm87_vm0, %v47_v11  ;;  %v2762_v23 = vld [vmem:[%s3479_s0 + $0x58] sm:$0xff]  ;;  %v40_v24 = vld [vmem:[%s3480_s1 + $0x10] sm:$0xff]  ;;  %v38_v28 = vld [vmem:[%s3480_s1] sm:$0xff] }
   0xa   :  { %2316 = vmatmul.mubr.msk.f32.gmra.mxu0 %vm87_vm0, %v2691_v12  ;;  %2324 = vmatmul.mubr.msk.f32.gmra.mxu1 %vm87_vm0, %v2696_v13  ;;  %v45_v25 = vld [vmem:[%s3480_s1 + $0x38] sm:$0xff]  ;;  %v44_v27 = vld [vmem:[%s3480_s1 + $0x30] sm:$0xff]  ;;  %v43_v29 = vld [vmem:[%s3480_s1 + $0x28] sm:$0xff]  ;;  %v527_v47 = vand.u32 7, %v2125_v44 }
   0xb   :  { %2328 = vmatprep.mubr.msk.f32.mxu0 %vm87_vm0, %v2705_v14  ;;  %2336 = vmatprep.mubr.msk.f32.mxu1 %vm87_vm0, %v2710_v15  ;;  %v52_v30 = vld [vmem:[%s3480_s1 + $0x70] sm:$0xff]  ;;  %v57_v31 = vld [vmem:[%s3480_s1 + $0x98] sm:$0xff]  ;;  %v51_v32 = vld [vmem:[%s3480_s1 + $0x68] sm:$0xff] }
   0xc   :  { %v56_v33 = vld [vmem:[%s3480_s1 + $0x90] sm:$0xff]  ;;  %v50_v34 = vld [vmem:[%s3480_s1 + $0x60] sm:$0xff]  ;;  %v55_v35 = vld [vmem:[%s3480_s1 + $0x88] sm:$0xff]  ;;  %v528_v54 = vsub.s32 0, %v527_v47 }
   0xd   :  { %v49_v36 = vld [vmem:[%s3480_s1 + $0x58] sm:$0xff]  ;;  %v54_v37 = vld [vmem:[%s3480_s1 + $0x80] sm:$0xff]  ;;  %v48_v38 = vld [vmem:[%s3480_s1 + $0x50] sm:$0xff] }
   0xe   :  { %2329 = vmatmul.mubr.msk.f32.vlgmr.msra.gmra.mxu0 %vm87_vm0, %v2725_v16  ;;  %2337 = vmatmul.mubr.msk.f32.vlgmr.msra.gmra.mxu1 %vm87_vm0, %v2730_v17  ;;  %v53_v39 = vld [vmem:[%s3480_s1 + $0x78] sm:$0xff]  ;;  %v529_v60 = vsel %vm523_vm2, %v528_v54, %v527_v47  ;;  %vm510_vm10 = vmand %vm499_vm5, %vm506_vm6  ;;  %vm518_vm2 = vcmp.lt.s32.totalorder %v2889_v42, 32 }
   0xf   :  { %2343 = vmatpush3.xpose.msk.msra.mxu0 %vm87_vm0, %v42_v10  ;;  %2359 = vmatpush3.xpose.msk.msra.mxu1 %vm87_vm0, %v47_v11  ;;  %vm530_vm3 = vcmp.ne.s32.totalorder %v529_v60, 0  ;;  %vm531_vm4 = vcmp.lt.s32.totalorder %v529_v60, 0  ;;  %vm509_vm12 = vmand %vm498_vm8, %vm505_vm9 }
  0x10   :  { %2344 = vmatprep.subr.msk.mxu0 %vm87_vm0, %v41_v18  ;;  %2360 = vmatprep.subr.msk.mxu1 %vm87_vm0, %v46_v19  ;;  %vm2934_vm7 = vmand %vm531_vm4, %vm530_vm3 }
  0x11   :  { %2339 = vmatprep.mubr.msk.f32.mxu1 %vm87_vm0, %v2745_v20  ;;  %2331 = vmatprep.mubr.msk.f32.mxu0 %vm87_vm0, %v2750_v21  ;;  %vm515_vm15 = vmand %vm510_vm10, %vm513_vm11 }
  0x12   :  { %2340 = vmatmul.mubr.msk.f32.gmra.mxu1 %vm87_vm0, %v2757_v22  ;;  %2332 = vmatmul.mubr.msk.f32.gmra.mxu0 %vm87_vm0, %v2762_v23  ;;  %vm514_vm4 = vmand %vm509_vm12, %vm513_vm11  ;;  %vm990_vm12 = vcmask 326656  }
  0x13   :  { %2345 = vmatpush3.xpose.msk.msra.mxu0 %vm87_vm0, %v41_v18  ;;  %2361 = vmatpush3.xpose.msk.msra.mxu1 %vm87_vm0, %v46_v19  ;;  %vm520_vm6 = vmand %vm515_vm15, %vm518_vm2 }
  0x14   :  { %2346 = vmatprep.subr.msk.mxu0 %vm87_vm0, %v40_v24  ;;  %2362 = vmatprep.subr.msk.mxu1 %vm87_vm0, %v45_v25 }
  0x15   :  { %2352 = vmatprep.mubr.msk.f32.mxu0 %vm87_vm0, %v21_v2  ;;  %2368 = vmatprep.mubr.msk.f32.mxu1 %vm87_vm0, %v25_v3  ;;  %v492_v2 = vadd.s32 24, %v489_v52 }
  0x17   :  { %2347 = vmatpush3.xpose.msk.msra.mxu0 %vm87_vm0, %v40_v24  ;;  %2363 = vmatpush3.xpose.msk.msra.mxu1 %vm87_vm0, %v45_v25  ;;  %vm501_vm13 = vcmp.ge.s32.totalorder %v2886_v41, %v492_v2 }
  0x18   :  { %2348 = vmatprep.subr.msk.mxu0 %vm87_vm0, %v39_v26  ;;  %2364 = vmatprep.subr.msk.mxu1 %vm87_vm0, %v44_v27 }
  0x1b   :  { %2349 = vmatpush3.xpose.msk.msra.mxu0 %vm87_vm0, %v39_v26  ;;  %2365 = vmatpush3.xpose.msk.msra.mxu1 %vm87_vm0, %v44_v27 }
  0x1c   :  { %2350 = vmatprep.subr.msk.mxu0 %vm87_vm0, %v38_v28  ;;  %2366 = vmatprep.subr.msk.mxu1 %vm87_vm0, %v43_v29 }
  0x1f   :  { %2351 = vmatpush3.xpose.msk.msra.mxu0 %vm87_vm0, %v38_v28  ;;  %2367 = vmatpush3.xpose.msk.msra.mxu1 %vm87_vm0, %v43_v29 }
  0x20   :  { %2374 = vmatprep.subr.msk.mxu0 %vm87_vm0, %v52_v30  ;;  %2390 = vmatprep.subr.msk.mxu1 %vm87_vm0, %v57_v31 }
  0x22   :  { %2353 = vmatmul.mubr.msk.f32.vlgmr.msra.gmra.mxu0 %vm87_vm0, %v2647_v4  ;;  %2369 = vmatmul.mubr.msk.f32.vlgmr.msra.gmra.mxu1 %vm87_vm0, %v2654_v5  ;;  %v533_v5 = vadd.s32 8, %v529_v60 }
  0x23   :  { %2375 = vmatpush3.xpose.msk.msra.mxu0 %vm87_vm0, %v52_v30  ;;  %2391 = vmatpush3.xpose.msk.msra.mxu1 %vm87_vm0, %v57_v31 }
  0x24   :  { %2376 = vmatprep.subr.msk.mxu0 %vm87_vm0, %v51_v32  ;;  %2392 = vmatprep.subr.msk.mxu1 %vm87_vm0, %v56_v33 }
  0x25   :  { %2355 = vmatprep.mubr.msk.f32.mxu0 %vm87_vm0, %v2669_v8  ;;  %2371 = vmatprep.mubr.msk.f32.mxu1 %vm87_vm0, %v2674_v9  ;;  %v504_v9 = vadd.s32 8, %v492_v2 }
  0x26   :  { %2356 = vmatmul.mubr.msk.f32.gmra.mxu0 %vm87_vm0, %v2691_v12  ;;  %2372 = vmatmul.mubr.msk.f32.gmra.mxu1 %vm87_vm0, %v2696_v13  ;;  %v534_v13 = vsel %vm2934_vm7, %v533_v5, %v529_v60  ;;  %vm519_vm7 = vmand %vm514_vm4, %vm518_vm2 }
  0x27   :  { %2377 = vmatpush3.xpose.msk.msra.mxu0 %vm87_vm0, %v51_v32  ;;  %2393 = vmatpush3.xpose.msk.msra.mxu1 %vm87_vm0, %v56_v33  ;;  %vm508_vm14 = vcmp.le.s32.totalorder %v2886_v41, %v504_v9  ;;  %vm535_vm3 = vcmp.eq.s32.totalorder %v534_v13, 0 }
  0x28   :  { %2378 = vmatprep.subr.msk.mxu0 %vm87_vm0, %v50_v34  ;;  %2394 = vmatprep.subr.msk.mxu1 %vm87_vm0, %v55_v35  ;;  %vm512_vm5 = vmand %vm501_vm13, %vm508_vm14 }
  0x29   :  { %2384 = vmatprep.mubr.msk.f32.mxu0 %vm87_vm0, %v2705_v14  ;;  %2400 = vmatprep.mubr.msk.f32.mxu1 %vm87_vm0, %v2710_v15  ;;  %v491_v15 = vadd.s32 16, %v489_v52  ;;  %vm517_vm8 = vmand %vm512_vm5, %vm513_vm11 }
  0x2a   :  { %vm522_vm13 = vmand %vm517_vm8, %vm518_vm2 }
  0x2b   :  { %2379 = vmatpush3.xpose.msk.msra.mxu0 %vm87_vm0, %v50_v34  ;;  %2395 = vmatpush3.xpose.msk.msra.mxu1 %vm87_vm0, %v55_v35  ;;  %vm500_vm9 = vcmp.ge.s32.totalorder %v2886_v41, %v491_v15 }
  0x2c   :  { %2380 = vmatprep.subr.msk.mxu0 %vm87_vm0, %v49_v36  ;;  %2396 = vmatprep.subr.msk.mxu1 %vm87_vm0, %v54_v37 }
  0x2f   :  { %2381 = vmatpush3.xpose.msk.msra.mxu0 %vm87_vm0, %v49_v36  ;;  %2397 = vmatpush3.xpose.msk.msra.mxu1 %vm87_vm0, %v54_v37 }
  0x30   :  { %2382 = vmatprep.subr.msk.mxu0 %vm87_vm0, %v48_v38  ;;  %2398 = vmatprep.subr.msk.mxu1 %vm87_vm0, %v53_v39 }
  0x33   :  { %2383 = vmatpush3.xpose.msk.msra.mxu0 %vm87_vm0, %v48_v38  ;;  %2399 = vmatpush3.xpose.msk.msra.mxu1 %vm87_vm0, %v53_v39 }
  0x36   :  { %2385 = vmatmul.mubr.msk.f32.vlgmr.msra.gmra.mxu0 %vm87_vm0, %v2725_v16  ;;  %2401 = vmatmul.mubr.msk.f32.vlgmr.msra.gmra.mxu1 %vm87_vm0, %v2730_v17 }
  0x37   :  { %2387 = vmatprep.mubr.msk.f32.mxu0 %vm87_vm0, %v2750_v21  ;;  %2403 = vmatprep.mubr.msk.f32.mxu1 %vm87_vm0, %v2745_v20  ;;  %v503_v20 = vadd.s32 8, %v491_v15  ;;  %v2599_v21 = vmov 0.0  }
  0x39   :  { %vm507_vm10 = vcmp.le.s32.totalorder %v2886_v41, %v503_v20 }
  0x3a   :  { %2388 = vmatmul.mubr.msk.f32.gmra.mxu0 %vm87_vm0, %v2762_v23  ;;  %2404 = vmatmul.mubr.msk.f32.gmra.mxu1 %vm87_vm0, %v2757_v22  ;;  %v536_v22 = vsel %vm535_vm3, -10000.0, %v2599_v21  ;;  %vm511_vm14 = vmand %vm500_vm9, %vm507_vm10 }
  0x3b   :  { %v538_v26 = vsel %vm520_vm6, %v536_v22, -inf  ;;  %v537_v29 = vsel %vm519_vm7, %v536_v22, -inf  ;;  %v540_v36 = vsel %vm522_vm13, %v536_v22, -inf  ;;  %vm516_vm15 = vmand %vm511_vm14, %vm513_vm11  ;;  %vm1663_vm11 = vcmask 1043456  }
  0x3c   :  { %vm521_vm3 = vmand %vm516_vm15, %vm518_vm2 }
  0xc6   :  { %v2893_v45 = vpop.f32.mrf.mxu0  ;;  %v2895_v46 = vpop.f32.mrf.mxu1 }
  0xc7   :  { %v957_v48 = vsel %vm941_vm1, %v2895_v46, -inf  ;;  %v945_v49 = vsel %vm941_vm1, %v2893_v45, -inf }
  0xc8   :  { %958 = vmax.xlane.f32.xlu1 %v957_v48  ;;  %v2901_v50 = vpop.f32.mrf.mxu1  ;;  %946 = vmax.xlane.f32.xlu0 %v945_v49  ;;  %v2903_v51 = vpop.f32.mrf.mxu0  ;;  %v539_v49 = vsel %vm521_vm3, %v536_v22, -inf }
  0xc9   :  { %v942_v56 = vsel %vm941_vm1, %v2903_v51, -inf  ;;  %v954_v62 = vsel %vm941_vm1, %v2901_v50, -inf }
  0xca   :  { %v2905_v53 = vpop.f32.mrf.mxu1  ;;  %v2912_v57 = vpop.f32.mrf.mxu0 }
  0xcb   :  { %v963_v55 = vsel %vm941_vm1, %v2905_v53, -inf  ;;  %v951_v4 = vsel %vm941_vm1, %v2912_v57, -inf }
  0xcc   :  { %964 = vmax.xlane.f32.xlu1 %v963_v55  ;;  %v2914_v58 = vpop.f32.mrf.mxu1  ;;  %943 = vmax.xlane.f32.xlu0 %v942_v56  ;;  %v2920_v63 = vpop.f32.mrf.mxu0 }
  0xcd   :  { %v960_v61 = vsel %vm941_vm1, %v2914_v58, -inf  ;;  %v948_v12 = vsel %vm941_vm1, %v2920_v63, -inf }
  0xce   :  { %v2922_v0 = vpop.f32.mrf.mxu1  ;;  %v2928_v6 = vpop.f32.mrf.mxu0 }
  0xcf   :  { %v981_v3 = vsel %vm941_vm1, %v2922_v0, -inf  ;;  %v969_v18 = vsel %vm941_vm1, %v2928_v6, -inf }
  0xd0   :  { %961 = vmax.xlane.f32.xlu1 %v960_v61  ;;  %955 = vmax.xlane.f32.xlu0 %v954_v62  ;;  %v2930_v7 = vpop.f32.mrf.mxu1  ;;  %v2949_v14 = vpop.f32.mrf.mxu0 }
  0xd1   :  { %v978_v11 = vsel %vm941_vm1, %v2930_v7, -inf  ;;  %v966_v25 = vsel %vm941_vm1, %v2949_v14, -inf }
  0xd2   :  { %v2940_v10 = vpop.f32.mrf.mxu1  ;;  %v2955_v17 = vpop.f32.mrf.mxu0 }
  0xd3   :  { %3487 = vst [vmem:[#allocation2_spill] sm:$0xff] %v2940_v10  ;;  %v987_v16 = vsel %vm941_vm1, %v2940_v10, -inf  ;;  %v975_v31 = vsel %vm941_vm1, %v2955_v17, -inf }
  0xd4   :  { %982 = vmax.xlane.f32.xlu1 %v981_v3  ;;  %952 = vmax.xlane.f32.xlu0 %v951_v4  ;;  %v2964_v19 = vpop.f32.mrf.mxu1  ;;  %v2968_v23 = vpop.f32.mrf.mxu0 }
  0xd5   :  { %v984_v24 = vsel %vm941_vm1, %v2964_v19, -inf  ;;  %v972_v39 = vsel %vm941_vm1, %v2968_v23, -inf }
  0xd8   :  { %979 = vmax.xlane.f32.xlu1 %v978_v11  ;;  %949 = vmax.xlane.f32.xlu0 %v948_v12 }
  0xdc   :  { %988 = vmax.xlane.f32.xlu1 %v987_v16  ;;  %970 = vmax.xlane.f32.xlu0 %v969_v18 }
  0xe0   :  { %985 = vmax.xlane.f32.xlu1 %v984_v24  ;;  %967 = vmax.xlane.f32.xlu0 %v966_v25 }
  0xe2   :  { %v2354_v27 = vpop.f32.mrf.mxu0  ;;  %v2370_v28 = vpop.f32.mrf.mxu1 }
  0xe3   :  { %v2982_v30 = vadd.f32 %v2370_v28, %v538_v26  ;;  %v2992_v38 = vadd.f32 %v2354_v27, %v538_v26 }
  0xe4   :  { %v622_v32 = vpop.f32.mrf.mxu0  ;;  %976 = vmax.xlane.f32.xlu0 %v975_v31  ;;  %v722_v35 = vpop.f32.mrf.mxu1  ;;  %v63_v31 = vld [vmem:[%s3481_s2 + $0x20] sm:$0xff] }
  0xe5   :  { %v2986_v33 = vadd.f32 %v622_v32, %v537_v29  ;;  %v1006_v34 = vsel %vm990_vm12, %v2982_v30, -inf  ;;  %v2996_v40 = vadd.f32 %v722_v35, %v537_v29  ;;  %v994_v48 = vsel %vm990_vm12, %v2992_v38, -inf  ;;  %2406 = vmatprep.subr.mxu0 %v63_v31  ;;  %v62_v32 = vld [vmem:[%s3481_s2 + $0x18] sm:$0xff] }
  0xe6   :  { %1007 = vmax.xlane.f32.xlu1 %v1006_v34  ;;  %v2357_v37 = vpop.f32.mrf.mxu0  ;;  %v2373_v44 = vpop.f32.mrf.mxu1  ;;  %2407 = vmatpush3.msra.mxu0 %v63_v31  ;;  %v68_v34 = vld [vmem:[%s3481_s2 + $0x48] sm:$0xff] }
  0xe7   :  { %v991_v41 = vsel %vm990_vm12, %v2986_v33, -inf  ;;  %v3000_v43 = vadd.f32 %v2357_v37, %v540_v36  ;;  %v3004_v47 = vadd.f32 %v2373_v44, %v540_v36  ;;  %v1003_v54 = vsel %vm990_vm12, %v2996_v40, -inf  ;;  %2408 = vmatprep.subr.mxu0 %v62_v32  ;;  %2422 = vmatprep.subr.mxu1 %v68_v34  ;;  %v61_v37 = vld [vmem:[%s3481_s2 + $0x10] sm:$0xff]  ;;  %v66_v44 = vld [vmem:[%s3481_s2 + $0x38] sm:$0xff] }
  0xe8   :  { %973 = vmax.xlane.f32.xlu0 %v972_v39  ;;  %v632_v52 = vpop.f32.mrf.mxu0  ;;  %v732_v56 = vpop.f32.mrf.mxu1  ;;  %2409 = vmatpush3.msra.mxu0 %v62_v32  ;;  %v67_v39 = vld [vmem:[%s3481_s2 + $0x40] sm:$0xff] }
  0xe9   :  { %v1000_v55 = vsel %vm990_vm12, %v3000_v43, -inf  ;;  %v3012_v42 = vadd.f32 %v632_v52, %v539_v49  ;;  %v1012_v59 = vsel %vm990_vm12, %v3004_v47, -inf  ;;  %v3016_v60 = vadd.f32 %v732_v56, %v539_v49  ;;  %2423 = vmatpush3.msra.mxu1 %v68_v34  ;;  %2410 = vmatprep.subr.mxu0 %v61_v37  ;;  %v64_v52 = vld [vmem:[%s3481_s2 + $0x28] sm:$0xff] }
  0xea   :  { %992 = vmax.xlane.f32.xlu1 %v991_v41  ;;  %2424 = vmatprep.subr.mxu1 %v67_v39  ;;  %v60_v41 = vld [vmem:[%s3481_s2 + $0x8] sm:$0xff] }
  0xeb   :  { %v997_v61 = vsel %vm990_vm12, %v3012_v42, -inf  ;;  %v1009_v62 = vsel %vm990_vm12, %v3016_v60, -inf  ;;  %2411 = vmatpush3.msra.mxu0 %v61_v37  ;;  %2425 = vmatpush3.msra.mxu1 %v67_v39 }
  0xec   :  { %995 = vmax.xlane.f32.xlu0 %v994_v48  ;;  %2412 = vmatprep.subr.mxu0 %v60_v41  ;;  %v59_v48 = vld [vmem:[%s3481_s2] sm:$0xff] }
  0xed   :  { %2426 = vmatprep.subr.mxu1 %v66_v44  ;;  %2413 = vmatpush3.msra.mxu0 %v60_v41 }
  0xee   :  { %1004 = vmax.xlane.f32.xlu1 %v1003_v54  ;;  %2427 = vmatpush3.msra.mxu1 %v66_v44  ;;  %v3087_v54 = vld [vmem:[%s3481_s2 + $0x70] sm:$0xff] }
  0xef   :  { %2414 = vmatprep.subr.mxu0 %v59_v48 }
  0xf0   :  { %1001 = vmax.xlane.f32.xlu0 %v1000_v55  ;;  %2415 = vmatpush3.msra.mxu0 %v59_v48  ;;  %v3092_v55 = vld [vmem:[%s3481_s2 + $0x98] sm:$0xff] }
  0xf1   :  { %2438 = vmatprep.subr.mxu0 %v3087_v54 }
  0xf2   :  { %1013 = vmax.xlane.f32.xlu1 %v1012_v59 }
  0xf4   :  { %998 = vmax.xlane.f32.xlu0 %v997_v61 }
  0xf6   :  { %v2386_v1 = vpop.f32.mrf.mxu0  ;;  %v2402_v2 = vpop.f32.mrf.mxu1  ;;  %1010 = vmax.xlane.f32.xlu1 %v1009_v62 }
  0xf7   :  { %v3022_v3 = vadd.f32 %v2386_v1, %v538_v26  ;;  %v3024_v4 = vadd.f32 %v2402_v2, %v538_v26 }
  0xf8   :  { %v822_v5 = vpop.f32.mrf.mxu0  ;;  %v922_v8 = vpop.f32.mrf.mxu1 }
  0xf9   :  { %v3026_v9 = vadd.f32 %v822_v5, %v537_v29  ;;  %v3028_v11 = vadd.f32 %v922_v8, %v537_v29  ;;  %v1018_v12 = vsel %vm990_vm12, %v3022_v3, -inf  ;;  %v1030_v13 = vsel %vm990_vm12, %v3024_v4, -inf }
  0xfa   :  { %1019 = vmax.xlane.f32.xlu0 %v1018_v12  ;;  %1031 = vmax.xlane.f32.xlu1 %v1030_v13  ;;  %v2389_v15 = vpop.f32.mrf.mxu0  ;;  %v2405_v16 = vpop.f32.mrf.mxu1 }
  0xfb   :  { %v1015_v24 = vsel %vm990_vm12, %v3026_v9, -inf  ;;  %v1027_v25 = vsel %vm990_vm12, %v3028_v11, -inf  ;;  %v3042_v26 = vadd.f32 %v2389_v15, %v540_v36  ;;  %v3044_v27 = vadd.f32 %v2405_v16, %v540_v36 }
  0xfc   :  { %v832_v18 = vpop.f32.mrf.mxu0  ;;  %v932_v20 = vpop.f32.mrf.mxu1 }
  0xfd   :  { %v3034_v21 = vadd.f32 %v832_v18, %v539_v49  ;;  %v3036_v22 = vadd.f32 %v932_v20, %v539_v49  ;;  %v1024_v35 = vsel %vm990_vm12, %v3042_v26, -inf  ;;  %v1036_v36 = vsel %vm990_vm12, %v3044_v27, -inf  ;;  %v65_v49 = vld [vmem:[%s3481_s2 + $0x30] sm:$0xff] }
  0xfe   :  { %1016 = vmax.xlane.f32.xlu0 %v1015_v24  ;;  %1028 = vmax.xlane.f32.xlu1 %v1027_v25 }
  0xff   :  { %v1021_v28 = vsel %vm990_vm12, %v3034_v21, -inf  ;;  %v1033_v29 = vsel %vm990_vm12, %v3036_v22, -inf  ;;  %2428 = vmatprep.subr.mxu1 %v65_v49 }
 0x100   :  { %2429 = vmatpush3.msra.mxu1 %v65_v49 }
 0x101   :  { %2430 = vmatprep.subr.mxu1 %v64_v52 }
 0x102   :  { %1022 = vmax.xlane.f32.xlu0 %v1021_v28  ;;  %1034 = vmax.xlane.f32.xlu1 %v1033_v29 }
 0x103   :  { %2431 = vmatpush3.msra.mxu1 %v64_v52 }
 0x104   :  { %2454 = vmatprep.subr.mxu1 %v3092_v55 }
 0x106   :  { %1025 = vmax.xlane.f32.xlu0 %v1024_v35  ;;  %1037 = vmax.xlane.f32.xlu1 %v1036_v36 }
 0x151   :  { %v959_v56 = vpop.xlane.xlu1 %958  ;;  %v947_v59 = vpop.xlane.xlu0 %946 }
 0x155   :  { %v965_v61 = vpop.xlane.xlu1 %964  ;;  %v944_v62 = vpop.xlane.xlu0 %943 }
 0x159   :  { %v962_v1 = vpop.xlane.xlu1 %961  ;;  %v956_v2 = vpop.xlane.xlu0 %955 }
 0x15d   :  { %v3096_v5 = vpop.xlane.xlu1 %982  ;;  %v953_v8 = vpop.xlane.xlu0 %952 }
 0x161   :  { %v3098_v12 = vpop.xlane.xlu1 %979  ;;  %v950_v13 = vpop.xlane.xlu0 %949 }
 0x165   :  { %v3100_v15 = vpop.xlane.xlu1 %988  ;;  %v971_v16 = vpop.xlane.xlu0 %970 }
 0x169   :  { %v3102_v18 = vpop.xlane.xlu1 %985  ;;  %v3104_v20 = vpop.xlane.xlu0 %967 }
 0x16d   :  { %v3106_v24 = vpop.xlane.xlu0 %976 }
 0x16f   :  { %v1008_v25 = vpop.xlane.xlu1 %1007 }
 0x170   :  { %v1044_v29 = vmax.f32 %v959_v56, %v1008_v25 }
 0x171   :  { %v3108_v28 = vpop.xlane.xlu0 %973 }
 0x172   :  { %v1060_v35 = vsub.f32 %v2895_v46, %v1044_v29  ;;  %v1108_v41 = vsub.f32 %v2982_v30, %v1044_v29 }
 0x173   :  { %v993_v31 = vpop.xlane.xlu1 %992 }
 0x174   :  { %v1039_v32 = vmax.f32 %v944_v62, %v993_v31  ;;  %v1081_v62 = vmul.f32 1.442695, %v1060_v35  ;;  %v1129_v29 = vmul.f32 1.442695, %v1108_v41 }
 0x175   :  { %v996_v34 = vpop.xlane.xlu0 %995 }
 0x176   :  { %v1055_v36 = vsub.f32 %v2903_v51, %v1039_v32  ;;  %v1103_v37 = vsub.f32 %v2986_v33, %v1039_v32  ;;  %v1040_v39 = vmax.f32 %v947_v59, %v996_v34 }
 0x177   :  { %v1005_v44 = vpop.xlane.xlu1 %1004 }
 0x178   :  { %v1071_v48 = vmul.f32 1.442695, %v1055_v36  ;;  %v1119_v49 = vmul.f32 1.442695, %v1103_v37  ;;  %v1056_v52 = vsub.f32 %v2893_v45, %v1040_v39  ;;  %v1104_v10 = vsub.f32 %v2992_v38, %v1040_v39 }
 0x179   :  { %v1043_v56 = vmax.f32 %v956_v2, %v1005_v44  ;;  %v1002_v25 = vpop.xlane.xlu0 %1001 }
 0x17a   :  { %2503 = vpow2.f32 %v1071_v48  ;;  %v1073_v31 = vmul.f32 1.442695, %v1056_v52  ;;  %v1121_v46 = vmul.f32 1.442695, %v1104_v10  ;;  %v1042_v59 = vmax.f32 %v953_v8, %v1002_v25 }
 0x17b   :  { %2505 = vpow2.f32 %v1119_v49  ;;  %v1059_v51 = vsub.f32 %v2901_v50, %v1043_v56  ;;  %v1107_v33 = vsub.f32 %v2996_v40, %v1043_v56  ;;  %v1014_v30 = vpop.xlane.xlu1 %1013 }
 0x17c   :  { %2507 = vpow2.f32 %v1073_v31  ;;  %v1046_v34 = vmax.f32 %v965_v61, %v1014_v30  ;;  %v1106_v2 = vsub.f32 %v3000_v43, %v1042_v59  ;;  %v1058_v61 = vsub.f32 %v2912_v57, %v1042_v59 }
 0x17d   :  { %2509 = vpow2.f32 %v1121_v46  ;;  %v1079_v32 = vmul.f32 1.442695, %v1059_v51  ;;  %v1127_v45 = vmul.f32 1.442695, %v1107_v33  ;;  %v999_v38 = vpop.xlane.xlu0 %998 }
 0x17e   :  { %2511 = vpow2.f32 %v1081_v62  ;;  %v1041_v35 = vmax.f32 %v950_v13, %v999_v38  ;;  %v1110_v50 = vsub.f32 %v3004_v47, %v1046_v34  ;;  %v1125_v39 = vmul.f32 1.442695, %v1106_v2 }
 0x17f   :  { %2513 = vpow2.f32 %v1079_v32  ;;  %v1011_v10 = vpop.xlane.xlu1 %1010  ;;  %v1062_v43 = vsub.f32 %v2905_v53, %v1046_v34  ;;  %v1077_v57 = vmul.f32 1.442695, %v1058_v61 }
 0x180   :  { %2515 = vpow2.f32 %v1127_v45  ;;  %v1045_v36 = vmax.f32 %v962_v1, %v1011_v10  ;;  %v1105_v40 = vsub.f32 %v3012_v42, %v1041_v35  ;;  %v1057_v8 = vsub.f32 %v2920_v63, %v1041_v35 }
 0x181   :  { %2517 = vpow2.f32 %v1129_v29  ;;  %v1133_v1 = vmul.f32 1.442695, %v1110_v50  ;;  %v1085_v53 = vmul.f32 1.442695, %v1062_v43 }
 0x182   :  { %v1109_v37 = vsub.f32 %v3016_v60, %v1045_v36  ;;  %v1123_v41 = vmul.f32 1.442695, %v1105_v40  ;;  %v1061_v47 = vsub.f32 %v2914_v58, %v1045_v36  ;;  %v1075_v52 = vmul.f32 1.442695, %v1057_v8 }
 0x183   :  { %v1020_v44 = vpop.xlane.xlu0 %1019  ;;  %v1032_v48 = vpop.xlane.xlu1 %1031 }
 0x184   :  { %v1131_v13 = vmul.f32 1.442695, %v1109_v37  ;;  %v3125_v49 = vmax.f32 %v971_v16, %v1020_v44  ;;  %2519 = vpow2.f32 %v1123_v41  ;;  %v3129_v63 = vmax.f32 %v3096_v5, %v1032_v48 }
 0x185   :  { %2521 = vpow2.f32 %v1125_v39  ;;  %v1083_v5 = vmul.f32 1.442695, %v1061_v47 }
 0x186   :  { %2523 = vpow2.f32 %v1131_v13  ;;  %v1112_v16 = vsub.f32 %v3022_v3, %v3125_v49  ;;  %v1116_v3 = vsub.f32 %v3024_v4, %v3129_v63  ;;  %v1064_v13 = vsub.f32 %v2928_v6, %v3125_v49 }
 0x187   :  { %v3131_v42 = vpop.eup %2503  ;;  %v1017_v60 = vpop.xlane.xlu0 %1016  ;;  %2525 = vpow2.f32 %v1133_v1 }
 0x188   :  { %v1029_v56 = vpop.xlane.xlu1 %1028  ;;  %v3133_v25 = vpop.eup %2505  ;;  %v3138_v58 = vmax.f32 %v3104_v20, %v1017_v60  ;;  %v1151_v46 = vsel %vm941_vm1, %v3131_v42, 0.0  ;;  %2527 = vpow2.f32 %v1075_v52  ;;  %v1137_v32 = vmul.f32 1.442695, %v1112_v16  ;;  %v75_v52 = vld [vmem:[%s3481_s2 + $0x80] sm:$0xff] }
 0x189   :  { %v3140_v62 = vpop.eup %2507  ;;  %v3143_v31 = vmax.f32 %v3098_v12, %v1029_v56  ;;  %2416 = vmatprep.mubr.msk.f32.mxu0 %vm990_vm12, %v3133_v25  ;;  %1152 = vadd.xlane.f32.xlu0 %v1151_v46  ;;  %v72_v12 = vld [vmem:[%s3481_s2 + $0x68] sm:$0xff]  ;;  %2529 = vpow2.f32 %v1077_v57  ;;  %v1145_v10 = vmul.f32 1.442695, %v1116_v3  ;;  %v83_v3 = vld [vmem:[%s3482_s4] sm:$0xf] }
 0x18a   :  { %v2510_v51 = vpop.eup %2509  ;;  %v1111_v20 = vsub.f32 %v3026_v9, %v3138_v58  ;;  %v1154_v33 = vsel %vm941_vm1, %v3140_v62, 0.0  ;;  %2531 = vpow2.f32 %v1085_v53  ;;  %v1063_v44 = vsub.f32 %v2949_v14, %v3138_v58  ;;  %v70_v14 = vld [vmem:[%s3481_s2 + $0x58] sm:$0xff]  ;;  %v69_v53 = vld [vmem:[%s3481_s2 + $0x50] sm:$0xff] }
 0x18b   :  { %v3158_v59 = vpop.eup %2511  ;;  %v1115_v30 = vsub.f32 %v3028_v11, %v3143_v31  ;;  %v1023_v29 = vpop.xlane.xlu0 %1022  ;;  %2417 = vmatmul.mubr.msk.f32.vlgmr.msra.gmra.mxu0 %vm990_vm12, %v2510_v51  ;;  %1155 = vadd.xlane.f32.xlu1 %v1154_v33  ;;  %2533 = vpow2.f32 %v1083_v5  ;;  %v1202_v43 = vsel %vm990_vm12, %v2510_v51, 0.0  ;;  %v1067_v49 = vsub.f32 %v2930_v7, %v3143_v31  ;;  %v74_v7 = vld [vmem:[%s3481_s2 + $0x78] sm:$0xff] }
 0x18c   :  { %v1035_v4 = vpop.xlane.xlu1 %1034  ;;  %v3163_v9 = vpop.eup %2513  ;;  %v1135_v45 = vmul.f32 1.442695, %v1111_v20  ;;  %v3166_v34 = vmax.f32 %v3108_v28, %v1023_v29  ;;  %2439 = vmatpush3.msra.mxu0 %v3087_v54  ;;  %v77_v54 = vld [vmem:[%s3481_s2 + $0x90] sm:$0xff]  ;;  %v1166_v8 = vsel %vm941_vm1, %v3158_v59, 0.0  ;;  %v1087_v6 = vmul.f32 1.442695, %v1063_v44 }
 0x18d   :  { %v2516_v38 = vpop.eup %2515  ;;  %v1143_v2 = vmul.f32 1.442695, %v1115_v30  ;;  %v3170_v35 = vmax.f32 %v3102_v18, %v1035_v4  ;;  %2440 = vmatprep.subr.mxu0 %v72_v12  ;;  %v1163_v28 = vsel %vm941_vm1, %v3163_v9, 0.0  ;;  %v71_v18 = vld [vmem:[%s3481_s2 + $0x60] sm:$0xff]  ;;  %v1089_v58 = vmul.f32 1.442695, %v1064_v13 }
 0x18e   :  { %v2518_v11 = vpop.eup %2517  ;;  %v1113_v36 = vsub.f32 %v3034_v21, %v3166_v34  ;;  %2432 = vmatprep.mubr.msk.f32.mxu1 %vm990_vm12, %v2516_v38  ;;  %2441 = vmatpush3.msra.mxu0 %v72_v12  ;;  %2535 = vpow2.f32 %v1135_v45  ;;  %v1211_v60 = vsel %vm990_vm12, %v2516_v38, 0.0  ;;  %v1068_v5 = vsub.f32 %v2922_v0, %v3129_v63  ;;  %v84_v20 = vld [vmem:[%s3482_s4 + $0x4] sm:$0xf]  ;;  %v85_v38 = vld [vmem:[%s3482_s4 + $0x8] sm:$0xf] }
 0x18f   :  { %v1117_v50 = vsub.f32 %v3036_v22, %v3170_v35  ;;  %2433 = vmatmul.mubr.msk.f32.vlgmr.msra.gmra.mxu1 %vm990_vm12, %v2518_v11  ;;  %1164 = vadd.xlane.f32.xlu0 %v1163_v28  ;;  %v1026_v21 = vpop.xlane.xlu0 %1025  ;;  %2537 = vpow2.f32 %v1137_v32  ;;  %v76_v22 = vld [vmem:[%s3481_s2 + $0x88] sm:$0xff]  ;;  %v1095_v46 = vmul.f32 1.442695, %v1067_v49  ;;  %v1065_v30 = vsub.f32 %v2968_v23, %v3166_v34 }
 0x190   :  { %v1038_v40 = vpop.xlane.xlu1 %1037  ;;  %v1139_v37 = vmul.f32 1.442695, %v1113_v36  ;;  %v3189_v61 = vmax.f32 %v3106_v24, %v1026_v21  ;;  %1167 = vadd.xlane.f32.xlu1 %v1166_v8  ;;  %2455 = vmatpush3.msra.mxu1 %v3092_v55  ;;  %2539 = vpow2.f32 %v1143_v2  ;;  %v1199_v55 = vsel %vm990_vm12, %v3133_v25, 0.0 }
 0x191   :  { %v1147_v39 = vmul.f32 1.442695, %v1117_v50  ;;  %v3196_v41 = vmax.f32 %v3100_v15, %v1038_v40  ;;  %2456 = vmatprep.subr.mxu1 %v77_v54  ;;  %2442 = vmatprep.subr.mxu0 %v71_v18  ;;  %2541 = vpow2.f32 %v1145_v10  ;;  %v3204_v48 = vpop.eup %2519  ;;  %v1214_v25 = vsel %vm990_vm12, %v2518_v11, 0.0  ;;  %v86_v10 = vld [vmem:[%s3482_s4 + $0xc] sm:$0xf] }
 0x192   :  { %v1114_v24 = vsub.f32 %v3042_v26, %v3189_v61  ;;  %2457 = vmatpush3.msra.mxu1 %v77_v54  ;;  %2443 = vmatpush3.msra.mxu0 %v71_v18  ;;  %2543 = vpow2.f32 %v1139_v37  ;;  %v3212_v26 = vpop.eup %2521  ;;  %v1097_v12 = vmul.f32 1.442695, %v1068_v5  ;;  %v1069_v32 = vsub.f32 %v2964_v19, %v3170_v35 }
 0x193   :  { %v1118_v15 = vsub.f32 %v3044_v27, %v3196_v41  ;;  %1200 = vadd.xlane.f32.xlu0 %v1199_v55  ;;  %2458 = vmatprep.subr.mxu1 %v76_v22  ;;  %v3218_v47 = vpop.eup %2523  ;;  %2545 = vpow2.f32 %v1147_v39  ;;  %v1066_v34 = vsub.f32 %v2955_v17, %v3189_v61  ;;  %v1091_v35 = vmul.f32 1.442695, %v1065_v30  ;;  %v3488_v17 = vld [vmem:[#allocation2_spill] sm:$0xff] }
 0x194   :  { %v1141_v1 = vmul.f32 1.442695, %v1114_v24  ;;  %2419 = vmatprep.mubr.msk.f32.mxu0 %vm990_vm12, %v3204_v48  ;;  %1203 = vadd.xlane.f32.xlu1 %v1202_v43  ;;  %v3225_v57 = vpop.eup %2525  ;;  %v1070_v11 = vsub.f32 %v3488_v17, %v3196_v41  ;;  %v1099_v28 = vmul.f32 1.442695, %v1069_v32  ;;  %v1205_v54 = vsel %vm990_vm12, %v3204_v48, 0.0 }
 0x195   :  { %v1149_v27 = vmul.f32 1.442695, %v1118_v15  ;;  %2420 = vmatmul.mubr.msk.f32.gmra.mxu0 %vm990_vm12, %v3212_v26  ;;  %2459 = vmatpush3.msra.mxu1 %v76_v22  ;;  %v3232_v56 = vpop.eup %2527  ;;  %v1093_v18 = vmul.f32 1.442695, %v1066_v34  ;;  %v1208_v50 = vsel %vm990_vm12, %v3212_v26, 0.0  ;;  %v1217_v37 = vsel %vm990_vm12, %v3218_v47, 0.0 }
 0x196   :  { %2435 = vmatprep.mubr.msk.f32.mxu1 %vm990_vm12, %v3218_v47  ;;  %2444 = vmatprep.subr.mxu0 %v70_v14  ;;  %2547 = vpow2.f32 %v1141_v1  ;;  %v3243_v16 = vpop.eup %2529  ;;  %v1157_v51 = vsel %vm941_vm1, %v3232_v56, 0.0  ;;  %v1101_v40 = vmul.f32 1.442695, %v1070_v11  ;;  %v1220_v22 = vsel %vm990_vm12, %v3225_v57, 0.0 }
 0x197   :  { %1212 = vadd.xlane.f32.xlu0 %v1211_v60  ;;  %2436 = vmatmul.mubr.msk.f32.gmra.mxu1 %vm990_vm12, %v3225_v57  ;;  %2549 = vpow2.f32 %v1149_v27  ;;  %v3247_v31 = vpop.eup %2531  ;;  %v1160_v63 = vsel %vm941_vm1, %v3243_v16, 0.0 }
 0x198   :  { %1215 = vadd.xlane.f32.xlu1 %v1214_v25  ;;  %2460 = vmatprep.subr.mxu1 %v75_v52  ;;  %2551 = vpow2.f32 %v1087_v6  ;;  %v3254_v0 = vpop.eup %2533  ;;  %v1172_v19 = vsel %vm941_vm1, %v3247_v31, 0.0 }
 0x199   :  { %2445 = vmatpush3.msra.mxu0 %v70_v14  ;;  %2461 = vmatpush3.msra.mxu1 %v75_v52  ;;  %2553 = vpow2.f32 %v1089_v58  ;;  %v1169_v23 = vsel %vm941_vm1, %v3254_v0, 0.0 }
 0x19a   :  { %2446 = vmatprep.subr.mxu0 %v69_v53  ;;  %2462 = vmatprep.subr.mxu1 %v74_v7  ;;  %2555 = vpow2.f32 %v1095_v46 }
 0x19b   :  { %1158 = vadd.xlane.f32.xlu0 %v1157_v51  ;;  %2447 = vmatpush3.msra.mxu0 %v69_v53  ;;  %v3261_v33 = vpop.eup %2535  ;;  %2557 = vpow2.f32 %v1097_v12 }
 0x19c   :  { %1161 = vadd.xlane.f32.xlu1 %v1160_v63  ;;  %2463 = vmatpush3.msra.mxu1 %v74_v7  ;;  %v3265_v29 = vpop.eup %2537  ;;  %2559 = vpow2.f32 %v1091_v35  ;;  %v1223_v55 = vsel %vm990_vm12, %v3261_v33, 0.0 }
 0x19d   :  { %2448 = vmatprep.mubr.msk.f32.mxu0 %vm990_vm12, %v3261_v33  ;;  %2470 = vmatprep.subr.msk.mxu0 %vm1663_vm11, %v83_v3  ;;  %v3270_v4 = vpop.eup %2539  ;;  %2561 = vpow2.f32 %v1099_v28  ;;  %v1226_v43 = vsel %vm990_vm12, %v3265_v29, 0.0 }
 0x19e   :  { %2449 = vmatmul.mubr.msk.f32.vlgmr.msra.gmra.mxu0 %vm990_vm12, %v3265_v29  ;;  %2478 = vmatprep.subr.msk.mxu1 %vm1663_vm11, %v84_v20  ;;  %v3279_v45 = vpop.eup %2541  ;;  %2563 = vpow2.f32 %v1093_v18  ;;  %v1235_v26 = vsel %vm990_vm12, %v3270_v4, 0.0 }
 0x19f   :  { %2464 = vmatprep.mubr.msk.f32.mxu1 %vm990_vm12, %v3270_v4  ;;  %1170 = vadd.xlane.f32.xlu0 %v1169_v23  ;;  %v3290_v2 = vpop.eup %2543  ;;  %2565 = vpow2.f32 %v1101_v40  ;;  %v1238_v13 = vsel %vm990_vm12, %v3279_v45, 0.0 }
 0x1a0   :  { %2465 = vmatmul.mubr.msk.f32.vlgmr.msra.gmra.mxu1 %vm990_vm12, %v3279_v45  ;;  %1173 = vadd.xlane.f32.xlu1 %v1172_v19  ;;  %v3302_v36 = vpop.eup %2545  ;;  %v1229_v57 = vsel %vm990_vm12, %v3290_v2, 0.0 }
 0x1a1   :  { %2451 = vmatprep.mubr.msk.f32.mxu0 %vm990_vm12, %v3290_v2  ;;  %2471 = vmatpush3.msk.msra.mxu0 %vm1663_vm11, %v83_v3  ;;  %v1241_v49 = vsel %vm990_vm12, %v3302_v36, 0.0 }
 0x1a2   :  { %2479 = vmatpush3.msk.msra.mxu1 %vm1663_vm11, %v84_v20  ;;  %2486 = vmatprep.subr.msk.mxu0 %vm1663_vm11, %v85_v38 }
 0x1a3   :  { %2467 = vmatprep.mubr.msk.f32.mxu1 %vm990_vm12, %v3302_v36  ;;  %1206 = vadd.xlane.f32.xlu0 %v1205_v54  ;;  %v3312_v21 = vpop.eup %2547 }
 0x1a4   :  { %1209 = vadd.xlane.f32.xlu1 %v1208_v50  ;;  %2494 = vmatprep.subr.msk.mxu1 %vm1663_vm11, %v86_v10  ;;  %v3317_v8 = vpop.eup %2549  ;;  %v1232_v6 = vsel %vm990_vm12, %v3312_v21, 0.0 }
 0x1a5   :  { %2452 = vmatmul.mubr.msk.f32.gmra.mxu0 %vm990_vm12, %v3312_v21  ;;  %v2552_v61 = vpop.eup %2551  ;;  %2468 = vmatmul.mubr.msk.f32.gmra.mxu1 %vm990_vm12, %v3317_v8  ;;  %v1244_v60 = vsel %vm990_vm12, %v3317_v8, 0.0 }
 0x1a6   :  { %2472 = vmatprep.mubr.msk.f32.mxu0 %vm941_vm1, %v3131_v42  ;;  %2480 = vmatprep.mubr.msk.f32.mxu1 %vm941_vm1, %v3163_v9  ;;  %v2554_v39 = vpop.eup %2553  ;;  %v1175_v42 = vsel %vm941_vm1, %v2552_v61, 0.0 }
 0x1a7   :  { %1218 = vadd.xlane.f32.xlu0 %v1217_v37  ;;  %v2556_v41 = vpop.eup %2555  ;;  %v1178_v9 = vsel %vm941_vm1, %v2554_v39, 0.0 }
 0x1a8   :  { %1221 = vadd.xlane.f32.xlu1 %v1220_v22  ;;  %v1187_v44 = vsel %vm941_vm1, %v2556_v41, 0.0 }
 0x1a9   :  { %2473 = vmatmul.mubr.msk.f32.vlgmr.msra.gmra.mxu0 %vm941_vm1, %v3140_v62  ;;  %2481 = vmatmul.mubr.msk.f32.vlgmr.msra.gmra.mxu1 %vm941_vm1, %v3158_v59  ;;  %v2558_v62 = vpop.eup %2557 }
 0x1aa   :  { %2475 = vmatprep.mubr.msk.f32.mxu0 %vm941_vm1, %v3232_v56  ;;  %2487 = vmatpush3.msk.msra.mxu0 %vm1663_vm11, %v85_v38  ;;  %v1190_v59 = vsel %vm941_vm1, %v2558_v62, 0.0  ;;  %v2560_v24 = vpop.eup %2559 }
 0x1ab   :  { %1176 = vadd.xlane.f32.xlu0 %v1175_v42  ;;  %2483 = vmatprep.mubr.msk.f32.mxu1 %vm941_vm1, %v3254_v0  ;;  %v2562_v48 = vpop.eup %2561  ;;  %v1181_v1 = vsel %vm941_vm1, %v2560_v24, 0.0 }
 0x1ac   :  { %2495 = vmatpush3.msk.msra.mxu1 %vm1663_vm11, %v86_v10  ;;  %1179 = vadd.xlane.f32.xlu1 %v1178_v9  ;;  %v2564_v15 = vpop.eup %2563  ;;  %v1193_v27 = vsel %vm941_vm1, %v2562_v48, 0.0 }
 0x1ad   :  { %2476 = vmatmul.mubr.msk.f32.gmra.mxu0 %vm941_vm1, %v3243_v16  ;;  %2484 = vmatmul.mubr.msk.f32.gmra.mxu1 %vm941_vm1, %v3247_v31  ;;  %v2566_v14 = vpop.eup %2565  ;;  %v1184_v47 = vsel %vm941_vm1, %v2564_v15, 0.0 }
 0x1ae   :  { %2488 = vmatprep.mubr.msk.f32.mxu0 %vm941_vm1, %v2552_v61  ;;  %2496 = vmatprep.mubr.msk.f32.mxu1 %vm941_vm1, %v2556_v41  ;;  %v1196_v52 = vsel %vm941_vm1, %v2566_v14, 0.0 }
 0x1af   :  { %1188 = vadd.xlane.f32.xlu0 %v1187_v44 }
 0x1b0   :  { %1191 = vadd.xlane.f32.xlu1 %v1190_v59 }
 0x1b1   :  { %2489 = vmatmul.mubr.msk.f32.vlgmr.msra.gmra.mxu0 %vm941_vm1, %v2554_v39  ;;  %2497 = vmatmul.mubr.msk.f32.vlgmr.msra.gmra.mxu1 %vm941_vm1, %v2558_v62 }
 0x1b2   :  { %2491 = vmatprep.mubr.msk.f32.mxu0 %vm941_vm1, %v2560_v24  ;;  %2499 = vmatprep.mubr.msk.f32.mxu1 %vm941_vm1, %v2562_v48 }
 0x1b3   :  { %1224 = vadd.xlane.f32.xlu0 %v1223_v55 }
 0x1b4   :  { %1227 = vadd.xlane.f32.xlu1 %v1226_v43 }
 0x1b5   :  { %2492 = vmatmul.mubr.msk.f32.gmra.mxu0 %vm941_vm1, %v2564_v15  ;;  %2500 = vmatmul.mubr.msk.f32.gmra.mxu1 %vm941_vm1, %v2566_v14 }
 0x1b7   :  { %1236 = vadd.xlane.f32.xlu0 %v1235_v26 }
 0x1b8   :  { %1239 = vadd.xlane.f32.xlu1 %v1238_v13 }
 0x1bb   :  { %1182 = vadd.xlane.f32.xlu0 %v1181_v1 }
 0x1bc   :  { %1185 = vadd.xlane.f32.xlu1 %v1184_v47 }
 0x1bf   :  { %1194 = vadd.xlane.f32.xlu0 %v1193_v27 }
 0x1c0   :  { %1197 = vadd.xlane.f32.xlu1 %v1196_v52 }
 0x1c3   :  { %1230 = vadd.xlane.f32.xlu0 %v1229_v57 }
 0x1c4   :  { %1233 = vadd.xlane.f32.xlu1 %v1232_v6 }
 0x1c7   :  { %1242 = vadd.xlane.f32.xlu0 %v1241_v49 }
 0x1c8   :  { %1245 = vadd.xlane.f32.xlu1 %v1244_v60 }
 0x212   :  { %v1153_v56 = vpop.xlane.xlu0 %1152 }
 0x214   :  { %v1156_v25 = vpop.xlane.xlu1 %1155 }
 0x218   :  { %v1165_v53 = vpop.xlane.xlu0 %1164 }
 0x219   :  { %v1168_v7 = vpop.xlane.xlu1 %1167 }
 0x21c   :  { %v1201_v16 = vpop.xlane.xlu0 %1200 }
 0x21d   :  { %v1204_v58 = vpop.xlane.xlu1 %1203  ;;  %v1247_v50 = vadd.f32 %v1201_v16, %v1153_v56 }
 0x21e   :  { %v1248_v54 = vadd.f32 %v1204_v58, %v1156_v25 }
 0x220   :  { %v1213_v5 = vpop.xlane.xlu0 %1212  ;;  %2567 = vrcp.f32 %v1248_v54 }
 0x221   :  { %v1216_v31 = vpop.xlane.xlu1 %1215  ;;  %v1251_v8 = vadd.f32 %v1213_v5, %v1165_v53  ;;  %2569 = vrcp.f32 %v1247_v50 }
 0x222   :  { %v1252_v40 = vadd.f32 %v1216_v31, %v1168_v7 }
 0x224   :  { %v1159_v46 = vpop.xlane.xlu0 %1158  ;;  %2571 = vrcp.f32 %v1252_v40 }
 0x225   :  { %v1162_v51 = vpop.xlane.xlu1 %1161  ;;  %2573 = vrcp.f32 %v1251_v8 }
 0x228   :  { %v1171_v0 = vpop.xlane.xlu0 %1170 }
 0x229   :  { %v1174_v3 = vpop.xlane.xlu1 %1173 }
 0x22c   :  { %v1207_v20 = vpop.xlane.xlu0 %1206 }
 0x22d   :  { %v1210_v63 = vpop.xlane.xlu1 %1209  ;;  %v1249_v39 = vadd.f32 %v1207_v20, %v1159_v46  ;;  %v2568_v53 = vpop.eup %2567 }
 0x22e   :  { %v1250_v61 = vadd.f32 %v1210_v63, %v1162_v51  ;;  %v2570_v58 = vpop.eup %2569 }
 0x230   :  { %v1219_v12 = vpop.xlane.xlu0 %1218  ;;  %2575 = vrcp.f32 %v1250_v61 }
 0x231   :  { %v1222_v33 = vpop.xlane.xlu1 %1221  ;;  %v1253_v44 = vadd.f32 %v1219_v12, %v1171_v0  ;;  %2577 = vrcp.f32 %v1249_v39  ;;  %v2572_v51 = vpop.eup %2571 }
 0x232   :  { %v1254_v9 = vadd.f32 %v1222_v33, %v1174_v3  ;;  %v2574_v63 = vpop.eup %2573 }
 0x234   :  { %v1177_v29 = vpop.xlane.xlu0 %1176  ;;  %2579 = vrcp.f32 %v1254_v9 }
 0x235   :  { %v1180_v30 = vpop.xlane.xlu1 %1179  ;;  %2581 = vrcp.f32 %v1253_v44 }
 0x238   :  { %v1189_v32 = vpop.xlane.xlu0 %1188 }
 0x239   :  { %v1192_v4 = vpop.xlane.xlu1 %1191 }
 0x23c   :  { %v1225_v45 = vpop.xlane.xlu0 %1224 }
 0x23d   :  { %v1228_v23 = vpop.xlane.xlu1 %1227  ;;  %v1255_v55 = vadd.f32 %v1225_v45, %v1177_v29  ;;  %v2576_v29 = vpop.eup %2575 }
 0x23e   :  { %v1256_v24 = vadd.f32 %v1228_v23, %v1180_v30  ;;  %v2578_v23 = vpop.eup %2577 }
 0x240   :  { %v1237_v19 = vpop.xlane.xlu0 %1236  ;;  %2583 = vrcp.f32 %v1256_v24 }
 0x241   :  { %v1240_v34 = vpop.xlane.xlu1 %1239  ;;  %v1259_v14 = vadd.f32 %v1237_v19, %v1189_v32  ;;  %2585 = vrcp.f32 %v1255_v55 }
 0x242   :  { %v1260_v15 = vadd.f32 %v1240_v34, %v1192_v4 }
 0x244   :  { %v1183_v35 = vpop.xlane.xlu0 %1182  ;;  %2587 = vrcp.f32 %v1260_v15 }
 0x245   :  { %v1186_v38 = vpop.xlane.xlu1 %1185  ;;  %2589 = vrcp.f32 %v1259_v14 }
 0x248   :  { %v1195_v18 = vpop.xlane.xlu0 %1194 }
 0x249   :  { %v1198_v10 = vpop.xlane.xlu1 %1197 }
 0x24b   :  { %v2418_v2 = vpop.f32.mrf.mxu0 }
 0x24c   :  { %v1231_v62 = vpop.xlane.xlu0 %1230 }
 0x24d   :  { %v1341_v11 = vpop.f32.mrf.mxu0  ;;  %v1234_v22 = vpop.xlane.xlu1 %1233  ;;  %v1257_v27 = vadd.f32 %v1231_v62, %v1183_v35 }
 0x24e   :  { %v1258_v1 = vadd.f32 %v1234_v22, %v1186_v38 }
 0x24f   :  { %v2434_v17 = vpop.f32.mrf.mxu1 }
 0x250   :  { %v1243_v47 = vpop.xlane.xlu0 %1242  ;;  %2591 = vrcp.f32 %v1258_v1 }
 0x251   :  { %v3375_v36 = vpop.f32.mrf.mxu1  ;;  %v1246_v43 = vpop.xlane.xlu1 %1245  ;;  %v1261_v49 = vadd.f32 %v1243_v47, %v1195_v18  ;;  %2593 = vrcp.f32 %v1257_v27 }
 0x252   :  { %v1262_v6 = vadd.f32 %v1246_v43, %v1198_v10 }
 0x254   :  { %2595 = vrcp.f32 %v1262_v6 }
 0x255   :  { %v3377_v28 = vpop.f32.mrf.mxu0  ;;  %2597 = vrcp.f32 %v1261_v49 }
 0x257   :  { %v3379_v21 = vpop.f32.mrf.mxu1  ;;  %v3381_v37 = vpop.f32.mrf.mxu0 }
 0x259   :  { %v3383_v42 = vpop.f32.mrf.mxu1 }
 0x25e   :  { %v3385_v41 = vpop.f32.mrf.mxu0 }
 0x260   :  { %v3387_v59 = vpop.f32.mrf.mxu1  ;;  %v3389_v48 = vpop.f32.mrf.mxu0 }
 0x262   :  { %v3391_v26 = vpop.f32.mrf.mxu1 }
 0x265   :  { %v3393_v13 = vpop.f32.mrf.mxu0  ;;  %v3395_v52 = vpop.f32.mrf.mxu1 }
 0x267   :  { %v3397_v57 = vpop.f32.mrf.mxu0  ;;  %v3399_v60 = vpop.f32.mrf.mxu1 }
 0x269   :  { %v2474_v56 = vpop.f32.mrf.mxu0  ;;  %v2482_v7 = vpop.f32.mrf.mxu1 }
 0x26a   :  { %v1739_v25 = vadd.f32 %v2474_v56, %v2418_v2  ;;  %v1839_v31 = vadd.f32 %v2482_v7, %v2434_v17  ;;  %v2580_v2 = vpop.eup %2579 }
 0x26b   :  { %v1733_v16 = vpop.f32.mrf.mxu0  ;;  %v1833_v3 = vpop.f32.mrf.mxu1 }
 0x26c   :  { %v2069_v5 = vmul.f32 %v2568_v53, %v1739_v25  ;;  %v1734_v46 = vadd.f32 %v1733_v16, %v1341_v11  ;;  %v2073_v20 = vmul.f32 %v2572_v51, %v1839_v31  ;;  %v1834_v12 = vadd.f32 %v1833_v3, %v3375_v36  ;;  %v2582_v11 = vpop.eup %2581 }
 0x26d   :  { %v2477_v0 = vpop.f32.mrf.mxu0  ;;  %v2485_v4 = vpop.f32.mrf.mxu1 }
 0x26e   :  { %2085 = vst.msk [vmem:[%s3483_s5 + $0x8] sm:$0xff] %vm87_vm0, %v2069_v5  ;;  %v2068_v33 = vmul.f32 %v2570_v58, %v1734_v46  ;;  %v1749_v30 = vadd.f32 %v2477_v0, %v3377_v28  ;;  %2089 = vst.msk [vmem:[%s3483_s5 + $0x28] sm:$0xff] %vm87_vm0, %v2073_v20  ;;  %v2072_v45 = vmul.f32 %v2574_v63, %v1834_v12  ;;  %v2584_v18 = vpop.eup %2583 }
 0x26f   :  { %v1743_v32 = vpop.f32.mrf.mxu0  ;;  %v1849_v19 = vadd.f32 %v2485_v4, %v3379_v21  ;;  %v1843_v35 = vpop.f32.mrf.mxu1 }
 0x270   :  { %2084 = vst.msk [vmem:[%s3483_s5] sm:$0xff] %vm87_vm0, %v2068_v33  ;;  %v2071_v34 = vmul.f32 %v2576_v29, %v1749_v30  ;;  %v1744_v38 = vadd.f32 %v1743_v32, %v3381_v37  ;;  %2088 = vst.msk [vmem:[%s3483_s5 + $0x20] sm:$0xff] %vm87_vm0, %v2072_v45  ;;  %v1844_v28 = vadd.f32 %v1843_v35, %v3383_v42  ;;  %v2586_v40 = vpop.eup %2585 }
 0x271   :  { %v2490_v17 = vpop.f32.mrf.mxu0  ;;  %v2075_v10 = vmul.f32 %v2580_v2, %v1849_v19  ;;  %v2498_v50 = vpop.f32.mrf.mxu1 }
 0x272   :  { %2087 = vst.msk [vmem:[%s3483_s5 + $0x18] sm:$0xff] %vm87_vm0, %v2071_v34  ;;  %v2070_v36 = vmul.f32 %v2578_v23, %v1744_v38  ;;  %v1939_v54 = vadd.f32 %v2490_v17, %v3385_v41  ;;  %v2074_v8 = vmul.f32 %v2582_v11, %v1844_v28  ;;  %v2039_v61 = vadd.f32 %v2498_v50, %v3387_v59  ;;  %v2588_v39 = vpop.eup %2587 }
 0x273   :  { %v1933_v21 = vpop.f32.mrf.mxu0  ;;  %2091 = vst.msk [vmem:[%s3483_s5 + $0x38] sm:$0xff] %vm87_vm0, %v2075_v10  ;;  %v2033_v42 = vpop.f32.mrf.mxu1 }
 0x274   :  { %2086 = vst.msk [vmem:[%s3483_s5 + $0x10] sm:$0xff] %vm87_vm0, %v2070_v36  ;;  %v2077_v37 = vmul.f32 %v2584_v18, %v1939_v54  ;;  %v1934_v22 = vadd.f32 %v1933_v21, %v3389_v48  ;;  %v2590_v9 = vpop.eup %2589  ;;  %2090 = vst.msk [vmem:[%s3483_s5 + $0x30] sm:$0xff] %vm87_vm0, %v2074_v8  ;;  %v2081_v62 = vmul.f32 %v2588_v39, %v2039_v61 }
 0x275   :  { %v2493_v41 = vpop.f32.mrf.mxu0  ;;  %v2034_v59 = vadd.f32 %v2033_v42, %v3391_v26  ;;  %v2592_v55 = vpop.eup %2591 }
 0x276   :  { %2093 = vst.msk [vmem:[%s3483_s5 + $0x48] sm:$0xff] %vm87_vm0, %v2077_v37  ;;  %v2076_v44 = vmul.f32 %v2586_v40, %v1934_v22  ;;  %v1949_v24 = vadd.f32 %v2493_v41, %v3393_v13  ;;  %v2501_v48 = vpop.f32.mrf.mxu1  ;;  %v2594_v43 = vpop.eup %2593  ;;  %2097 = vst.msk [vmem:[%s3483_s5 + $0x68] sm:$0xff] %vm87_vm0, %v2081_v62 }
 0x277   :  { %v1943_v15 = vpop.f32.mrf.mxu0  ;;  %v2080_v14 = vmul.f32 %v2590_v9, %v2034_v59  ;;  %v2049_v26 = vadd.f32 %v2501_v48, %v3395_v52  ;;  %v2596_v47 = vpop.eup %2595 }
 0x278   :  { %2092 = vst.msk [vmem:[%s3483_s5 + $0x40] sm:$0xff] %vm87_vm0, %v2076_v44  ;;  %v2079_v1 = vmul.f32 %v2592_v55, %v1949_v24  ;;  %v1944_v13 = vadd.f32 %v1943_v15, %v3397_v57  ;;  %v2043_v27 = vpop.f32.mrf.mxu1  ;;  %v2598_v6 = vpop.eup %2597 }
 0x279   :  { %2096 = vst.msk [vmem:[%s3483_s5 + $0x60] sm:$0xff] %vm87_vm0, %v2080_v14  ;;  %v2083_v49 = vmul.f32 %v2596_v47, %v2049_v26  ;;  %v2044_v25 = vadd.f32 %v2043_v27, %v3399_v60 }
 0x27a   :  { %2095 = vst.msk [vmem:[%s3483_s5 + $0x58] sm:$0xff] %vm87_vm0, %v2079_v1  ;;  %v2078_v56 = vmul.f32 %v2594_v43, %v1944_v13 }
 0x27b   :  { %2099 = vst.msk [vmem:[%s3483_s5 + $0x78] sm:$0xff] %vm87_vm0, %v2083_v49  ;;  %v2082_v52 = vmul.f32 %v2598_v6, %v2044_v25 }
 0x27c   :  { %2094 = vst.msk [vmem:[%s3483_s5 + $0x50] sm:$0xff] %vm87_vm0, %v2078_v56 }
 0x27d   :  { %2098 = vst.msk [vmem:[%s3483_s5 + $0x70] sm:$0xff] %vm87_vm0, %v2082_v52 }

</bundles_post_ra>
